<compile_context>
chip_gen: v7x
topology: tpu7x:2x2x1
jax: 0.10.0
libtpu: 0.0.40
codegen_flags: <defaults>
</compile_context>

<pallas_src>
import math
from functools import partial

import jax
import jax.numpy as jnp
from jax.experimental import pallas as pl
from jax.experimental.pallas import tpu as pltpu

EMBED_DIM = 512          # fixed by the module (nn.Linear(512, 512))
LN_EPS = 1e-5            # torch.nn.LayerNorm default


def _layernorm(x, w, b):
    # one-pass mean / variance: var = E[x^2] - E[x]^2
    mu = jnp.mean(x, axis=-1, keepdims=True)
    m2 = jnp.mean(x * x, axis=-1, keepdims=True)
    var = m2 - mu * mu
    return (x - mu) * jax.lax.rsqrt(var + LN_EPS) * w + b


def alignment_kernel(text_ref, video_ref,
                     ln1w_ref, ln1b_ref, ln2w_ref, ln2b_ref, ln3w_ref, ln3b_ref,
                     wq_ref, bq_ref, wkv_ref, bkv_ref,
                     wo_ref, bo_ref, wl_ref, bl_ref,
                     out_ref):
    D = text_ref.shape[-1]
    inv_sqrt_d = 1.0 / math.sqrt(D)

    ln1w, ln1b = ln1w_ref[...], ln1b_ref[...]

    # layer_norm1 on both modalities (shared weights, as in the module)
    t = _layernorm(text_ref[...], ln1w, ln1b)                     # (B, D)   f32
    vn = _layernorm(video_ref[...], ln1w, ln1b)                   # (B, F, D) f32

    B, F, _ = vn.shape
    v_flat = vn.reshape(B * F, D)                                 # (B*F, D)

    # Projections: bf16 weights, bf16 activations at the dot, f32 accumulation.
    # K|V fused into one (D, 2D) weight -> single MXU pass over the video tokens.
    q = (jnp.dot(t.astype(jnp.bfloat16), wq_ref[...],
                 preferred_element_type=jnp.float32) + bq_ref[...])          # (B, D)
    kv = (jnp.dot(v_flat.astype(jnp.bfloat16), wkv_ref[...],
                  preferred_element_type=jnp.float32) + bkv_ref[...])        # (B*F, 2D)
    k = kv[:, 0:D].reshape(B, F, D)                                          # (B, F, D)
    v = kv[:, D:2 * D].reshape(B, F, D)                                      # (B, F, D)

    # Attention logits on the MXU: (B,1,D) x (B,F,D) contracted over D, batch over B.
    logits = jax.lax.dot_general(
        q[:, None, :], k,
        dimension_numbers=(((2,), (2,)), ((0,), (0,))),
        preferred_element_type=jnp.float32)[:, 0, :] * inv_sqrt_d            # (B, F)

    # softmax over frames (EUP exp, approx reciprocal for the denominator)
    m = jnp.max(logits, axis=-1, keepdims=True)
    e = jnp.exp(logits - m)
    attn_w = e * pl.reciprocal(jnp.sum(e, axis=-1, keepdims=True), approx=True)  # (B, F)

    # Weighted sum over frames on the MXU: (B,1,F) x (B,F,D) -> (B,D)
    attn = jax.lax.dot_general(
        attn_w[:, None, :], v,
        dimension_numbers=(((2,), (1,)), ((0,), (0,))),
        preferred_element_type=jnp.float32)[:, 0, :]                         # (B, D)

    attn = (jnp.dot(attn.astype(jnp.bfloat16), wo_ref[...],
                    preferred_element_type=jnp.float32) + bo_ref[...])
    attn_out = _layernorm(attn, ln2w_ref[...], ln2b_ref[...])                # (B, D)

    lin = (jnp.dot(attn_out.astype(jnp.bfloat16), wl_ref[...],
                   preferred_element_type=jnp.float32) + bl_ref[...])
    # dropout is identity in eval mode
    vid = _layernorm(attn_out + lin, ln3w_ref[...], ln3b_ref[...])           # (B, D)

    # Cosine-normalize; similarity as an NT dot_general (no explicit transpose).
    # tiny eps guards an all-zero row (torch would NaN there too; harmless otherwise).
    t_n = t * jax.lax.rsqrt(jnp.sum(t * t, axis=-1, keepdims=True) + 1e-12)
    v_n = vid * jax.lax.rsqrt(jnp.sum(vid * vid, axis=-1, keepdims=True) + 1e-12)
    out_ref[...] = jax.lax.dot_general(
        t_n, v_n,
        dimension_numbers=(((1,), (1,)), ((), ())),
        preferred_element_type=jnp.float32)                                  # (B, B)


def make_params(dtype=jnp.float32):
    """Deterministic params mirroring alignmentMedium._init_parameters:
    projection / linear weights = identity, biases = 0, LayerNorm gamma=1 beta=0."""
    D = EMBED_DIM
    eye = jnp.eye(D, dtype=dtype)           # (in, out) layout; identity is symmetric
    zeros_row = jnp.zeros((1, D), dtype=dtype)
    ones_row = jnp.ones((1, D), dtype=dtype)
    return dict(
        ln1w=ones_row, ln1b=zeros_row,
        ln2w=ones_row, ln2b=zeros_row,
        ln3w=ones_row, ln3b=zeros_row,
        wq=eye, bq=zeros_row,
        wk=eye, bk=zeros_row,
        wv=eye, bv=zeros_row,
        wo=eye, bo=zeros_row,
        wl=eye, bl=zeros_row,
    )


def prepare_kernel_params(params):
    """Pre-fuse K|V and cast the 512x512 projection weights to bf16.
    Call once and reuse across forward calls (weights dominate the DMA cost)."""
    return dict(
        ln1w=params["ln1w"], ln1b=params["ln1b"],
        ln2w=params["ln2w"], ln2b=params["ln2b"],
        ln3w=params["ln3w"], ln3b=params["ln3b"],
        wq=params["wq"].astype(jnp.bfloat16), bq=params["bq"],
        wkv=jnp.concatenate([params["wk"], params["wv"]], axis=1).astype(jnp.bfloat16),
        bkv=jnp.concatenate([params["bk"], params["bv"]], axis=1),
        wo=params["wo"].astype(jnp.bfloat16), bo=params["bo"],
        wl=params["wl"].astype(jnp.bfloat16), bl=params["bl"],
    )


@jax.jit
def alignment_medium_forward(text_embeds, video_embeds, kparams):
    B, D = text_embeds.shape
    assert D == EMBED_DIM
    assert video_embeds.shape[0] == B and video_embeds.shape[2] == D

    ordered = [
        text_embeds, video_embeds,
        kparams["ln1w"], kparams["ln1b"],
        kparams["ln2w"], kparams["ln2b"],
        kparams["ln3w"], kparams["ln3b"],
        kparams["wq"], kparams["bq"],
        kparams["wkv"], kparams["bkv"],
        kparams["wo"], kparams["bo"],
        kparams["wl"], kparams["bl"],
    ]
    vmem_spec = pl.BlockSpec(memory_space=pltpu.MemorySpace.VMEM)
    return pl.pallas_call(
        alignment_kernel,
        out_shape=jax.ShapeDtypeStruct((B, B), jnp.float32),
        in_specs=[vmem_spec] * len(ordered),
        out_specs=vmem_spec,
    )(*ordered)


def _reference_forward(text_embeds, video_embeds, params):
    """Pure-JAX f32 reference matching the PyTorch forward (eval mode)."""
    t = _layernorm(text_embeds, params["ln1w"], params["ln1b"])
    vn = _layernorm(video_embeds, params["ln1w"], params["ln1b"])
    q = t @ params["wq"] + params["bq"]
    k = vn @ params["wk"] + params["bk"]
    v = vn @ params["wv"] + params["bv"]
    logits = jnp.einsum("bd,bfd->bf", q, k) / math.sqrt(EMBED_DIM)
    w = jax.nn.softmax(logits, axis=-1)
    attn = jnp.einsum("bf,bfd->bd", w, v)
    attn = attn @ params["wo"] + params["bo"]
    attn_out = _layernorm(attn, params["ln2w"], params["ln2b"])
    lin = attn_out @ params["wl"] + params["bl"]
    vid = _layernorm(attn_out + lin, params["ln3w"], params["ln3b"])
    t_n = t / jnp.linalg.norm(t, axis=-1, keepdims=True)
    v_n = vid / jnp.linalg.norm(vid, axis=-1, keepdims=True)
    return t_n @ v_n.T


if __name__ == "__main__":
    B, F, D = 8, 8, EMBED_DIM   # small batch / frame count; D fixed by module

    key = jax.random.PRNGKey(0)
    k_text, k_video = jax.random.split(key)
    text_embeds = jax.random.normal(k_text, (B, D), dtype=jnp.float32)
    video_embeds = jax.random.normal(k_video, (B, F, D), dtype=jnp.float32)

    params = make_params()
    kparams = prepare_kernel_params(params)

    sims = alignment_medium_forward(text_embeds, video_embeds, kparams)
    sims = jax.block_until_ready(sims)

    ref = _reference_forward(text_embeds, video_embeds, params)
    assert sims.shape == (B, B)
    # bf16 weights / bf16 dot inputs -> looser tolerance vs the f32 reference
    assert jnp.allclose(sims, ref, atol=2e-2, rtol=2e-2), "mismatch vs reference"

    print("KERNEL_OK")
</pallas_src>

<mosaic_0001>
module attributes {stable_mosaic.version = 11 : i64} {
  func.func @alignment_kernel(%arg0: memref<8x512xf32, #tpu.memory_space<vmem>>, %arg1: memref<8x8x512xf32, #tpu.memory_space<vmem>>, %arg2: memref<1x512xf32, #tpu.memory_space<vmem>>, %arg3: memref<1x512xf32, #tpu.memory_space<vmem>>, %arg4: memref<1x512xf32, #tpu.memory_space<vmem>>, %arg5: memref<1x512xf32, #tpu.memory_space<vmem>>, %arg6: memref<1x512xf32, #tpu.memory_space<vmem>>, %arg7: memref<1x512xf32, #tpu.memory_space<vmem>>, %arg8: memref<512x512xbf16, #tpu.memory_space<vmem>>, %arg9: memref<1x512xf32, #tpu.memory_space<vmem>>, %arg10: memref<512x1024xbf16, #tpu.memory_space<vmem>>, %arg11: memref<1x1024xf32, #tpu.memory_space<vmem>>, %arg12: memref<512x512xbf16, #tpu.memory_space<vmem>>, %arg13: memref<1x512xf32, #tpu.memory_space<vmem>>, %arg14: memref<512x512xbf16, #tpu.memory_space<vmem>>, %arg15: memref<1x512xf32, #tpu.memory_space<vmem>>, %arg16: memref<8x8xf32, #tpu.memory_space<vmem>>) attributes {dimension_semantics = [], scalar_prefetch = 0 : i64, scratch_operands = 0 : i64, tpu.core_type = #tpu.core_type<tc>} {
    %c0 = arith.constant 0 : index
    %c0_0 = arith.constant 0 : index
    %0 = vector.load %arg2[%c0, %c0_0] : memref<1x512xf32, #tpu.memory_space<vmem>>, vector<1x512xf32>
    %c0_1 = arith.constant 0 : index
    %c0_2 = arith.constant 0 : index
    %1 = vector.load %arg3[%c0_1, %c0_2] : memref<1x512xf32, #tpu.memory_space<vmem>>, vector<1x512xf32>
    %c0_3 = arith.constant 0 : index
    %c0_4 = arith.constant 0 : index
    %2 = vector.load %arg0[%c0_3, %c0_4] : memref<8x512xf32, #tpu.memory_space<vmem>>, vector<8x512xf32>
    %cst = arith.constant dense<0.000000e+00> : vector<8xf32>
    %3 = vector.multi_reduction <add>, %2, %cst [1] : vector<8x512xf32> to vector<8xf32>
    %4 = vector.shape_cast %3 : vector<8xf32> to vector<8x1xf32>
    %cst_5 = arith.constant 5.120000e+02 : f32
    %5 = vector.broadcast %cst_5 : f32 to vector<8x1xf32>
    %6 = arith.divf %4, %5 : vector<8x1xf32>
    %7 = arith.mulf %2, %2 : vector<8x512xf32>
    %cst_6 = arith.constant dense<0.000000e+00> : vector<8xf32>
    %8 = vector.multi_reduction <add>, %7, %cst_6 [1] : vector<8x512xf32> to vector<8xf32>
    %9 = vector.shape_cast %8 : vector<8xf32> to vector<8x1xf32>
    %cst_7 = arith.constant 5.120000e+02 : f32
    %10 = vector.broadcast %cst_7 : f32 to vector<8x1xf32>
    %11 = arith.divf %9, %10 : vector<8x1xf32>
    %12 = arith.mulf %6, %6 : vector<8x1xf32>
    %13 = arith.subf %11, %12 : vector<8x1xf32>
    %14 = vector.broadcast %6 : vector<8x1xf32> to vector<8x512xf32>
    %15 = arith.subf %2, %14 : vector<8x512xf32>
    %cst_8 = arith.constant 9.99999974E-6 : f32
    %16 = vector.broadcast %cst_8 : f32 to vector<8x1xf32>
    %17 = arith.addf %13, %16 : vector<8x1xf32>
    %18 = math.rsqrt %17 : vector<8x1xf32>
    %19 = vector.broadcast %18 : vector<8x1xf32> to vector<8x512xf32>
    %20 = arith.mulf %15, %19 : vector<8x512xf32>
    %21 = vector.broadcast %0 : vector<1x512xf32> to vector<8x512xf32>
    %22 = arith.mulf %20, %21 : vector<8x512xf32>
    %23 = vector.broadcast %1 : vector<1x512xf32> to vector<8x512xf32>
    %24 = arith.addf %22, %23 : vector<8x512xf32>
    %c0_9 = arith.constant 0 : index
    %c0_10 = arith.constant 0 : index
    %c0_11 = arith.constant 0 : index
    %25 = vector.load %arg1[%c0_9, %c0_10, %c0_11] : memref<8x8x512xf32, #tpu.memory_space<vmem>>, vector<8x8x512xf32>
    %cst_12 = arith.constant dense<0.000000e+00> : vector<8x8xf32>
    %26 = vector.multi_reduction <add>, %25, %cst_12 [2] : vector<8x8x512xf32> to vector<8x8xf32>
    %27 = vector.shape_cast %26 : vector<8x8xf32> to vector<8x8x1xf32>
    %cst_13 = arith.constant 5.120000e+02 : f32
    %28 = vector.broadcast %cst_13 : f32 to vector<8x8x1xf32>
    %29 = arith.divf %27, %28 : vector<8x8x1xf32>
    %30 = arith.mulf %25, %25 : vector<8x8x512xf32>
    %cst_14 = arith.constant dense<0.000000e+00> : vector<8x8xf32>
    %31 = vector.multi_reduction <add>, %30, %cst_14 [2] : vector<8x8x512xf32> to vector<8x8xf32>
    %32 = vector.shape_cast %31 : vector<8x8xf32> to vector<8x8x1xf32>
    %cst_15 = arith.constant 5.120000e+02 : f32
    %33 = vector.broadcast %cst_15 : f32 to vector<8x8x1xf32>
    %34 = arith.divf %32, %33 : vector<8x8x1xf32>
    %35 = arith.mulf %29, %29 : vector<8x8x1xf32>
    %36 = arith.subf %34, %35 : vector<8x8x1xf32>
    %37 = vector.broadcast %29 : vector<8x8x1xf32> to vector<8x8x512xf32>
    %38 = arith.subf %25, %37 : vector<8x8x512xf32>
    %cst_16 = arith.constant 9.99999974E-6 : f32
    %39 = vector.broadcast %cst_16 : f32 to vector<8x8x1xf32>
    %40 = arith.addf %36, %39 : vector<8x8x1xf32>
    %41 = math.rsqrt %40 : vector<8x8x1xf32>
    %42 = vector.broadcast %41 : vector<8x8x1xf32> to vector<8x8x512xf32>
    %43 = arith.mulf %38, %42 : vector<8x8x512xf32>
    %44 = vector.shape_cast %0 : vector<1x512xf32> to vector<1x1x512xf32>
    %45 = vector.broadcast %44 : vector<1x1x512xf32> to vector<8x8x512xf32>
    %46 = arith.mulf %43, %45 : vector<8x8x512xf32>
    %47 = vector.shape_cast %1 : vector<1x512xf32> to vector<1x1x512xf32>
    %48 = vector.broadcast %47 : vector<1x1x512xf32> to vector<8x8x512xf32>
    %49 = arith.addf %46, %48 : vector<8x8x512xf32>
    %50 = vector.shape_cast %49 : vector<8x8x512xf32> to vector<64x512xf32>
    %51 = arith.truncf %24 : vector<8x512xf32> to vector<8x512xbf16>
    %c0_17 = arith.constant 0 : index
    %c0_18 = arith.constant 0 : index
    %52 = vector.load %arg8[%c0_17, %c0_18] : memref<512x512xbf16, #tpu.memory_space<vmem>>, vector<512x512xbf16>
    %cst_19 = arith.constant dense<0.000000e+00> : vector<8x512xf32>
    %53 = tpu.matmul %51, %52, %cst_19 {dimension_numbers = #tpu.dot_dimension_numbers<[1], [0], [0], [1], [0, 0, 1, 1], [], []>} : vector<8x512xbf16>, vector<512x512xbf16>, vector<8x512xf32> -> vector<8x512xf32>
    %c0_20 = arith.constant 0 : index
    %c0_21 = arith.constant 0 : index
    %54 = vector.load %arg9[%c0_20, %c0_21] : memref<1x512xf32, #tpu.memory_space<vmem>>, vector<1x512xf32>
    %55 = vector.broadcast %54 : vector<1x512xf32> to vector<8x512xf32>
    %56 = arith.addf %53, %55 : vector<8x512xf32>
    %57 = arith.truncf %50 : vector<64x512xf32> to vector<64x512xbf16>
    %c0_22 = arith.constant 0 : index
    %c0_23 = arith.constant 0 : index
    %58 = vector.load %arg10[%c0_22, %c0_23] : memref<512x1024xbf16, #tpu.memory_space<vmem>>, vector<512x1024xbf16>
    %cst_24 = arith.constant dense<0.000000e+00> : vector<64x1024xf32>
    %59 = tpu.matmul %57, %58, %cst_24 {dimension_numbers = #tpu.dot_dimension_numbers<[1], [0], [0], [1], [0, 0, 1, 1], [], []>} : vector<64x512xbf16>, vector<512x1024xbf16>, vector<64x1024xf32> -> vector<64x1024xf32>
    %c0_25 = arith.constant 0 : index
    %c0_26 = arith.constant 0 : index
    %60 = vector.load %arg11[%c0_25, %c0_26] : memref<1x1024xf32, #tpu.memory_space<vmem>>, vector<1x1024xf32>
    %61 = vector.broadcast %60 : vector<1x1024xf32> to vector<64x1024xf32>
    %62 = arith.addf %59, %61 : vector<64x1024xf32>
    %63 = vector.extract_strided_slice %62 {offsets = [0, 0], sizes = [64, 512], strides = [1, 1]} : vector<64x1024xf32> to vector<64x512xf32>
    %64 = vector.shape_cast %63 : vector<64x512xf32> to vector<8x8x512xf32>
    %65 = vector.extract_strided_slice %62 {offsets = [0, 512], sizes = [64, 512], strides = [1, 1]} : vector<64x1024xf32> to vector<64x512xf32>
    %66 = vector.shape_cast %65 : vector<64x512xf32> to vector<8x8x512xf32>
    %67 = vector.shape_cast %56 : vector<8x512xf32> to vector<8x1x512xf32>
    %cst_27 = arith.constant dense<0.000000e+00> : vector<8x1x8xf32>
    %68 = tpu.matmul %67, %64, %cst_27 {dimension_numbers = #tpu.dot_dimension_numbers<[2], [2], [1], [1], [0, 0, 0, 1, 1, 1], [0], [0]>} : vector<8x1x512xf32>, vector<8x8x512xf32>, vector<8x1x8xf32> -> vector<8x1x8xf32>
    %69 = vector.shape_cast %68 : vector<8x1x8xf32> to vector<8x8xf32>
    %cst_28 = arith.constant 0.0441941731 : f32
    %70 = vector.broadcast %cst_28 : f32 to vector<8x8xf32>
    %71 = arith.mulf %69, %70 : vector<8x8xf32>
    %cst_29 = arith.constant dense<0xFF800000> : vector<8xf32>
    %72 = vector.multi_reduction <maximumf>, %71, %cst_29 [1] : vector<8x8xf32> to vector<8xf32>
    %73 = vector.shape_cast %72 : vector<8xf32> to vector<8x1xf32>
    %74 = vector.broadcast %73 : vector<8x1xf32> to vector<8x8xf32>
    %75 = arith.subf %71, %74 : vector<8x8xf32>
    %76 = math.exp %75 : vector<8x8xf32>
    %cst_30 = arith.constant dense<0.000000e+00> : vector<8xf32>
    %77 = vector.multi_reduction <add>, %76, %cst_30 [1] : vector<8x8xf32> to vector<8xf32>
    %78 = vector.shape_cast %77 : vector<8xf32> to vector<8x1xf32>
    %79 = tpu.reciprocal %78 {approx = true} : vector<8x1xf32> -> vector<8x1xf32>
    %80 = vector.broadcast %79 : vector<8x1xf32> to vector<8x8xf32>
    %81 = arith.mulf %76, %80 : vector<8x8xf32>
    %82 = vector.shape_cast %81 : vector<8x8xf32> to vector<8x1x8xf32>
    %cst_31 = arith.constant dense<0.000000e+00> : vector<8x1x512xf32>
    %83 = tpu.matmul %82, %66, %cst_31 {dimension_numbers = #tpu.dot_dimension_numbers<[2], [1], [1], [2], [0, 0, 0, 1, 1, 2], [0], [0]>} : vector<8x1x8xf32>, vector<8x8x512xf32>, vector<8x1x512xf32> -> vector<8x1x512xf32>
    %84 = vector.shape_cast %83 : vector<8x1x512xf32> to vector<8x512xf32>
    %85 = arith.truncf %84 : vector<8x512xf32> to vector<8x512xbf16>
    %c0_32 = arith.constant 0 : index
    %c0_33 = arith.constant 0 : index
    %86 = vector.load %arg12[%c0_32, %c0_33] : memref<512x512xbf16, #tpu.memory_space<vmem>>, vector<512x512xbf16>
    %cst_34 = arith.constant dense<0.000000e+00> : vector<8x512xf32>
    %87 = tpu.matmul %85, %86, %cst_34 {dimension_numbers = #tpu.dot_dimension_numbers<[1], [0], [0], [1], [0, 0, 1, 1], [], []>} : vector<8x512xbf16>, vector<512x512xbf16>, vector<8x512xf32> -> vector<8x512xf32>
    %c0_35 = arith.constant 0 : index
    %c0_36 = arith.constant 0 : index
    %88 = vector.load %arg13[%c0_35, %c0_36] : memref<1x512xf32, #tpu.memory_space<vmem>>, vector<1x512xf32>
    %89 = vector.broadcast %88 : vector<1x512xf32> to vector<8x512xf32>
    %90 = arith.addf %87, %89 : vector<8x512xf32>
    %c0_37 = arith.constant 0 : index
    %c0_38 = arith.constant 0 : index
    %91 = vector.load %arg4[%c0_37, %c0_38] : memref<1x512xf32, #tpu.memory_space<vmem>>, vector<1x512xf32>
    %c0_39 = arith.constant 0 : index
    %c0_40 = arith.constant 0 : index
    %92 = vector.load %arg5[%c0_39, %c0_40] : memref<1x512xf32, #tpu.memory_space<vmem>>, vector<1x512xf32>
    %cst_41 = arith.constant dense<0.000000e+00> : vector<8xf32>
    %93 = vector.multi_reduction <add>, %90, %cst_41 [1] : vector<8x512xf32> to vector<8xf32>
    %94 = vector.shape_cast %93 : vector<8xf32> to vector<8x1xf32>
    %cst_42 = arith.constant 5.120000e+02 : f32
    %95 = vector.broadcast %cst_42 : f32 to vector<8x1xf32>
    %96 = arith.divf %94, %95 : vector<8x1xf32>
    %97 = arith.mulf %90, %90 : vector<8x512xf32>
    %cst_43 = arith.constant dense<0.000000e+00> : vector<8xf32>
    %98 = vector.multi_reduction <add>, %97, %cst_43 [1] : vector<8x512xf32> to vector<8xf32>
    %99 = vector.shape_cast %98 : vector<8xf32> to vector<8x1xf32>
    %cst_44 = arith.constant 5.120000e+02 : f32
    %100 = vector.broadcast %cst_44 : f32 to vector<8x1xf32>
    %101 = arith.divf %99, %100 : vector<8x1xf32>
    %102 = arith.mulf %96, %96 : vector<8x1xf32>
    %103 = arith.subf %101, %102 : vector<8x1xf32>
    %104 = vector.broadcast %96 : vector<8x1xf32> to vector<8x512xf32>
    %105 = arith.subf %90, %104 : vector<8x512xf32>
    %cst_45 = arith.constant 9.99999974E-6 : f32
    %106 = vector.broadcast %cst_45 : f32 to vector<8x1xf32>
    %107 = arith.addf %103, %106 : vector<8x1xf32>
    %108 = math.rsqrt %107 : vector<8x1xf32>
    %109 = vector.broadcast %108 : vector<8x1xf32> to vector<8x512xf32>
    %110 = arith.mulf %105, %109 : vector<8x512xf32>
    %111 = vector.broadcast %91 : vector<1x512xf32> to vector<8x512xf32>
    %112 = arith.mulf %110, %111 : vector<8x512xf32>
    %113 = vector.broadcast %92 : vector<1x512xf32> to vector<8x512xf32>
    %114 = arith.addf %112, %113 : vector<8x512xf32>
    %115 = arith.truncf %114 : vector<8x512xf32> to vector<8x512xbf16>
    %c0_46 = arith.constant 0 : index
    %c0_47 = arith.constant 0 : index
    %116 = vector.load %arg14[%c0_46, %c0_47] : memref<512x512xbf16, #tpu.memory_space<vmem>>, vector<512x512xbf16>
    %cst_48 = arith.constant dense<0.000000e+00> : vector<8x512xf32>
    %117 = tpu.matmul %115, %116, %cst_48 {dimension_numbers = #tpu.dot_dimension_numbers<[1], [0], [0], [1], [0, 0, 1, 1], [], []>} : vector<8x512xbf16>, vector<512x512xbf16>, vector<8x512xf32> -> vector<8x512xf32>
    %c0_49 = arith.constant 0 : index
    %c0_50 = arith.constant 0 : index
    %118 = vector.load %arg15[%c0_49, %c0_50] : memref<1x512xf32, #tpu.memory_space<vmem>>, vector<1x512xf32>
    %119 = vector.broadcast %118 : vector<1x512xf32> to vector<8x512xf32>
    %120 = arith.addf %117, %119 : vector<8x512xf32>
    %121 = arith.addf %114, %120 : vector<8x512xf32>
    %c0_51 = arith.constant 0 : index
    %c0_52 = arith.constant 0 : index
    %122 = vector.load %arg6[%c0_51, %c0_52] : memref<1x512xf32, #tpu.memory_space<vmem>>, vector<1x512xf32>
    %c0_53 = arith.constant 0 : index
    %c0_54 = arith.constant 0 : index
    %123 = vector.load %arg7[%c0_53, %c0_54] : memref<1x512xf32, #tpu.memory_space<vmem>>, vector<1x512xf32>
    %cst_55 = arith.constant dense<0.000000e+00> : vector<8xf32>
    %124 = vector.multi_reduction <add>, %121, %cst_55 [1] : vector<8x512xf32> to vector<8xf32>
    %125 = vector.shape_cast %124 : vector<8xf32> to vector<8x1xf32>
    %cst_56 = arith.constant 5.120000e+02 : f32
    %126 = vector.broadcast %cst_56 : f32 to vector<8x1xf32>
    %127 = arith.divf %125, %126 : vector<8x1xf32>
    %128 = arith.mulf %121, %121 : vector<8x512xf32>
    %cst_57 = arith.constant dense<0.000000e+00> : vector<8xf32>
    %129 = vector.multi_reduction <add>, %128, %cst_57 [1] : vector<8x512xf32> to vector<8xf32>
    %130 = vector.shape_cast %129 : vector<8xf32> to vector<8x1xf32>
    %cst_58 = arith.constant 5.120000e+02 : f32
    %131 = vector.broadcast %cst_58 : f32 to vector<8x1xf32>
    %132 = arith.divf %130, %131 : vector<8x1xf32>
    %133 = arith.mulf %127, %127 : vector<8x1xf32>
    %134 = arith.subf %132, %133 : vector<8x1xf32>
    %135 = vector.broadcast %127 : vector<8x1xf32> to vector<8x512xf32>
    %136 = arith.subf %121, %135 : vector<8x512xf32>
    %cst_59 = arith.constant 9.99999974E-6 : f32
    %137 = vector.broadcast %cst_59 : f32 to vector<8x1xf32>
    %138 = arith.addf %134, %137 : vector<8x1xf32>
    %139 = math.rsqrt %138 : vector<8x1xf32>
    %140 = vector.broadcast %139 : vector<8x1xf32> to vector<8x512xf32>
    %141 = arith.mulf %136, %140 : vector<8x512xf32>
    %142 = vector.broadcast %122 : vector<1x512xf32> to vector<8x512xf32>
    %143 = arith.mulf %141, %142 : vector<8x512xf32>
    %144 = vector.broadcast %123 : vector<1x512xf32> to vector<8x512xf32>
    %145 = arith.addf %143, %144 : vector<8x512xf32>
    %146 = arith.mulf %24, %24 : vector<8x512xf32>
    %cst_60 = arith.constant dense<0.000000e+00> : vector<8xf32>
    %147 = vector.multi_reduction <add>, %146, %cst_60 [1] : vector<8x512xf32> to vector<8xf32>
    %148 = vector.shape_cast %147 : vector<8xf32> to vector<8x1xf32>
    %cst_61 = arith.constant 9.99999996E-13 : f32
    %149 = vector.broadcast %cst_61 : f32 to vector<8x1xf32>
    %150 = arith.addf %148, %149 : vector<8x1xf32>
    %151 = math.rsqrt %150 : vector<8x1xf32>
    %152 = vector.broadcast %151 : vector<8x1xf32> to vector<8x512xf32>
    %153 = arith.mulf %24, %152 : vector<8x512xf32>
    %154 = arith.mulf %145, %145 : vector<8x512xf32>
    %cst_62 = arith.constant dense<0.000000e+00> : vector<8xf32>
    %155 = vector.multi_reduction <add>, %154, %cst_62 [1] : vector<8x512xf32> to vector<8xf32>
    %156 = vector.shape_cast %155 : vector<8xf32> to vector<8x1xf32>
    %cst_63 = arith.constant 9.99999996E-13 : f32
    %157 = vector.broadcast %cst_63 : f32 to vector<8x1xf32>
    %158 = arith.addf %156, %157 : vector<8x1xf32>
    %159 = math.rsqrt %158 : vector<8x1xf32>
    %160 = vector.broadcast %159 : vector<8x1xf32> to vector<8x512xf32>
    %161 = arith.mulf %145, %160 : vector<8x512xf32>
    %cst_64 = arith.constant dense<0.000000e+00> : vector<8x8xf32>
    %162 = tpu.matmul %153, %161, %cst_64 {dimension_numbers = #tpu.dot_dimension_numbers<[1], [1], [0], [0], [0, 0, 1, 0], [], []>} : vector<8x512xf32>, vector<8x512xf32>, vector<8x8xf32> -> vector<8x8xf32>
    %c0_65 = arith.constant 0 : index
    %c0_66 = arith.constant 0 : index
    %163 = vector.load %arg16[%c0_65, %c0_66] : memref<8x8xf32, #tpu.memory_space<vmem>>, vector<8x8xf32>
    tpu.vector_store %arg16[%c0_65, %c0_66], %162 {strides = array<i32>} : memref<8x8xf32, #tpu.memory_space<vmem>>, vector<8x8xf32>,
    return
  }
}

</mosaic_0001>

<bundles_post_ra>
// kernel: alignment_medium_forward.1
= control target key start
LH: loop header
LB: loop body
LE: loop exit
PB: predicated region body
PF: predicated region fallthrough
CT: control target
= control target key end

     0   :  { %s11641_s0 = inlined_call_operand.hbm [shape: f32[8,512], index: 0, kind: input, shape index: {}]   ;;  %s11642_s1 = inlined_call_operand.hbm [shape: f32[8,8,512], index: 1, kind: input, shape index: {}]   ;;  %s11643_s2 = inlined_call_operand.vmem [shape: f32[1,512], index: 2, kind: input, shape index: {}]   ;;  %s11644_s3 = inlined_call_operand.vmem [shape: f32[1,512], index: 3, kind: input, shape index: {}]   ;;  %s11645_s4 = inlined_call_operand.vmem [shape: f32[1,512], index: 4, kind: input, shape index: {}]   ;;  %s11646_s5 = inlined_call_operand.vmem [shape: f32[1,512], index: 5, kind: input, shape index: {}]   ;;  %s11647_s6 = inlined_call_operand.vmem [shape: f32[1,512], index: 6, kind: input, shape index: {}]   ;;  %s11648_s7 = inlined_call_operand.vmem [shape: f32[1,512], index: 7, kind: input, shape index: {}]   ;;  %s11649_s8 = inlined_call_operand.hbm [shape: bf16[512,512], index: 8, kind: input, shape index: {}]   ;;  %s11650_s9 = inlined_call_operand.hbm [shape: f32[1,512], index: 9, kind: input, shape index: {}]   ;;  %s11651_s10 = inlined_call_operand.hbm [shape: bf16[512,1024], index: 10, kind: input, shape index: {}]   ;;  %s11652_s11 = inlined_call_operand.hbm [shape: f32[1,1024], index: 11, kind: input, shape index: {}]   ;;  %s11653_s12 = inlined_call_operand.hbm [shape: bf16[512,512], index: 12, kind: input, shape index: {}]   ;;  %s11654_s13 = inlined_call_operand.hbm [shape: f32[1,512], index: 13, kind: input, shape index: {}]   ;;  %s11655_s14 = inlined_call_operand.hbm [shape: bf16[512,512], index: 14, kind: input, shape index: {}]   ;;  %s11656_s15 = inlined_call_operand.hbm [shape: f32[1,512], index: 15, kind: input, shape index: {}]   ;;  %s11657_s16 = inlined_call_operand.hbm [shape: f32[8,8], index: 16, kind: output, shape index: {}]  }
   0x1   :  { %11664 = sst [smem:[#allocation29_spill]] %s11641_s0 }
   0x2   :  { %11665 = sst [smem:[#allocation30_spill]] %s11657_s16 }
   0x3   :  { %21 = vsyncpa [#allocation3], 0 }
   0x4   :  { %22 = vsyncpa [#allocation6], 0 }
   0x5   :  { %23 = vsyncpa [#allocation9], 0 }
   0x6   :  { %24 = vsyncpa [#allocation12], 0 }
   0x7   :  { %25 = vsyncpa [#allocation15], 0 }
   0x8   :  { %26 = vsyncpa [#allocation18], 0 }
   0x9   :  { %27 = vsyncpa [#allocation4], 0  ;;  %s10547_s21 = smov [#allocation5]   ;;  %s10291_s25 = scalar_lea.hbm %s11642_s1, 4096 }
   0xa   :  { %s43_s22 = sshll.u32 %s10547_s21, 4  ;;  %p10292_p0 = scmp.ne.s32.totalorder %s11642_s1, %s10291_s25  ;;  %s44_s22 = int_to_ptr.vmem [resolvable:$true] %s43_s22 }
   0xb   :  { %p10295_p1 = scmp.lt.u32.totalorder %s10291_s25, %s11642_s1 }
   0xd   :  { %p10297_p2 = pnand %p10295_p1, %p10292_p0 }
   0xf   :  { %10300 = shalt.err (!%p10297_p2)
}
  0x10   :  { %s10301_s30 = scalar_lea.vmem %s44_s22, 4096  ;;  %p10306_p4 = scmp.lt.s32.totalorder %s44_s22, %s44_s22 }
  0x11   :  { %p10302_p3 = scmp.ne.s32.totalorder %s44_s22, %s10301_s30  ;;  %p10307_p5 = scmp.lt.s32.totalorder %s10301_s30, %s10301_s30 }
  0x13   :  { %p10308_p6 = por %p10307_p5, %p10306_p4 }
  0x15   :  { %p10309_p7 = pnand %p10308_p6, %p10302_p3 }
  0x17   :  { %10312 = shalt.err (!%p10309_p7)
}
  0x18   :  { %s10548_s0 = smov 512   ;;  %s10549_s17 = smov 32  }
  0x19   :  { %49 = dma.hbm_to_vmem [thread:$0]  %s11642_s1, 4096, %s44_s22, [#allocation6], %s10548_s0, %s10548_s0, %s10549_s17  }
  0x1a   :  { %s10550_s20 = smov [#allocation8]   ;;  %s10551_s23 = smov [#allocation11]  }
  0x1b   :  { %s80_s21 = sshll.u32 %s10550_s20, 4  ;;  %s102_s24 = sshll.u32 %s10551_s23, 4  ;;  %s81_s21 = int_to_ptr.vmem [resolvable:$true] %s80_s21  ;;  %s103_s24 = int_to_ptr.vmem [resolvable:$true] %s102_s24 }
  0x1c   :  { %s10313_s27 = scalar_lea.hbm %s11650_s9, 64 }
  0x1d   :  { %p10314_p8 = scmp.ne.s32.totalorder %s11650_s9, %s10313_s27  ;;  %p10317_p9 = scmp.lt.u32.totalorder %s10313_s27, %s11650_s9 }
  0x1f   :  { %p10319_p10 = pnand %p10317_p9, %p10314_p8 }
  0x21   :  { %10322 = shalt.err (!%p10319_p10)
}
  0x22   :  { %s10323_s1 = scalar_lea.vmem %s81_s21, 64  ;;  %p10328_p12 = scmp.lt.s32.totalorder %s81_s21, %s81_s21 }
  0x23   :  { %p10324_p11 = scmp.ne.s32.totalorder %s81_s21, %s10323_s1  ;;  %p10329_p13 = scmp.lt.s32.totalorder %s10323_s1, %s10323_s1 }
  0x25   :  { %p10330_p0 = por %p10329_p13, %p10328_p12 }
  0x27   :  { %p10331_p1 = pnand %p10330_p0, %p10324_p11 }
  0x29   :  { %10334 = shalt.err (!%p10331_p1)
}
  0x2a   :  { %83 = dma.hbm_to_vmem [thread:$0]  %s11650_s9, 64, %s81_s21, [#allocation9]  }
  0x2b   :  { %s10335_s23 = scalar_lea.hbm %s11652_s11, 128 }
  0x2c   :  { %p10336_p2 = scmp.ne.s32.totalorder %s11652_s11, %s10335_s23  ;;  %p10339_p3 = scmp.lt.u32.totalorder %s10335_s23, %s11652_s11 }
  0x2e   :  { %p10341_p4 = pnand %p10339_p3, %p10336_p2 }
  0x30   :  { %10344 = shalt.err (!%p10341_p4)
}
  0x31   :  { %s10345_s28 = scalar_lea.vmem %s103_s24, 128  ;;  %p10350_p6 = scmp.lt.s32.totalorder %s103_s24, %s103_s24 }
  0x32   :  { %p10346_p5 = scmp.ne.s32.totalorder %s103_s24, %s10345_s28  ;;  %p10351_p7 = scmp.lt.s32.totalorder %s10345_s28, %s10345_s28 }
  0x34   :  { %p10352_p8 = por %p10351_p7, %p10350_p6 }
  0x36   :  { %p10353_p9 = pnand %p10352_p8, %p10346_p5 }
  0x38   :  { %10356 = shalt.err (!%p10353_p9)
}
  0x39   :  { %105 = dma.hbm_to_vmem [thread:$0]  %s11652_s11, 128, %s103_s24, [#allocation12]  }
  0x3a   :  { %s10552_s29 = smov [#allocation14]   ;;  %s10553_s1 = smov [#allocation2]  }
  0x3b   :  { %s124_s30 = sshll.u32 %s10552_s29, 4  ;;  %s34_s22 = sshll.u32 %s10553_s1, 4  ;;  %s125_s30 = int_to_ptr.vmem [resolvable:$true] %s124_s30  ;;  %s35_s22 = int_to_ptr.vmem [resolvable:$true] %s34_s22 }
  0x3c   :  { %s10357_s20 = scalar_lea.hbm %s11654_s13, 64 }
  0x3d   :  { %p10358_p10 = scmp.ne.s32.totalorder %s11654_s13, %s10357_s20  ;;  %p10361_p11 = scmp.lt.u32.totalorder %s10357_s20, %s11654_s13 }
  0x3f   :  { %p10363_p12 = pnand %p10361_p11, %p10358_p10 }
  0x41   :  { %10366 = shalt.err (!%p10363_p12)
}
  0x42   :  { %s10367_s11 = scalar_lea.vmem %s125_s30, 64  ;;  %p10372_p0 = scmp.lt.s32.totalorder %s125_s30, %s125_s30 }
  0x43   :  { %p10368_p13 = scmp.ne.s32.totalorder %s125_s30, %s10367_s11  ;;  %p10373_p1 = scmp.lt.s32.totalorder %s10367_s11, %s10367_s11 }
  0x45   :  { %p10374_p2 = por %p10373_p1, %p10372_p0 }
  0x47   :  { %p10375_p3 = pnand %p10374_p2, %p10368_p13 }
  0x49   :  { %10378 = shalt.err (!%p10375_p3)
}
  0x4a   :  { %127 = dma.hbm_to_vmem [thread:$0]  %s11654_s13, 64, %s125_s30, [#allocation15]  }
  0x4b   :  { %s11666_s21 = sld [smem:[#allocation29_spill]] }
  0x51   :  { %s10379_s29 = scalar_lea.hbm %s11666_s21, 512 }
  0x52   :  { %p10380_p4 = scmp.ne.s32.totalorder %s11666_s21, %s10379_s29  ;;  %p10383_p5 = scmp.lt.u32.totalorder %s10379_s29, %s11666_s21 }
  0x54   :  { %p10385_p6 = pnand %p10383_p5, %p10380_p4 }
  0x56   :  { %10388 = shalt.err (!%p10385_p6)
}
  0x57   :  { %s10389_s23 = scalar_lea.vmem %s35_s22, 512  ;;  %p10394_p8 = scmp.lt.s32.totalorder %s35_s22, %s35_s22 }
  0x58   :  { %p10390_p7 = scmp.ne.s32.totalorder %s35_s22, %s10389_s23  ;;  %p10395_p9 = scmp.lt.s32.totalorder %s10389_s23, %s10389_s23 }
  0x5a   :  { %p10396_p10 = por %p10395_p9, %p10394_p8 }
  0x5c   :  { %p10397_p11 = pnand %p10396_p10, %p10390_p7 }
  0x5e   :  { %10400 = shalt.err (!%p10397_p11)
}
  0x5f   :  { %37 = dma.hbm_to_vmem [thread:$0]  %s11666_s21, 512, %s35_s22, [#allocation3]  }
  0x60   :  { %s10554_s16 = smov [#allocation7]   ;;  %s10401_s24 = scalar_lea.hbm %s11649_s8, 16384 }
  0x61   :  { %s67_s25 = sshll.u32 %s10554_s16, 4  ;;  %p10402_p12 = scmp.ne.s32.totalorder %s11649_s8, %s10401_s24  ;;  %s68_s25 = int_to_ptr.vmem [resolvable:$true] %s67_s25 }
  0x62   :  { %p10405_p13 = scmp.lt.u32.totalorder %s10401_s24, %s11649_s8 }
  0x64   :  { %p10407_p0 = pnand %p10405_p13, %p10402_p12 }
  0x66   :  { %10410 = shalt.err (!%p10407_p0)
}
  0x67   :  { %s10411_s1 = scalar_lea.vmem %s68_s25, 16384  ;;  %p10416_p2 = scmp.lt.s32.totalorder %s68_s25, %s68_s25 }
  0x68   :  { %p10412_p1 = scmp.ne.s32.totalorder %s68_s25, %s10411_s1  ;;  %p10417_p3 = scmp.lt.s32.totalorder %s10411_s1, %s10411_s1 }
  0x6a   :  { %p10418_p4 = por %p10417_p3, %p10416_p2 }
  0x6c   :  { %p10419_p5 = pnand %p10418_p4, %p10412_p1 }
  0x6e   :  { %10422 = shalt.err (!%p10419_p5)
}
  0x6f   :  { %s10555_s22 = smov 256   ;;  %s10556_s21 = smov 16  }
  0x70   :  { %73 = dma.hbm_to_vmem [thread:$0]  %s11649_s8, 16384, %s68_s25, [#allocation6], %s10555_s22, %s10555_s22, %s10556_s21  }
  0x71   :  { %s10557_s20 = smov [#allocation10]   ;;  %s10558_s13 = smov [#allocation13]  }
  0x72   :  { %s89_s23 = sshll.u32 %s10557_s20, 4  ;;  %s111_s30 = sshll.u32 %s10558_s13, 4  ;;  %s90_s23 = int_to_ptr.vmem [resolvable:$true] %s89_s23  ;;  %s10727_s30 = int_to_ptr.vmem [resolvable:$true] %s111_s30 }
  0x73   :  { %s10423_s11 = scalar_lea.hbm %s11651_s10, 32768 }
  0x74   :  { %p10424_p6 = scmp.ne.s32.totalorder %s11651_s10, %s10423_s11  ;;  %p10427_p7 = scmp.lt.u32.totalorder %s10423_s11, %s11651_s10 }
  0x76   :  { %p10429_p8 = pnand %p10427_p7, %p10424_p6 }
  0x78   :  { %10432 = shalt.err (!%p10429_p8)
}
  0x79   :  { %s10433_s8 = scalar_lea.vmem %s90_s23, 32768  ;;  %p10438_p10 = scmp.lt.s32.totalorder %s90_s23, %s90_s23 }
  0x7a   :  { %p10434_p9 = scmp.ne.s32.totalorder %s90_s23, %s10433_s8  ;;  %p10439_p11 = scmp.lt.s32.totalorder %s10433_s8, %s10433_s8 }
  0x7c   :  { %p10440_p12 = por %p10439_p11, %p10438_p10 }
  0x7e   :  { %p10441_p13 = pnand %p10440_p12, %p10434_p9 }
  0x80   :  { %10444 = shalt.err (!%p10441_p13)
}
  0x81   :  { %95 = dma.hbm_to_vmem [thread:$0]  %s11651_s10, 32768, %s90_s23, [#allocation9], %s10548_s0, %s10548_s0, %s10549_s17  }
  0x82   :  { %s10445_s19 = scalar_lea.hbm %s11653_s12, 16384 }
  0x83   :  { %p10446_p0 = scmp.ne.s32.totalorder %s11653_s12, %s10445_s19  ;;  %p10449_p1 = scmp.lt.u32.totalorder %s10445_s19, %s11653_s12 }
  0x85   :  { %p10451_p2 = pnand %p10449_p1, %p10446_p0 }
  0x87   :  { %10454 = shalt.err (!%p10451_p2)
}
  0x88   :  { %s10455_s11 = scalar_lea.vmem %s10727_s30, 16384  ;;  %p10460_p4 = scmp.lt.s32.totalorder %s10727_s30, %s10727_s30 }
  0x89   :  { %p10456_p3 = scmp.ne.s32.totalorder %s10727_s30, %s10455_s11  ;;  %p10461_p5 = scmp.lt.s32.totalorder %s10455_s11, %s10455_s11 }
  0x8b   :  { %p10462_p6 = por %p10461_p5, %p10460_p4 }
  0x8d   :  { %p10463_p7 = pnand %p10462_p6, %p10456_p3 }
  0x8f   :  { %10466 = shalt.err (!%p10463_p7)
}
  0x90   :  { %117 = dma.hbm_to_vmem [thread:$0]  %s11653_s12, 16384, %s10727_s30, [#allocation12], %s10555_s22, %s10555_s22, %s10556_s21  }
  0x91   :  { %s10559_s17 = smov [#allocation16]   ;;  %s10560_s24 = smov [#allocation17]  }
  0x92   :  { %s133_s23 = sshll.u32 %s10559_s17, 4  ;;  %s146_s27 = sshll.u32 %s10560_s24, 4  ;;  %s134_s23 = int_to_ptr.vmem [resolvable:$true] %s133_s23  ;;  %s147_s27 = int_to_ptr.vmem [resolvable:$true] %s146_s27 }
  0x93   :  { %s10467_s8 = scalar_lea.hbm %s11655_s14, 16384 }
  0x94   :  { %p10468_p8 = scmp.ne.s32.totalorder %s11655_s14, %s10467_s8  ;;  %p10471_p9 = scmp.lt.u32.totalorder %s10467_s8, %s11655_s14 }
  0x96   :  { %p10473_p10 = pnand %p10471_p9, %p10468_p8 }
  0x98   :  { %10476 = shalt.err (!%p10473_p10)
}
  0x99   :  { %s10477_s12 = scalar_lea.vmem %s134_s23, 16384  ;;  %p10482_p12 = scmp.lt.s32.totalorder %s134_s23, %s134_s23 }
  0x9a   :  { %p10478_p11 = scmp.ne.s32.totalorder %s134_s23, %s10477_s12  ;;  %p10483_p13 = scmp.lt.s32.totalorder %s10477_s12, %s10477_s12 }
  0x9c   :  { %p10484_p0 = por %p10483_p13, %p10482_p12 }
  0x9e   :  { %p10485_p1 = pnand %p10484_p0, %p10478_p11 }
  0xa0   :  { %10488 = shalt.err (!%p10485_p1)
}
  0xa1   :  { %139 = dma.hbm_to_vmem [thread:$0]  %s11655_s14, 16384, %s134_s23, [#allocation15], %s10555_s22, %s10555_s22, %s10556_s21  }
  0xa2   :  { %s10489_s16 = scalar_lea.hbm %s11656_s15, 64 }
  0xa3   :  { %p10490_p2 = scmp.ne.s32.totalorder %s11656_s15, %s10489_s16  ;;  %p10493_p3 = scmp.lt.u32.totalorder %s10489_s16, %s11656_s15 }
  0xa5   :  { %p10495_p4 = pnand %p10493_p3, %p10490_p2 }
  0xa7   :  { %10498 = shalt.err (!%p10495_p4)
}
  0xa8   :  { %s10499_s17 = scalar_lea.vmem %s147_s27, 64  ;;  %p10504_p6 = scmp.lt.s32.totalorder %s147_s27, %s147_s27 }
  0xa9   :  { %p10500_p5 = scmp.ne.s32.totalorder %s147_s27, %s10499_s17  ;;  %p10505_p7 = scmp.lt.s32.totalorder %s10499_s17, %s10499_s17 }
  0xab   :  { %p10506_p8 = por %p10505_p7, %p10504_p6 }
  0xad   :  { %p10507_p9 = pnand %p10506_p8, %p10500_p5 }
  0xaf   :  { %10510 = shalt.err (!%p10507_p9)
}
  0xb0   :  { %149 = dma.hbm_to_vmem [thread:$0]  %s11656_s15, 64, %s147_s27, [#allocation18]  }
  0xb1   :  { %10533 = dma.done.wait [#allocation3], 512  }
  0xb2   :  { %10534 = vsyncadd [#allocation3], 4294966784 }
  0xb3   :  { %10535 = dma.done.wait [#allocation6], 20480  }
  0xb4   :  { %10536 = vsyncadd [#allocation6], 4294946816 }
  0xb5   :  { %10537 = dma.done.wait [#allocation9], 32832  }
  0xb6   :  { %10538 = vsyncadd [#allocation9], 4294934464 }
  0xb7   :  { %10539 = dma.done.wait [#allocation12], 16512  }
  0xb8   :  { %10540 = vsyncadd [#allocation12], 4294950784 }
  0xb9   :  { %10541 = dma.done.wait [#allocation15], 16448  }
  0xba   :  { %10542 = vsyncadd [#allocation15], 4294950848 }
  0xbb   :  { %10543 = dma.done.wait [#allocation18], 64  }
  0xbc   :  { %10544 = vsyncadd [#allocation18], 4294967232  ;;  %v182_v0 = vld [vmem:[#allocation2] sm:$0xff]  ;;  %v183_v1 = vld [vmem:[#allocation2 + $0x8] sm:$0xff]  ;;  %vm5090_vm0 = vcmask 1041409   ;;  %vm5093_vm1 = vcmask 1042434  }
  0xbd   :  { %v184_v2 = vld [vmem:[#allocation2 + $0x10] sm:$0xff]  ;;  %v185_v3 = vld [vmem:[#allocation2 + $0x18] sm:$0xff]  ;;  %v186_v4 = vadd.f32 %v183_v1, %v182_v0  ;;  %v193_v5 = vmul.f32 %v182_v0, %v182_v0  ;;  %v194_v6 = vmul.f32 %v183_v1, %v183_v1  ;;  %v265_v8 = vld [vmem:[#allocation5] sm:$0xff]  ;;  %vm5096_vm2 = vcmask 1043459  }
  0xbe   :  { %v195_v7 = vmul.f32 %v184_v2, %v184_v2  ;;  %v266_v9 = vld [vmem:[#allocation5 + $0x8] sm:$0xff]  ;;  %v267_v10 = vld [vmem:[#allocation5 + $0x10] sm:$0xff]  ;;  %v268_v11 = vld [vmem:[#allocation5 + $0x18] sm:$0xff]  ;;  %v345_v13 = vmul.f32 %v265_v8, %v265_v8  ;;  %v196_v16 = vmul.f32 %v185_v3, %v185_v3  ;;  %vm5099_vm3 = vcmask 1044484  }
  0xbf   :  { %v297_v12 = vadd.f32 %v266_v9, %v265_v8  ;;  %v346_v14 = vmul.f32 %v266_v9, %v266_v9  ;;  %v187_v15 = vadd.f32 %v186_v4, %v184_v2  ;;  %v197_v17 = vadd.f32 %v194_v6, %v193_v5  ;;  %v9635_v18 = vld [vmem:[#allocation7 + $0x4] ss:$16 sps:$4 sm:$0xff]   ;;  %v9637_v21 = vld [vmem:[#allocation7 + $0xc] ss:$16 sps:$4 sm:$0xff]   ;;  %v9639_v32 = vld [vmem:[#allocation7] ss:$16 sps:$4 sm:$0xff]  }
  0xc0   :  { %v347_v19 = vmul.f32 %v267_v10, %v267_v10  ;;  %v269_v22 = vld [vmem:[#allocation5 + $0x20] sm:$0xff]  ;;  %1379 = vmatprep.subr.bf16.mxu0 %v9635_v18  ;;  %v270_v26 = vld [vmem:[#allocation5 + $0x28] sm:$0xff]  ;;  %v271_v27 = vld [vmem:[#allocation5 + $0x30] sm:$0xff]  ;;  %1461 = vmatprep.subr.bf16.mxu1 %v9637_v21  ;;  %v348_v38 = vmul.f32 %v268_v11, %v268_v11  ;;  %vm5102_vm4 = vcmask 1045509   ;;  %vm5105_vm5 = vcmask 1046534  }
  0xc1   :  { %v298_v20 = vadd.f32 %v297_v12, %v267_v10  ;;  %v377_v23 = vadd.f32 %v346_v14, %v345_v13  ;;  %v188_v24 = vadd.f32 %v187_v15, %v185_v3  ;;  %v198_v25 = vadd.f32 %v197_v17, %v195_v7  ;;  %v272_v28 = vld [vmem:[#allocation5 + $0x38] sm:$0xff]  ;;  %v9641_v37 = vld [vmem:[#allocation7 + $0x24] ss:$16 sps:$4 sm:$0xff]   ;;  %1380 = vmatpush1.bf16.msra.mxu0 %v9639_v32  ;;  %v9645_v44 = vld [vmem:[#allocation7 + $0x20] ss:$16 sps:$4 sm:$0xff]  }
  0xc2   :  { %v349_v29 = vmul.f32 %v269_v22, %v269_v22  ;;  %v302_v31 = vadd.f32 %v270_v26, %v269_v22  ;;  %v9640_v33 = vld [vmem:[#allocation7 + $0x8] ss:$16 sps:$4 sm:$0xff]   ;;  %v350_v34 = vmul.f32 %v270_v26, %v270_v26  ;;  %v351_v35 = vmul.f32 %v271_v27, %v271_v27  ;;  %v9643_v41 = vld [vmem:[#allocation7 + $0x2c] ss:$16 sps:$4 sm:$0xff]   ;;  %1381 = vmatprep.subr.bf16.mxu0 %v9641_v37  ;;  %v9647_v48 = vld [vmem:[#allocation7 + $0x44] ss:$16 sps:$4 sm:$0xff]  }
  0xc3   :  { %v299_v30 = vadd.f32 %v298_v20, %v268_v11  ;;  %189 = vadd.xlane.f32.xlu0 %v188_v24  ;;  %v199_v36 = vadd.f32 %v198_v25, %v196_v16  ;;  %v378_v39 = vadd.f32 %v377_v23, %v347_v19  ;;  %v352_v42 = vmul.f32 %v272_v28, %v272_v28  ;;  %v9646_v45 = vld [vmem:[#allocation7 + $0x28] ss:$16 sps:$4 sm:$0xff]   ;;  %v9649_v50 = vld [vmem:[#allocation7 + $0x4c] ss:$16 sps:$4 sm:$0xff]   ;;  %v9651_v51 = vld [vmem:[#allocation7 + $0x40] ss:$16 sps:$4 sm:$0xff]  }
  0xc4   :  { %v303_v40 = vadd.f32 %v302_v31, %v271_v27  ;;  %v382_v43 = vadd.f32 %v350_v34, %v349_v29  ;;  %1462 = vmatpush1.bf16.msra.mxu1 %v9640_v33  ;;  %v9652_v53 = vld [vmem:[#allocation7 + $0x48] ss:$16 sps:$4 sm:$0xff]   ;;  %v9653_v54 = vld [vmem:[#allocation7 + $0x64] ss:$16 sps:$4 sm:$0xff]   ;;  %v9655_v55 = vld [vmem:[#allocation7 + $0x6c] ss:$16 sps:$4 sm:$0xff]  }
  0xc5   :  { %300 = vadd.xlane.f32.xlu1 %v299_v30  ;;  %1463 = vmatprep.subr.bf16.mxu1 %v9643_v41  ;;  %v379_v49 = vadd.f32 %v378_v39, %v348_v38  ;;  %v9657_v56 = vld [vmem:[#allocation7 + $0x60] ss:$16 sps:$4 sm:$0xff]   ;;  %v9658_v57 = vld [vmem:[#allocation7 + $0x68] ss:$16 sps:$4 sm:$0xff]   ;;  %v9659_v58 = vld [vmem:[#allocation7 + $0x84] ss:$16 sps:$4 sm:$0xff]  }
  0xc6   :  { %v304_v46 = vadd.f32 %v303_v40, %v272_v28  ;;  %v383_v47 = vadd.f32 %v382_v43, %v351_v35  ;;  %1382 = vmatpush1.bf16.msra.mxu0 %v9645_v44  ;;  %v9661_v59 = vld [vmem:[#allocation7 + $0x8c] ss:$16 sps:$4 sm:$0xff]   ;;  %v9663_v60 = vld [vmem:[#allocation7 + $0x80] ss:$16 sps:$4 sm:$0xff]   ;;  %v9664_v61 = vld [vmem:[#allocation7 + $0x88] ss:$16 sps:$4 sm:$0xff]  }
  0xc7   :  { %200 = vadd.xlane.f32.xlu0 %v199_v36  ;;  %1383 = vmatprep.subr.bf16.mxu0 %v9647_v48  ;;  %v9665_v62 = vld [vmem:[#allocation7 + $0xa4] ss:$16 sps:$4 sm:$0xff]   ;;  %v9667_v63 = vld [vmem:[#allocation7 + $0xac] ss:$16 sps:$4 sm:$0xff]   ;;  %v9669_v0 = vld [vmem:[#allocation7 + $0xa0] ss:$16 sps:$4 sm:$0xff]  }
  0xc8   :  { %v384_v52 = vadd.f32 %v383_v47, %v352_v42  ;;  %1464 = vmatpush1.bf16.msra.mxu1 %v9646_v45  ;;  %v9670_v1 = vld [vmem:[#allocation7 + $0xa8] ss:$16 sps:$4 sm:$0xff]   ;;  %v9671_v2 = vld [vmem:[#allocation7 + $0xc4] ss:$16 sps:$4 sm:$0xff]   ;;  %v9673_v4 = vld [vmem:[#allocation7 + $0xcc] ss:$16 sps:$4 sm:$0xff]  }
  0xc9   :  { %305 = vadd.xlane.f32.xlu1 %v304_v46  ;;  %1465 = vmatprep.subr.bf16.mxu1 %v9649_v50  ;;  %v277_v3 = vld [vmem:[#allocation5 + $0x60] sm:$0xff]  ;;  %v278_v5 = vld [vmem:[#allocation5 + $0x68] sm:$0xff]  ;;  %v279_v6 = vld [vmem:[#allocation5 + $0x70] sm:$0xff]  ;;  %vm5108_vm6 = vcmask 1047559   ;;  %vm5111_vm7 = vcmask 64512  }
  0xca   :  { %1384 = vmatpush1.bf16.msra.mxu0 %v9651_v51  ;;  %v357_v7 = vmul.f32 %v277_v3, %v277_v3  ;;  %v312_v8 = vadd.f32 %v278_v5, %v277_v3  ;;  %v273_v9 = vld [vmem:[#allocation5 + $0x40] sm:$0xff]  ;;  %v274_v10 = vld [vmem:[#allocation5 + $0x48] sm:$0xff]  ;;  %v275_v11 = vld [vmem:[#allocation5 + $0x50] sm:$0xff]  ;;  %v358_v12 = vmul.f32 %v278_v5, %v278_v5  ;;  %v359_v13 = vmul.f32 %v279_v6, %v279_v6 }
  0xcb   :  { %380 = vadd.xlane.f32.xlu0 %v379_v49  ;;  %1385 = vmatprep.subr.bf16.mxu0 %v9653_v54  ;;  %v9675_v14 = vld [vmem:[#allocation7 + $0xc0] ss:$16 sps:$4 sm:$0xff]   ;;  %v9676_v15 = vld [vmem:[#allocation7 + $0xc8] ss:$16 sps:$4 sm:$0xff]   ;;  %v307_v17 = vadd.f32 %v274_v10, %v273_v9  ;;  %v353_v18 = vmul.f32 %v273_v9, %v273_v9  ;;  %v354_v19 = vmul.f32 %v274_v10, %v274_v10  ;;  %v9677_v25 = vld [vmem:[#allocation7 + $0xe4] ss:$16 sps:$4 sm:$0xff]  }
  0xcc   :  { %1466 = vmatpush1.bf16.msra.mxu1 %v9652_v53  ;;  %v280_v16 = vld [vmem:[#allocation5 + $0x78] sm:$0xff]  ;;  %v355_v20 = vmul.f32 %v275_v11, %v275_v11  ;;  %v313_v21 = vadd.f32 %v312_v8, %v279_v6  ;;  %v392_v24 = vadd.f32 %v358_v12, %v357_v7  ;;  %v9681_v31 = vld [vmem:[#allocation7 + $0xe0] ss:$16 sps:$4 sm:$0xff]   ;;  %v9683_v35 = vld [vmem:[#allocation7 + $0x104] ss:$16 sps:$4 sm:$0xff]  }
  0xcd   :  { %385 = vadd.xlane.f32.xlu1 %v384_v52  ;;  %1467 = vmatprep.subr.bf16.mxu1 %v9655_v55  ;;  %v276_v22 = vld [vmem:[#allocation5 + $0x58] sm:$0xff]  ;;  %v360_v23 = vmul.f32 %v280_v16, %v280_v16  ;;  %v308_v26 = vadd.f32 %v307_v17, %v275_v11  ;;  %v387_v28 = vadd.f32 %v354_v19, %v353_v18  ;;  %v285_v39 = vld [vmem:[#allocation5 + $0xa0] sm:$0xff]  ;;  %v286_v41 = vld [vmem:[#allocation5 + $0xa8] sm:$0xff] }
  0xce   :  { %1386 = vmatpush1.bf16.msra.mxu0 %v9657_v56  ;;  %v356_v27 = vmul.f32 %v276_v22, %v276_v22  ;;  %v9679_v29 = vld [vmem:[#allocation7 + $0xec] ss:$16 sps:$4 sm:$0xff]   ;;  %v314_v30 = vadd.f32 %v313_v21, %v280_v16  ;;  %v393_v32 = vadd.f32 %v392_v24, %v359_v13  ;;  %v9682_v34 = vld [vmem:[#allocation7 + $0xe8] ss:$16 sps:$4 sm:$0xff]   ;;  %v287_v42 = vld [vmem:[#allocation5 + $0xb0] sm:$0xff]  ;;  %v365_v44 = vmul.f32 %v285_v39, %v285_v39 }
  0xcf   :  { %1387 = vmatprep.subr.bf16.mxu0 %v9659_v58  ;;  %v309_v33 = vadd.f32 %v308_v26, %v276_v22  ;;  %v388_v36 = vadd.f32 %v387_v28, %v355_v20  ;;  %v9685_v37 = vld [vmem:[#allocation7 + $0x10c] ss:$16 sps:$4 sm:$0xff]   ;;  %v322_v45 = vadd.f32 %v286_v41, %v285_v39  ;;  %v281_v46 = vld [vmem:[#allocation5 + $0x80] sm:$0xff]  ;;  %v283_v48 = vld [vmem:[#allocation5 + $0x90] sm:$0xff]  ;;  %v366_v49 = vmul.f32 %v286_v41, %v286_v41 }
  0xd0   :  { %1468 = vmatpush1.bf16.msra.mxu1 %v9658_v57  ;;  %v394_v38 = vadd.f32 %v393_v32, %v360_v23  ;;  %v288_v43 = vld [vmem:[#allocation5 + $0xb8] sm:$0xff]  ;;  %v282_v47 = vld [vmem:[#allocation5 + $0x88] sm:$0xff]  ;;  %v367_v50 = vmul.f32 %v287_v42, %v287_v42  ;;  %v9687_v51 = vld [vmem:[#allocation7 + $0x100] ss:$16 sps:$4 sm:$0xff]   ;;  %v361_v55 = vmul.f32 %v281_v46, %v281_v46 }
  0xd1   :  { %1469 = vmatprep.subr.bf16.mxu1 %v9661_v59  ;;  %315 = vadd.xlane.f32.xlu1 %v314_v30  ;;  %v389_v40 = vadd.f32 %v388_v36, %v356_v27  ;;  %v9688_v52 = vld [vmem:[#allocation7 + $0x108] ss:$16 sps:$4 sm:$0xff]   ;;  %v317_v53 = vadd.f32 %v282_v47, %v281_v46  ;;  %v368_v54 = vmul.f32 %v288_v43, %v288_v43  ;;  %v9693_v3 = vld [vmem:[#allocation7 + $0x120] ss:$16 sps:$4 sm:$0xff]   ;;  %v9695_v7 = vld [vmem:[#allocation7 + $0x144] ss:$16 sps:$4 sm:$0xff]  }
  0xd2   :  { %1388 = vmatpush1.bf16.msra.mxu0 %v9663_v60  ;;  %310 = vadd.xlane.f32.xlu0 %v309_v33  ;;  %v362_v56 = vmul.f32 %v282_v47, %v282_v47  ;;  %v323_v57 = vadd.f32 %v322_v45, %v287_v42  ;;  %v284_v58 = vld [vmem:[#allocation5 + $0x98] sm:$0xff]  ;;  %v402_v59 = vadd.f32 %v366_v49, %v365_v44  ;;  %v293_v11 = vld [vmem:[#allocation5 + $0xe0] sm:$0xff]  ;;  %v294_v13 = vld [vmem:[#allocation5 + $0xe8] sm:$0xff] }
  0xd3   :  { %1389 = vmatprep.subr.bf16.mxu0 %v9665_v62  ;;  %v363_v60 = vmul.f32 %v283_v48, %v283_v48  ;;  %v318_v62 = vadd.f32 %v317_v53, %v283_v48  ;;  %v9694_v6 = vld [vmem:[#allocation7 + $0x128] ss:$16 sps:$4 sm:$0xff]   ;;  %v9697_v9 = vld [vmem:[#allocation7 + $0x14c] ss:$16 sps:$4 sm:$0xff]   ;;  %v373_v16 = vmul.f32 %v293_v11, %v293_v11  ;;  %v332_v17 = vadd.f32 %v294_v13, %v293_v11  ;;  %v289_v18 = vld [vmem:[#allocation5 + $0xc0] sm:$0xff] }
  0xd4   :  { %1470 = vmatpush1.bf16.msra.mxu1 %v9664_v61  ;;  %v9689_v61 = vld [vmem:[#allocation7 + $0x124] ss:$16 sps:$4 sm:$0xff]   ;;  %v290_v19 = vld [vmem:[#allocation5 + $0xc8] sm:$0xff]  ;;  %v374_v21 = vmul.f32 %v294_v13, %v294_v13  ;;  %v9699_v23 = vld [vmem:[#allocation7 + $0x140] ss:$16 sps:$4 sm:$0xff]   ;;  %v369_v27 = vmul.f32 %v289_v18, %v289_v18 }
  0xd5   :  { %1471 = vmatprep.subr.bf16.mxu1 %v9667_v63  ;;  %395 = vadd.xlane.f32.xlu1 %v394_v38  ;;  %v364_v63 = vmul.f32 %v284_v58, %v284_v58  ;;  %v319_v5 = vadd.f32 %v318_v62, %v284_v58  ;;  %v291_v20 = vld [vmem:[#allocation5 + $0xd0] sm:$0xff]  ;;  %v9700_v24 = vld [vmem:[#allocation7 + $0x148] ss:$16 sps:$4 sm:$0xff]   ;;  %v370_v28 = vmul.f32 %v290_v19, %v290_v19  ;;  %v9703_v36 = vld [vmem:[#allocation7 + $0x16c] ss:$16 sps:$4 sm:$0xff]  }
  0xd6   :  { %1390 = vmatpush1.bf16.msra.mxu0 %v9669_v0  ;;  %v397_v0 = vadd.f32 %v362_v56, %v361_v55  ;;  %390 = vadd.xlane.f32.xlu0 %v389_v40  ;;  %v292_v30 = vld [vmem:[#allocation5 + $0xd8] sm:$0xff]  ;;  %v371_v32 = vmul.f32 %v291_v20, %v291_v20  ;;  %v9701_v33 = vld [vmem:[#allocation7 + $0x164] ss:$16 sps:$4 sm:$0xff]   ;;  %v9705_v42 = vld [vmem:[#allocation7 + $0x160] ss:$16 sps:$4 sm:$0xff]  }
  0xd7   :  { %1391 = vmatprep.subr.bf16.mxu0 %v9671_v2  ;;  %v324_v2 = vadd.f32 %v323_v57, %v288_v43  ;;  %v372_v39 = vmul.f32 %v292_v30, %v292_v30  ;;  %v9706_v43 = vld [vmem:[#allocation7 + $0x168] ss:$16 sps:$4 sm:$0xff]   ;;  %v9707_v45 = vld [vmem:[#allocation7 + $0x184] ss:$16 sps:$4 sm:$0xff]   ;;  %v9709_v46 = vld [vmem:[#allocation7 + $0x18c] ss:$16 sps:$4 sm:$0xff]  }
  0xd8   :  { %1472 = vmatpush1.bf16.msra.mxu1 %v9670_v1  ;;  %v9691_v1 = vld [vmem:[#allocation7 + $0x12c] ss:$16 sps:$4 sm:$0xff]   ;;  %v398_v8 = vadd.f32 %v397_v0, %v363_v60  ;;  %v9711_v48 = vld [vmem:[#allocation7 + $0x180] ss:$16 sps:$4 sm:$0xff]   ;;  %v9712_v49 = vld [vmem:[#allocation7 + $0x188] ss:$16 sps:$4 sm:$0xff]  }
  0xd9   :  { %1473 = vmatprep.subr.bf16.mxu1 %v9673_v4  ;;  %v403_v4 = vadd.f32 %v402_v59, %v367_v50  ;;  %325 = vadd.xlane.f32.xlu1 %v324_v2  ;;  %v9713_v50 = vld [vmem:[#allocation7 + $0x1a4] ss:$16 sps:$4 sm:$0xff]   ;;  %v9718_v53 = vld [vmem:[#allocation7 + $0x1a8] ss:$16 sps:$4 sm:$0xff]   ;;  %v9721_v55 = vld [vmem:[#allocation7 + $0x1cc] ss:$16 sps:$4 sm:$0xff]  }
  0xda   :  { %1392 = vmatpush1.bf16.msra.mxu0 %v9675_v14  ;;  %v399_v12 = vadd.f32 %v398_v8, %v364_v63  ;;  %v295_v14 = vld [vmem:[#allocation5 + $0xf0] sm:$0xff]  ;;  %320 = vadd.xlane.f32.xlu0 %v319_v5  ;;  %v9724_v57 = vld [vmem:[#allocation7 + $0x1c8] ss:$16 sps:$4 sm:$0xff]   ;;  %v9727_v59 = vld [vmem:[#allocation7 + $0x1ec] ss:$16 sps:$4 sm:$0xff]  }
  0xdb   :  { %1393 = vmatprep.subr.bf16.mxu0 %v9677_v25  ;;  %v404_v10 = vadd.f32 %v403_v4, %v368_v54  ;;  %v375_v22 = vmul.f32 %v295_v14, %v295_v14  ;;  %v327_v25 = vadd.f32 %v290_v19, %v289_v18  ;;  %v9719_v54 = vld [vmem:[#allocation7 + $0x1c4] ss:$16 sps:$4 sm:$0xff]   ;;  %v9723_v56 = vld [vmem:[#allocation7 + $0x1c0] ss:$16 sps:$4 sm:$0xff]   ;;  %v9736_v63 = vld [vmem:[#allocation7 + $0x20c] ss:$16 sps:$4 sm:$0xff]  }
  0xdc   :  { %1474 = vmatpush1.bf16.msra.mxu1 %v9676_v15  ;;  %v296_v15 = vld [vmem:[#allocation5 + $0xf8] sm:$0xff]  ;;  %v9725_v58 = vld [vmem:[#allocation7 + $0x1e4] ss:$16 sps:$4 sm:$0xff]   ;;  %v9729_v60 = vld [vmem:[#allocation7 + $0x1e0] ss:$16 sps:$4 sm:$0xff]  }
  0xdd   :  { %1475 = vmatprep.subr.bf16.mxu1 %v9679_v29  ;;  %v376_v26 = vmul.f32 %v296_v15, %v296_v15  ;;  %405 = vadd.xlane.f32.xlu1 %v404_v10  ;;  %v333_v29 = vadd.f32 %v332_v17, %v295_v14  ;;  %v9733_v62 = vld [vmem:[#allocation7 + $0x204] ss:$16 sps:$4 sm:$0xff]   ;;  %v216_v10 = vlaneseq }
  0xde   :  { %1394 = vmatpush1.bf16.msra.mxu0 %v9681_v31  ;;  %v412_v31 = vadd.f32 %v374_v21, %v373_v16  ;;  %400 = vadd.xlane.f32.xlu0 %v399_v12 }
  0xdf   :  { %1395 = vmatprep.subr.bf16.mxu0 %v9683_v35  ;;  %v407_v35 = vadd.f32 %v370_v28, %v369_v27  ;;  %v10799_v18 = vshrl.u32 %v216_v10, 7  ;;  %v10818_v27 = vld [vmem:[%s11644_s3] sm:$0xf]  ;;  %v9739_v10 = vld [vmem:[#allocation7 + $0x224] ss:$16 sps:$4 sm:$0xff]  }
  0xe0   :  { %1476 = vmatpush1.bf16.msra.mxu1 %v9682_v34  ;;  %v328_v34 = vadd.f32 %v327_v25, %v291_v20  ;;  %v413_v38 = vadd.f32 %v412_v31, %v375_v22  ;;  %v10255_v31 = vld [vmem:[#allocation2] sm:$0xff] }
  0xe1   :  { %1477 = vmatprep.subr.bf16.mxu1 %v9685_v37  ;;  %v334_v37 = vadd.f32 %v333_v29, %v296_v15  ;;  %v408_v41 = vadd.f32 %v407_v35, %v371_v32  ;;  %v10808_v25 = vsub.s32 3, %v10799_v18  ;;  %v10257_v35 = vld [vmem:[#allocation2 + $0x18] sm:$0xff] }
  0xe2   :  { %1396 = vmatpush1.bf16.msra.mxu0 %v9687_v51  ;;  %v329_v40 = vadd.f32 %v328_v34, %v292_v30  ;;  %v414_v44 = vadd.f32 %v413_v38, %v376_v26  ;;  %v9715_v51 = vld [vmem:[#allocation7 + $0x1ac] ss:$16 sps:$4 sm:$0xff]   ;;  %v10813_v26 = vld [vmem:[%s11643_s2] sm:$0xf] }
  0xe3   :  { %1397 = vmatprep.subr.bf16.mxu0 %v9689_v61  ;;  %335 = vadd.xlane.f32.xlu1 %v334_v37  ;;  %v409_v47 = vadd.f32 %v408_v41, %v372_v39  ;;  %v9730_v61 = vld [vmem:[#allocation7 + $0x1e8] ss:$16 sps:$4 sm:$0xff]   ;;  %v10830_v30 = vrot.slane %v10813_v26, %v10808_v25 }
  0xe4   :  { %1478 = vmatpush1.bf16.msra.mxu1 %v9688_v52  ;;  %330 = vadd.xlane.f32.xlu0 %v329_v40  ;;  %v9717_v52 = vld [vmem:[#allocation7 + $0x1a0] ss:$16 sps:$4 sm:$0xff]   ;;  %v10258_v37 = vld [vmem:[#allocation2 + $0x8] sm:$0xff] }
  0xe5   :  { %1479 = vmatprep.subr.bf16.mxu1 %v9691_v1 }
  0xe6   :  { %1398 = vmatpush1.bf16.msra.mxu0 %v9693_v3 }
  0xe7   :  { %1399 = vmatprep.subr.bf16.mxu0 %v9695_v7  ;;  %415 = vadd.xlane.f32.xlu1 %v414_v44 }
  0xe8   :  { %1480 = vmatpush1.bf16.msra.mxu1 %v9694_v6  ;;  %410 = vadd.xlane.f32.xlu0 %v409_v47  ;;  %v10259_v47 = vld [vmem:[#allocation5 + $0x8] sm:$0xff] }
  0xe9   :  { %1481 = vmatprep.subr.bf16.mxu1 %v9697_v9 }
  0xea   :  { %1400 = vmatpush1.bf16.msra.mxu0 %v9699_v23  ;;  %v10802_v23 = vsub.s32 1, %v10799_v18 }
  0xeb   :  { %1401 = vmatprep.subr.bf16.mxu0 %v9701_v33  ;;  %v10256_v33 = vld [vmem:[#allocation2 + $0x10] sm:$0xff] }
  0xec   :  { %1482 = vmatpush1.bf16.msra.mxu1 %v9700_v24  ;;  %v10805_v24 = vsub.s32 0, %v10799_v18  ;;  %v10822_v28 = vrot.slane %v10813_v26, %v10802_v23  ;;  %v10834_v40 = vrot.slane %v10818_v27, %v10802_v23 }
  0xed   :  { %1483 = vmatprep.subr.bf16.mxu1 %v9703_v36 }
  0xee   :  { %1402 = vmatpush1.bf16.msra.mxu0 %v9705_v42  ;;  %v10826_v29 = vrot.slane %v10813_v26, %v10805_v24  ;;  %v10838_v41 = vrot.slane %v10818_v27, %v10805_v24 }
  0xef   :  { %1403 = vmatprep.subr.bf16.mxu0 %v9707_v45 }
  0xf0   :  { %1484 = vmatpush1.bf16.msra.mxu1 %v9706_v43 }
  0xf1   :  { %1485 = vmatprep.subr.bf16.mxu1 %v9709_v46  ;;  %v10844_v46 = vrot.slane %v10818_v27, %v10808_v25 }
  0xf2   :  { %1404 = vmatpush1.bf16.msra.mxu0 %v9711_v48 }
  0xf3   :  { %1405 = vmatprep.subr.bf16.mxu0 %v9713_v50 }
  0xf4   :  { %1486 = vmatpush1.bf16.msra.mxu1 %v9712_v49  ;;  %v10260_v49 = vld [vmem:[#allocation5 + $0x28] sm:$0xff] }
  0xf5   :  { %1487 = vmatprep.subr.bf16.mxu1 %v9715_v51 }
  0xf6   :  { %1406 = vmatpush1.bf16.msra.mxu0 %v9717_v52 }
  0xf7   :  { %1407 = vmatprep.subr.bf16.mxu0 %v9719_v54 }
  0xf8   :  { %1488 = vmatpush1.bf16.msra.mxu1 %v9718_v53 }
  0xf9   :  { %1489 = vmatprep.subr.bf16.mxu1 %v9721_v55 }
  0xfa   :  { %1408 = vmatpush1.bf16.msra.mxu0 %v9723_v56 }
  0xfb   :  { %1409 = vmatprep.subr.bf16.mxu0 %v9725_v58 }
  0xfc   :  { %1490 = vmatpush1.bf16.msra.mxu1 %v9724_v57 }
  0xfd   :  { %1491 = vmatprep.subr.bf16.mxu1 %v9727_v59  ;;  %v10261_v59 = vld [vmem:[#allocation5] sm:$0xff] }
  0xfe   :  { %1410 = vmatpush1.bf16.msra.mxu0 %v9729_v60 }
  0xff   :  { %1420 = vmatprep.subr.bf16.mxu0 %v9733_v62 }
 0x100   :  { %1492 = vmatpush1.bf16.msra.mxu1 %v9730_v61  ;;  %v10262_v61 = vld [vmem:[#allocation5 + $0x20] sm:$0xff] }
 0x101   :  { %1502 = vmatprep.subr.bf16.mxu1 %v9736_v63 }
 0x150   :  { %v190_v0 = vpop.xlane.xlu0 %189 }
 0x151   :  { %v192_v1 = vmul.f32 0.001953125, %v190_v0 }
 0x152   :  { %v301_v2 = vpop.xlane.xlu1 %300 }
 0x153   :  { %v10791_v3 = vmul.f32 0.001953125, %v301_v2  ;;  %v203_v5 = vmul.f32 %v192_v1, %v192_v1  ;;  %v205_v32 = vsub.f32 %v10255_v31, %v192_v1  ;;  %v207_v34 = vsub.f32 %v10256_v33, %v192_v1  ;;  %v9745_v33 = vld [vmem:[#allocation7 + $0x244] ss:$16 sps:$4 sm:$0xff]  }
 0x154   :  { %v201_v4 = vpop.xlane.xlu0 %200  ;;  %v208_v36 = vsub.f32 %v10257_v35, %v192_v1  ;;  %v206_v38 = vsub.f32 %v10258_v37, %v192_v1  ;;  %v9748_v35 = vld [vmem:[#allocation7 + $0x24c] ss:$16 sps:$4 sm:$0xff]  }
 0x155   :  { %v202_v6 = vmul.f32 0.001953125, %v201_v4  ;;  %v425_v11 = vmul.f32 %v10791_v3, %v10791_v3  ;;  %v442_v48 = vsub.f32 %v10259_v47, %v10791_v3  ;;  %v441_v60 = vsub.f32 %v10261_v59, %v10791_v3  ;;  %v9754_v59 = vld [vmem:[#allocation7 + $0x26c] ss:$16 sps:$4 sm:$0xff]  }
 0x156   :  { %v306_v7 = vpop.xlane.xlu1 %305 }
 0x157   :  { %v10793_v8 = vmul.f32 0.001953125, %v306_v7  ;;  %v204_v9 = vsub.f32 %v202_v6, %v203_v5  ;;  %v9731_v6 = vld [vmem:[#allocation7 + $0x200] ss:$16 sps:$4 sm:$0xff]   ;;  %v9734_v7 = vld [vmem:[#allocation7 + $0x208] ss:$16 sps:$4 sm:$0xff]  }
 0x158   :  { %v381_v12 = vpop.xlane.xlu0 %380 }
 0x159   :  { %v209_v13 = vadd.f32 1e-05, %v204_v9  ;;  %v426_v14 = vmul.f32 %v10793_v8, %v10793_v8  ;;  %v417_v16 = vmul.f32 0.001953125, %v381_v12  ;;  %v446_v50 = vsub.f32 %v10260_v49, %v10793_v8 }
 0x15a   :  { %v386_v15 = vpop.xlane.xlu1 %385  ;;  %v445_v62 = vsub.f32 %v10262_v61, %v10793_v8 }
 0x15b   :  { %v418_v17 = vmul.f32 0.001953125, %v386_v15  ;;  %10211 = vrsqrt.f32 %v209_v13  ;;  %v433_v19 = vsub.f32 %v417_v16, %v425_v11  ;;  %v9742_v11 = vld [vmem:[#allocation7 + $0x22c] ss:$16 sps:$4 sm:$0xff]   ;;  %v9737_v13 = vld [vmem:[#allocation7 + $0x220] ss:$16 sps:$4 sm:$0xff]  }
 0x15d   :  { %v434_v20 = vsub.f32 %v418_v17, %v426_v14  ;;  %v473_v21 = vadd.f32 1e-05, %v433_v19 }
 0x15e   :  { %v316_v55 = vpop.xlane.xlu1 %315 }
 0x15f   :  { %v474_v22 = vadd.f32 1e-05, %v434_v20  ;;  %10213 = vrsqrt.f32 %v473_v21  ;;  %v10866_v0 = vmul.f32 0.001953125, %v316_v55  ;;  %v311_v1 = vpop.xlane.xlu0 %310 }
 0x160   :  { %v10874_v14 = vmul.f32 0.001953125, %v311_v1  ;;  %v9749_v1 = vld [vmem:[#allocation7 + $0x260] ss:$16 sps:$4 sm:$0xff]  }
 0x161   :  { %10215 = vrsqrt.f32 %v474_v22  ;;  %v428_v17 = vmul.f32 %v10866_v0, %v10866_v0 }
 0x162   :  { %v396_v12 = vpop.xlane.xlu1 %395 }
 0x163   :  { %v420_v20 = vmul.f32 0.001953125, %v396_v12  ;;  %v391_v21 = vpop.xlane.xlu0 %390 }
 0x165   :  { %v10212_v39 = vpop.eup %10211 }
 0x166   :  { %v212_v42 = vmul.f32 %v10212_v39, %v206_v38  ;;  %v211_v43 = vmul.f32 %v10212_v39, %v205_v32  ;;  %v214_v44 = vmul.f32 %v10212_v39, %v208_v36  ;;  %v10840_v45 = vmul.f32 %v10212_v39, %v207_v34  ;;  %v9740_v32 = vld [vmem:[#allocation7 + $0x228] ss:$16 sps:$4 sm:$0xff]   ;;  %v326_v38 = vpop.xlane.xlu1 %325  ;;  %v9743_v39 = vld [vmem:[#allocation7 + $0x240] ss:$16 sps:$4 sm:$0xff]  }
 0x167   :  { %v419_v34 = vmul.f32 0.001953125, %v391_v21  ;;  %v321_v49 = vpop.xlane.xlu0 %320 }
 0x168   :  { %v237_v51 = vmul.f32 %v10822_v28, %v212_v42  ;;  %v236_v52 = vmul.f32 %v10826_v29, %v211_v43  ;;  %v239_v53 = vmul.f32 %v10830_v30, %v214_v44  ;;  %v436_v42 = vsub.f32 %v420_v20, %v428_v17  ;;  %v9755_v17 = vld [vmem:[#allocation7 + $0x280] ss:$16 sps:$4 sm:$0xff]  }
 0x169   :  { %v10851_v54 = vpop.eup %10213  ;;  %v427_v43 = vmul.f32 %v10874_v14, %v10874_v14  ;;  %v10888_v44 = vmul.f32 0.001953125, %v326_v38  ;;  %v10264_v38 = vld [vmem:[#allocation5 + $0x68] sm:$0xff] }
 0x16a   :  { %v10856_v57 = vadd.f32 %v10834_v40, %v237_v51  ;;  %v10859_v58 = vadd.f32 %v10838_v41, %v236_v52  ;;  %v10864_v63 = vadd.f32 %v10844_v46, %v239_v53  ;;  %v490_v2 = vmul.f32 %v10851_v54, %v442_v48  ;;  %v9746_v51 = vld [vmem:[#allocation7 + $0x248] ss:$16 sps:$4 sm:$0xff]   ;;  %v9751_v52 = vld [vmem:[#allocation7 + $0x264] ss:$16 sps:$4 sm:$0xff]  }
 0x16b   :  { %v10853_v56 = vpop.eup %10215  ;;  %v489_v22 = vmul.f32 %v10851_v54, %v441_v60  ;;  %v476_v53 = vadd.f32 1e-05, %v436_v42  ;;  %v435_v55 = vsub.f32 %v419_v34, %v427_v43  ;;  %v10894_v60 = vmul.f32 0.001953125, %v321_v49  ;;  %v9761_v49 = vld [vmem:[#allocation7 + $0x2a0] ss:$16 sps:$4 sm:$0xff]  }
 0x16c   :  { %11667 = vst [vmem:[#allocation27_spill] sm:$0xff] %v10864_v63  ;;  %v494_v4 = vmul.f32 %v10853_v56, %v446_v50  ;;  %v586_v5 = vpack.c.bf16 %v10856_v57, %v10856_v57  ;;  %v585_v9 = vpack.c.bf16 %v10859_v58, %v10859_v58  ;;  %v522_v15 = vmul.f32 %v490_v2, %v10822_v28 }
 0x16d   :  { %v588_v19 = vpack.c.bf16 %v10864_v63, %v10864_v63  ;;  %v493_v31 = vmul.f32 %v10853_v56, %v445_v62  ;;  %v521_v47 = vmul.f32 %v489_v22, %v10826_v29  ;;  %v430_v61 = vmul.f32 %v10888_v44, %v10888_v44  ;;  %v406_v62 = vpop.xlane.xlu1 %405 }
 0x16e   :  { %1411 = vmatprep.mubr.bf16.mxu0 %v586_v5  ;;  %1493 = vmatprep.mubr.bf16.mxu1 %v586_v5  ;;  %v526_v16 = vmul.f32 %v494_v4, %v10822_v28  ;;  %v554_v36 = vadd.f32 %v522_v15, %v10834_v40  ;;  %10217 = vrsqrt.f32 %v476_v53  ;;  %v475_v2 = vadd.f32 1e-05, %v435_v55  ;;  %v10266_v53 = vld [vmem:[#allocation5 + $0x48] sm:$0xff] }
 0x16f   :  { %1412 = vmatmul.mubr.bf16.vlgmr.msra.gmra.mrb[0].mxu0 %v585_v9  ;;  %1494 = vmatmul.mubr.bf16.vlgmr.msra.gmra.mrb[0].mxu1 %v585_v9  ;;  %v525_v50 = vmul.f32 %v493_v31, %v10826_v29  ;;  %v422_v4 = vmul.f32 0.001953125, %v406_v62  ;;  %v553_v5 = vadd.f32 %v521_v47, %v10838_v41  ;;  %v9757_v9 = vld [vmem:[#allocation7 + $0x284] ss:$16 sps:$4 sm:$0xff]   ;;  %v450_v55 = vsub.f32 %v10266_v53, %v10874_v14  ;;  %v9764_v62 = vld [vmem:[#allocation7 + $0x2a8] ss:$16 sps:$4 sm:$0xff]  }
 0x170   :  { %1421 = vmatpush1.bf16.msra.mxu0 %v9731_v6  ;;  %1503 = vmatpush1.bf16.msra.mxu1 %v9734_v7  ;;  %v558_v37 = vadd.f32 %v526_v16, %v10834_v40  ;;  %v401_v6 = vpop.xlane.xlu0 %400  ;;  %v9752_v7 = vld [vmem:[#allocation7 + $0x268] ss:$16 sps:$4 sm:$0xff]   ;;  %10219 = vrsqrt.f32 %v475_v2  ;;  %v10270_v53 = vld [vmem:[#allocation5 + $0x80] sm:$0xff] }
 0x171   :  { %1452 = vmatprep.mubr.bf16.mxu0 %v588_v19  ;;  %1534 = vmatprep.mubr.bf16.mxu1 %v588_v19  ;;  %v421_v12 = vmul.f32 0.001953125, %v401_v6  ;;  %v336_v15 = vpop.xlane.xlu1 %335  ;;  %v557_v16 = vadd.f32 %v525_v50, %v10838_v41  ;;  %v9772_v6 = vld [vmem:[#allocation7 + $0x2cc] ss:$16 sps:$4 sm:$0xff]  }
 0x172   :  { %1422 = vmatprep.subr.bf16.mxu0 %v9739_v10  ;;  %1504 = vmatprep.subr.bf16.mxu1 %v9742_v11  ;;  %v10891_v48 = vpack.c.bf16 %v558_v37, %v554_v36  ;;  %v438_v10 = vsub.f32 %v422_v4, %v430_v61  ;;  %v429_v11 = vmul.f32 %v10894_v60, %v10894_v60  ;;  %v10902_v21 = vmul.f32 0.001953125, %v336_v15  ;;  %v10263_v36 = vld [vmem:[#allocation5 + $0x60] sm:$0xff]  ;;  %v10268_v15 = vld [vmem:[#allocation5 + $0xa8] sm:$0xff] }
 0x173   :  { %v10904_v31 = vpack.c.bf16 %v557_v16, %v553_v5  ;;  %v453_v37 = vsub.f32 %v10263_v36, %v10866_v0  ;;  %v462_v16 = vsub.f32 %v10268_v15, %v10888_v44  ;;  %v10269_v36 = vld [vmem:[#allocation5 + $0x88] sm:$0xff] }
 0x174   :  { %1423 = vmatpush1.bf16.msra.mxu0 %v9737_v13  ;;  %1505 = vmatpush1.bf16.msra.mxu1 %v9740_v32  ;;  %v9760_v13 = vld [vmem:[#allocation7 + $0x28c] ss:$16 sps:$4 sm:$0xff]   ;;  %v478_v19 = vadd.f32 1e-05, %v438_v10  ;;  %v437_v20 = vsub.f32 %v421_v12, %v429_v11  ;;  %v331_v22 = vpop.xlane.xlu0 %330  ;;  %v9758_v32 = vld [vmem:[#allocation7 + $0x288] ss:$16 sps:$4 sm:$0xff]   ;;  %v432_v43 = vmul.f32 %v10902_v21, %v10902_v21 }
 0x175   :  { %1424 = vmatprep.subr.bf16.mxu0 %v9745_v33  ;;  %1506 = vmatprep.subr.bf16.mxu1 %v9748_v35  ;;  %v9763_v33 = vld [vmem:[#allocation7 + $0x2a4] ss:$16 sps:$4 sm:$0xff]   ;;  %v9766_v35 = vld [vmem:[#allocation7 + $0x2ac] ss:$16 sps:$4 sm:$0xff]   ;;  %v10908_v42 = vmul.f32 0.001953125, %v331_v22  ;;  %v416_v47 = vpop.xlane.xlu1 %415 }
 0x176   :  { %10221 = vrsqrt.f32 %v478_v19  ;;  %v477_v34 = vadd.f32 1e-05, %v437_v20  ;;  %v424_v50 = vmul.f32 0.001953125, %v416_v47  ;;  %v9767_v11 = vld [vmem:[#allocation7 + $0x2c0] ss:$16 sps:$4 sm:$0xff]  }
 0x177   :  { %v431_v4 = vmul.f32 %v10908_v42, %v10908_v42  ;;  %v10267_v12 = vld [vmem:[#allocation5 + $0xa0] sm:$0xff] }
 0x178   :  { %1425 = vmatpush1.bf16.msra.mxu0 %v9743_v39  ;;  %1507 = vmatpush1.bf16.msra.mxu1 %v9746_v51  ;;  %v454_v39 = vsub.f32 %v10264_v38, %v10866_v0  ;;  %10223 = vrsqrt.f32 %v477_v34  ;;  %v10265_v51 = vld [vmem:[#allocation5 + $0x40] sm:$0xff]  ;;  %v10914_v61 = vpop.eup %10217  ;;  %v440_v2 = vsub.f32 %v424_v50, %v432_v43  ;;  %v9770_v34 = vld [vmem:[#allocation7 + $0x2c8] ss:$16 sps:$4 sm:$0xff]  }
 0x179   :  { %1426 = vmatprep.subr.bf16.mxu0 %v9751_v52  ;;  %1508 = vmatprep.subr.bf16.mxu1 %v9754_v59  ;;  %v449_v52 = vsub.f32 %v10265_v51, %v10874_v14  ;;  %v411_v59 = vpop.xlane.xlu0 %410 }
 0x17a   :  { %v423_v5 = vmul.f32 0.001953125, %v411_v59  ;;  %v10920_v10 = vpop.eup %10219 }
 0x17b   :  { %v498_v20 = vmul.f32 %v10920_v10, %v450_v55  ;;  %v457_v55 = vsub.f32 %v10270_v53, %v10894_v60  ;;  %v9790_v53 = vld [vmem:[#allocation7 + $0x32c] ss:$16 sps:$4 sm:$0xff]  }
 0x17c   :  { %1427 = vmatpush1.bf16.msra.mxu0 %v9749_v1  ;;  %1509 = vmatpush1.bf16.msra.mxu1 %v9752_v7  ;;  %v9769_v1 = vld [vmem:[#allocation7 + $0x2c4] ss:$16 sps:$4 sm:$0xff]   ;;  %v502_v7 = vmul.f32 %v10914_v61, %v454_v39  ;;  %v439_v19 = vsub.f32 %v423_v5, %v431_v4  ;;  %v9778_v39 = vld [vmem:[#allocation7 + $0x2ec] ss:$16 sps:$4 sm:$0xff]  }
 0x17d   :  { %1428 = vmatprep.subr.bf16.mxu0 %v9757_v9  ;;  %1510 = vmatprep.subr.bf16.mxu1 %v9760_v13  ;;  %v501_v9 = vmul.f32 %v10914_v61, %v453_v37  ;;  %v461_v13 = vsub.f32 %v10267_v12, %v10888_v44  ;;  %v458_v37 = vsub.f32 %v10269_v36, %v10894_v60  ;;  %v9784_v12 = vld [vmem:[#allocation7 + $0x30c] ss:$16 sps:$4 sm:$0xff]  }
 0x17e   :  { %v534_v22 = vmul.f32 %v502_v7, %v10822_v28  ;;  %v479_v38 = vadd.f32 1e-05, %v439_v19  ;;  %v530_v43 = vmul.f32 %v498_v20, %v10822_v28  ;;  %v9782_v20 = vld [vmem:[#allocation7 + $0x308] ss:$16 sps:$4 sm:$0xff]  }
 0x17f   :  { %v10274_v36 = vld [vmem:[#allocation5 + $0xe8] sm:$0xff] }
 0x180   :  { %1429 = vmatpush1.bf16.msra.mxu0 %v9755_v17  ;;  %1511 = vmatpush1.bf16.msra.mxu1 %v9758_v32  ;;  %v480_v17 = vadd.f32 1e-05, %v440_v2  ;;  %v497_v32 = vmul.f32 %v10920_v10, %v449_v52  ;;  %v566_v47 = vadd.f32 %v534_v22, %v10834_v40  ;;  %v10932_v51 = vpop.eup %10221  ;;  %v9776_v52 = vld [vmem:[#allocation7 + $0x2e8] ss:$16 sps:$4 sm:$0xff]  }
 0x181   :  { %1430 = vmatprep.subr.bf16.mxu0 %v9763_v33  ;;  %1512 = vmatprep.subr.bf16.mxu1 %v9766_v35  ;;  %v533_v33 = vmul.f32 %v501_v9, %v10826_v29  ;;  %v9775_v35 = vld [vmem:[#allocation7 + $0x2e4] ss:$16 sps:$4 sm:$0xff]   ;;  %v510_v2 = vmul.f32 %v10932_v51, %v462_v16  ;;  %v509_v4 = vmul.f32 %v10932_v51, %v461_v13  ;;  %v9779_v16 = vld [vmem:[#allocation7 + $0x300] ss:$16 sps:$4 sm:$0xff]   ;;  %v10272_v13 = vld [vmem:[#allocation5 + $0x38] sm:$0xff] }
 0x182   :  { %10225 = vrsqrt.f32 %v480_v17  ;;  %v529_v50 = vmul.f32 %v497_v32, %v10826_v29  ;;  %v10940_v5 = vpop.eup %10223  ;;  %v9781_v9 = vld [vmem:[#allocation7 + $0x304] ss:$16 sps:$4 sm:$0xff]   ;;  %v448_v22 = vsub.f32 %v10272_v13, %v10793_v8 }
 0x183   :  { %10227 = vrsqrt.f32 %v479_v38  ;;  %v565_v59 = vadd.f32 %v533_v33, %v10838_v41  ;;  %v506_v19 = vmul.f32 %v10940_v5, %v458_v37  ;;  %v505_v32 = vmul.f32 %v10940_v5, %v457_v55  ;;  %v10275_v55 = vld [vmem:[#allocation5 + $0xc0] sm:$0xff] }
 0x184   :  { %1431 = vmatpush1.bf16.msra.mxu0 %v9761_v49  ;;  %1513 = vmatpush1.bf16.msra.mxu1 %v9764_v62  ;;  %v9773_v49 = vld [vmem:[#allocation7 + $0x2e0] ss:$16 sps:$4 sm:$0xff]   ;;  %v562_v62 = vadd.f32 %v530_v43, %v10834_v40  ;;  %v541_v33 = vmul.f32 %v509_v4, %v10826_v29  ;;  %v470_v38 = vsub.f32 %v10274_v36, %v10902_v21  ;;  %v9788_v4 = vld [vmem:[#allocation7 + $0x328] ss:$16 sps:$4 sm:$0xff]  }
 0x185   :  { %1432 = vmatprep.subr.bf16.mxu0 %v9769_v1  ;;  %1514 = vmatprep.subr.bf16.mxu1 %v9772_v6  ;;  %v561_v1 = vadd.f32 %v529_v50, %v10838_v41  ;;  %v10271_v6 = vld [vmem:[#allocation5 + $0x18] sm:$0xff]  ;;  %v537_v43 = vmul.f32 %v505_v32, %v10826_v29  ;;  %v9787_v50 = vld [vmem:[#allocation7 + $0x324] ss:$16 sps:$4 sm:$0xff]  }
 0x186   :  { %v444_v7 = vsub.f32 %v10271_v6, %v10791_v3  ;;  %v10943_v15 = vpack.c.bf16 %v566_v47, %v562_v62  ;;  %v573_v47 = vadd.f32 %v541_v33, %v10838_v41  ;;  %v10276_v62 = vld [vmem:[#allocation5 + $0xc8] sm:$0xff] }
 0x187   :  { %v10945_v17 = vpack.c.bf16 %v565_v59, %v561_v1  ;;  %v465_v59 = vsub.f32 %v10275_v55, %v10908_v42  ;;  %v466_v1 = vsub.f32 %v10276_v62, %v10908_v42  ;;  %v569_v6 = vadd.f32 %v537_v43, %v10838_v41  ;;  %v9794_v43 = vld [vmem:[#allocation7 + $0x348] ss:$16 sps:$4 sm:$0xff]  }
 0x188   :  { %1433 = vmatpush1.bf16.msra.mxu0 %v9767_v11  ;;  %1515 = vmatpush1.bf16.msra.mxu1 %v9770_v34  ;;  %v542_v11 = vmul.f32 %v510_v2, %v10822_v28  ;;  %v10273_v34 = vld [vmem:[#allocation5 + $0xe0] sm:$0xff] }
 0x189   :  { %1434 = vmatprep.subr.bf16.mxu0 %v9775_v35  ;;  %1516 = vmatprep.subr.bf16.mxu1 %v9778_v39  ;;  %v469_v35 = vsub.f32 %v10273_v34, %v10902_v21  ;;  %v538_v39 = vmul.f32 %v506_v19, %v10822_v28  ;;  %v492_v19 = vmul.f32 %v10851_v54, %v444_v7  ;;  %v9793_v7 = vld [vmem:[#allocation7 + $0x344] ss:$16 sps:$4 sm:$0xff]  }
 0x18a   :  { %v574_v37 = vadd.f32 %v542_v11, %v10834_v40  ;;  %v10972_v33 = vpack.c.bf16 %v573_v47, %v569_v6  ;;  %v10989_v6 = vsub.s32 2, %v10799_v18 }
 0x18b   :  { %v570_v2 = vadd.f32 %v538_v39, %v10834_v40  ;;  %v524_v34 = vmul.f32 %v492_v19, %v10830_v30  ;;  %v10277_v19 = vld [vmem:[#allocation5 + $0x10] sm:$0xff] }
 0x18c   :  { %1435 = vmatpush1.bf16.msra.mxu0 %v9773_v49  ;;  %1517 = vmatpush1.bf16.msra.mxu1 %v9776_v52  ;;  %v10961_v49 = vpop.eup %10225  ;;  %v9785_v52 = vld [vmem:[#allocation7 + $0x320] ss:$16 sps:$4 sm:$0xff]  }
 0x18d   :  { %1436 = vmatprep.subr.bf16.mxu0 %v9781_v9  ;;  %1518 = vmatprep.subr.bf16.mxu1 %v9784_v12  ;;  %v496_v9 = vmul.f32 %v10853_v56, %v448_v22  ;;  %v10966_v12 = vpack.c.bf16 %v574_v37, %v570_v2  ;;  %v518_v13 = vmul.f32 %v10961_v49, %v470_v38  ;;  %v10970_v32 = vpop.eup %10227  ;;  %v9796_v22 = vld [vmem:[#allocation7 + $0x34c] ss:$16 sps:$4 sm:$0xff]   ;;  %v9791_v37 = vld [vmem:[#allocation7 + $0x340] ss:$16 sps:$4 sm:$0xff]  }
 0x18e   :  { %v517_v11 = vmul.f32 %v10961_v49, %v469_v35  ;;  %v514_v39 = vmul.f32 %v10970_v32, %v466_v1  ;;  %v513_v35 = vmul.f32 %v10970_v32, %v465_v59  ;;  %v9799_v59 = vld [vmem:[#allocation7 + $0x364] ss:$16 sps:$4 sm:$0xff]   ;;  %v9802_v2 = vld [vmem:[#allocation7 + $0x36c] ss:$16 sps:$4 sm:$0xff]  }
 0x18f   :  { %v528_v36 = vmul.f32 %v496_v9, %v10830_v30  ;;  %v550_v38 = vmul.f32 %v518_v13, %v10822_v28  ;;  %v10279_v13 = vld [vmem:[#allocation5 + $0x58] sm:$0xff] }
 0x190   :  { %1437 = vmatpush1.bf16.msra.mxu0 %v9779_v16  ;;  %1519 = vmatpush1.bf16.msra.mxu1 %v9782_v20  ;;  %v549_v16 = vmul.f32 %v517_v11, %v10826_v29  ;;  %v556_v20 = vadd.f32 %v524_v34, %v10844_v46  ;;  %v546_v55 = vmul.f32 %v514_v39, %v10822_v28  ;;  %v10280_v34 = vld [vmem:[#allocation5 + $0x78] sm:$0xff] }
 0x191   :  { %1438 = vmatprep.subr.bf16.mxu0 %v9787_v50  ;;  %1520 = vmatprep.subr.bf16.mxu1 %v9790_v53  ;;  %v560_v47 = vadd.f32 %v528_v36, %v10844_v46  ;;  %v582_v50 = vadd.f32 %v550_v38, %v10834_v40  ;;  %v545_v53 = vmul.f32 %v513_v35, %v10826_v29  ;;  %v9800_v39 = vld [vmem:[#allocation7 + $0x368] ss:$16 sps:$4 sm:$0xff]   ;;  %v9808_v38 = vld [vmem:[#allocation7 + $0x38c] ss:$16 sps:$4 sm:$0xff]  }
 0x192   :  { %v581_v62 = vadd.f32 %v549_v16, %v10838_v41  ;;  %v443_v28 = vsub.f32 %v10277_v19, %v10791_v3  ;;  %v578_v9 = vadd.f32 %v546_v55, %v10834_v40  ;;  %v452_v11 = vsub.f32 %v10279_v13, %v10874_v14  ;;  %v9797_v3 = vld [vmem:[#allocation7 + $0x360] ss:$16 sps:$4 sm:$0xff]   ;;  %v10283_v55 = vld [vmem:[#allocation5 + $0xb8] sm:$0xff]  ;;  %v9811_v19 = vld [vmem:[#allocation7 + $0x3a4] ss:$16 sps:$4 sm:$0xff]  }
 0x193   :  { %v10986_v1 = vpack.c.bf16 %v560_v47, %v556_v20  ;;  %v577_v29 = vadd.f32 %v545_v53, %v10838_v41  ;;  %v456_v36 = vsub.f32 %v10280_v34, %v10866_v0  ;;  %v10281_v40 = vld [vmem:[#allocation5 + $0x50] sm:$0xff]  ;;  %v11004_v35 = vrot.slane %v10813_v26, %v10989_v6  ;;  %v10284_v53 = vld [vmem:[#allocation5 + $0x98] sm:$0xff] }
 0x194   :  { %1439 = vmatpush1.bf16.msra.mxu0 %v9785_v52  ;;  %1521 = vmatpush1.bf16.msra.mxu1 %v9788_v4  ;;  %v10278_v52 = vld [vmem:[#allocation5 + $0x30] sm:$0xff]  ;;  %v451_v41 = vsub.f32 %v10281_v40, %v10874_v14  ;;  %v491_v47 = vmul.f32 %v10851_v54, %v443_v28  ;;  %v500_v14 = vmul.f32 %v10920_v10, %v452_v11  ;;  %v9814_v28 = vld [vmem:[#allocation7 + $0x3ac] ss:$16 sps:$4 sm:$0xff]  }
 0x195   :  { %1440 = vmatprep.subr.bf16.mxu0 %v9793_v7  ;;  %1522 = vmatprep.subr.bf16.mxu1 %v9796_v22  ;;  %v447_v4 = vsub.f32 %v10278_v52, %v10793_v8  ;;  %v10997_v7 = vpack.c.bf16 %v582_v50, %v578_v9  ;;  %v10999_v22 = vpack.c.bf16 %v581_v62, %v577_v29  ;;  %v9805_v8 = vld [vmem:[#allocation7 + $0x384] ss:$16 sps:$4 sm:$0xff]   ;;  %v9803_v54 = vld [vmem:[#allocation7 + $0x380] ss:$16 sps:$4 sm:$0xff]  }
 0x196   :  { %v10282_v16 = vld [vmem:[#allocation5 + $0x70] sm:$0xff]  ;;  %v464_v50 = vsub.f32 %v10283_v55, %v10888_v44  ;;  %v460_v26 = vsub.f32 %v10284_v53, %v10894_v60  ;;  %v523_v62 = vmul.f32 %v491_v47, %v11004_v35  ;;  %v238_v55 = vmul.f32 %v11004_v35, %v10840_v45  ;;  %v10288_v53 = vld [vmem:[#allocation5 + $0xf8] sm:$0xff] }
 0x197   :  { %v455_v20 = vsub.f32 %v10282_v16, %v10866_v0  ;;  %v504_v0 = vmul.f32 %v10914_v61, %v456_v36  ;;  %v10286_v36 = vld [vmem:[#allocation5 + $0x90] sm:$0xff] }
 0x198   :  { %1441 = vmatpush1.bf16.msra.mxu0 %v9791_v37  ;;  %1523 = vmatpush1.bf16.msra.mxu1 %v9794_v43  ;;  %v11010_v37 = vrot.slane %v10818_v27, %v10989_v6  ;;  %v495_v43 = vmul.f32 %v10853_v56, %v447_v4  ;;  %v532_v56 = vmul.f32 %v500_v14, %v10830_v30  ;;  %v10285_v4 = vld [vmem:[#allocation5 + $0xb0] sm:$0xff] }
 0x199   :  { %1442 = vmatprep.subr.bf16.mxu0 %v9799_v59  ;;  %1524 = vmatprep.subr.bf16.mxu1 %v9802_v2  ;;  %v9806_v59 = vld [vmem:[#allocation7 + $0x388] ss:$16 sps:$4 sm:$0xff]   ;;  %v499_v2 = vmul.f32 %v10920_v10, %v451_v41  ;;  %v536_v29 = vmul.f32 %v504_v0, %v10830_v30  ;;  %v503_v52 = vmul.f32 %v10914_v61, %v455_v20  ;;  %v9809_v61 = vld [vmem:[#allocation7 + $0x3a0] ss:$16 sps:$4 sm:$0xff]   ;;  %v9820_v20 = vld [vmem:[#allocation7 + $0x3cc] ss:$16 sps:$4 sm:$0xff]  }
 0x19a   :  { %v527_v27 = vmul.f32 %v495_v43, %v11004_v35  ;;  %v555_v9 = vadd.f32 %v523_v62, %v11010_v37  ;;  %v463_v13 = vsub.f32 %v10285_v4, %v10888_v44  ;;  %v564_v34 = vadd.f32 %v532_v56, %v10844_v46  ;;  %v10289_v56 = vld [vmem:[#allocation5 + $0xf0] sm:$0xff] }
 0x19b   :  { %v459_v10 = vsub.f32 %v10286_v36, %v10894_v60  ;;  %v568_v40 = vadd.f32 %v536_v29, %v10844_v46  ;;  %v531_v41 = vmul.f32 %v499_v2, %v11004_v35  ;;  %v535_v44 = vmul.f32 %v503_v52, %v11004_v35  ;;  %v9817_v60 = vld [vmem:[#allocation7 + $0x3c4] ss:$16 sps:$4 sm:$0xff]   ;;  %v1560_v29 = vld [vmem:[#allocation10 + $0x8] sm:$0xff] }
 0x19c   :  { %1443 = vmatpush1.bf16.msra.mxu0 %v9797_v3  ;;  %1525 = vmatpush1.bf16.msra.mxu1 %v9800_v39  ;;  %v559_v11 = vadd.f32 %v527_v27, %v11010_v37  ;;  %v10287_v3 = vld [vmem:[#allocation5 + $0xd8] sm:$0xff]  ;;  %v508_v16 = vmul.f32 %v10940_v5, %v460_v26  ;;  %v512_v14 = vmul.f32 %v10932_v51, %v464_v50  ;;  %v11044_v27 = vld [vmem:[#allocation10] sm:$0xff]  ;;  %v1564_v52 = vld [vmem:[#allocation10 + $0x28] sm:$0xff] }
 0x19d   :  { %1444 = vmatprep.subr.bf16.mxu0 %v9805_v8  ;;  %1526 = vmatprep.subr.bf16.mxu1 %v9808_v38  ;;  %v468_v39 = vsub.f32 %v10287_v3, %v10908_v42  ;;  %v9812_v8 = vld [vmem:[#allocation7 + $0x3a8] ss:$16 sps:$4 sm:$0xff]   ;;  %v11035_v47 = vpack.c.bf16 %v568_v40, %v564_v34  ;;  %v563_v43 = vadd.f32 %v531_v41, %v11010_v37  ;;  %v9826_v36 = vld [vmem:[#allocation7 + $0x3ec] ss:$16 sps:$4 sm:$0xff]  }
 0x19e   :  { %v11031_v38 = vpack.c.bf16 %v559_v11, %v555_v9  ;;  %v472_v62 = vsub.f32 %v10288_v53, %v10902_v21  ;;  %v567_v0 = vadd.f32 %v535_v44, %v11010_v37  ;;  %v540_v26 = vmul.f32 %v508_v16, %v10830_v30  ;;  %v1563_v9 = vld [vmem:[#allocation10 + $0x20] sm:$0xff]  ;;  %v1568_v53 = vld [vmem:[#allocation10 + $0x48] sm:$0xff] }
 0x19f   :  { %v471_v2 = vsub.f32 %v10289_v56, %v10902_v21  ;;  %v507_v45 = vmul.f32 %v10940_v5, %v459_v10  ;;  %v511_v34 = vmul.f32 %v10932_v51, %v463_v13  ;;  %v9823_v21 = vld [vmem:[#allocation7 + $0x3e4] ss:$16 sps:$4 sm:$0xff]   ;;  %v516_v5 = vmul.f32 %v10970_v32, %v468_v39  ;;  %v9821_v13 = vld [vmem:[#allocation7 + $0x3e0] ss:$16 sps:$4 sm:$0xff]   ;;  %v9824_v44 = vld [vmem:[#allocation7 + $0x3e8] ss:$16 sps:$4 sm:$0xff]  }
 0x1a0   :  { %1445 = vmatpush1.bf16.msra.mxu0 %v9803_v54  ;;  %1527 = vmatpush1.bf16.msra.mxu1 %v9806_v59  ;;  %v9815_v54 = vld [vmem:[#allocation7 + $0x3c0] ss:$16 sps:$4 sm:$0xff]   ;;  %v9818_v59 = vld [vmem:[#allocation7 + $0x3c8] ss:$16 sps:$4 sm:$0xff]   ;;  %v11050_v4 = vpack.c.bf16 %v567_v0, %v563_v43  ;;  %v572_v11 = vadd.f32 %v540_v26, %v10844_v46  ;;  %v520_v40 = vmul.f32 %v10961_v49, %v472_v62 }
 0x1a1   :  { %1446 = vmatprep.subr.bf16.mxu0 %v9811_v19  ;;  %1528 = vmatprep.subr.bf16.mxu1 %v9814_v28  ;;  %v10290_v19 = vld [vmem:[#allocation5 + $0xd0] sm:$0xff]  ;;  %v544_v28 = vmul.f32 %v512_v14, %v10830_v30  ;;  %v539_v3 = vmul.f32 %v507_v45, %v11004_v35  ;;  %v543_v10 = vmul.f32 %v511_v34, %v11004_v35  ;;  %v1567_v16 = vld [vmem:[#allocation10 + $0x40] sm:$0xff] }
 0x1a2   :  { %v467_v50 = vsub.f32 %v10290_v19, %v10908_v42  ;;  %v8922_v41 = vcombine.high %v11044_v27, %v1563_v9  ;;  %v548_v39 = vmul.f32 %v516_v5, %v10830_v30  ;;  %v11067_v43 = vadd.f32 %v11010_v37, %v238_v55  ;;  %v1571_v14 = vld [vmem:[#allocation10 + $0x60] sm:$0xff]  ;;  %v1572_v62 = vld [vmem:[#allocation10 + $0x68] sm:$0xff] }
 0x1a3   :  { %v576_v42 = vadd.f32 %v544_v28, %v10844_v46  ;;  %v571_v51 = vadd.f32 %v539_v3, %v11010_v37  ;;  %v519_v26 = vmul.f32 %v10961_v49, %v471_v2  ;;  %v8921_v56 = vcombine.low %v11044_v27, %v1563_v9  ;;  %v1580_v9 = vld [vmem:[#allocation10 + $0xa8] sm:$0xff]  ;;  %v1587_v3 = vld [vmem:[#allocation10 + $0xe0] sm:$0xff] }
 0x1a4   :  { %1447 = vmatpush1.bf16.msra.mxu0 %v9809_v61  ;;  %1529 = vmatpush1.bf16.msra.mxu1 %v9812_v8  ;;  %v8924_v61 = vcombine.high %v1560_v29, %v1564_v52  ;;  %11668 = vst [vmem:[#allocation28_spill] sm:$0xff] %v11067_v43  ;;  %v515_v0 = vmul.f32 %v10970_v32, %v467_v50  ;;  %v1575_v32 = vld [vmem:[#allocation10 + $0x80] sm:$0xff]  ;;  %v1584_v5 = vld [vmem:[#allocation10 + $0xc8] sm:$0xff] }
 0x1a5   :  { %1448 = vmatprep.subr.bf16.mxu0 %v9817_v60  ;;  %1530 = vmatprep.subr.bf16.mxu1 %v9820_v20  ;;  %v11060_v8 = vpack.c.bf16 %v576_v42, %v572_v11  ;;  %v575_v60 = vadd.f32 %v543_v10, %v11010_v37  ;;  %v552_v20 = vmul.f32 %v520_v40, %v10830_v30  ;;  %v1579_v50 = vld [vmem:[#allocation10 + $0xa0] sm:$0xff]  ;;  %v1588_v10 = vld [vmem:[#allocation10 + $0xe8] sm:$0xff] }
 0x1a6   :  { %v8923_v19 = vcombine.low %v1560_v29, %v1564_v52  ;;  %v547_v28 = vmul.f32 %v515_v0, %v11004_v35  ;;  %v8930_v55 = vcombine.high %v1567_v16, %v1571_v14  ;;  %v8932_v45 = vcombine.high %v1568_v53, %v1572_v62  ;;  %v1583_v42 = vld [vmem:[#allocation10 + $0xc0] sm:$0xff]  ;;  %v1600_v0 = vld [vmem:[#allocation10 + $0x148] sm:$0xff] }
 0x1a7   :  { %v584_v30 = vadd.f32 %v552_v20, %v10844_v46  ;;  %v551_v11 = vmul.f32 %v519_v26, %v11004_v35  ;;  %v587_v49 = vpack.c.bf16 %v11067_v43, %v11067_v43  ;;  %v8929_v35 = vcombine.low %v1567_v16, %v1571_v14  ;;  %v1596_v16 = vld [vmem:[#allocation10 + $0x128] sm:$0xff] }
 0x1a8   :  { %1449 = vmatpush1.bf16.msra.mxu0 %v9815_v54  ;;  %1531 = vmatpush1.bf16.msra.mxu1 %v9818_v59  ;;  %v11071_v54 = vpack.c.bf16 %v575_v60, %v571_v51  ;;  %v580_v59 = vadd.f32 %v548_v39, %v10844_v46  ;;  %v579_v27 = vadd.f32 %v547_v28, %v11010_v37  ;;  %v1576_v46 = vld [vmem:[#allocation10 + $0x88] sm:$0xff]  ;;  %v1591_v51 = vld [vmem:[#allocation10 + $0x100] sm:$0xff] }
 0x1a9   :  { %1450 = vmatprep.subr.bf16.mxu0 %v9823_v21  ;;  %1532 = vmatprep.subr.bf16.mxu1 %v9826_v36  ;;  %v583_v29 = vadd.f32 %v551_v11, %v11010_v37  ;;  %v8931_v52 = vcombine.low %v1568_v53, %v1572_v62  ;;  %v8938_v21 = vcombine.high %v1575_v32, %v1579_v50  ;;  %v1599_v53 = vld [vmem:[#allocation10 + $0x140] sm:$0xff]  ;;  %v1604_v26 = vld [vmem:[#allocation10 + $0x168] sm:$0xff] }
 0x1aa   :  { %v11080_v2 = vpack.c.bf16 %v584_v30, %v580_v59  ;;  %v8940_v36 = vcombine.high %v1576_v46, %v1580_v9  ;;  %v8937_v37 = vcombine.low %v1575_v32, %v1579_v50  ;;  %v8939_v40 = vcombine.low %v1576_v46, %v1580_v9  ;;  %v1603_v62 = vld [vmem:[#allocation10 + $0x160] sm:$0xff]  ;;  %v1612_v11 = vld [vmem:[#allocation10 + $0x1a8] sm:$0xff] }
 0x1ab   :  { %v11084_v34 = vpack.c.bf16 %v583_v29, %v579_v27  ;;  %v8945_v60 = vcombine.low %v1583_v42, %v1587_v3  ;;  %v8947_v39 = vcombine.low %v1584_v5, %v1588_v10  ;;  %v8964_v30 = vcombine.high %v1600_v0, %v1604_v26  ;;  %v1607_v28 = vld [vmem:[#allocation10 + $0x180] sm:$0xff]  ;;  %v1616_v29 = vld [vmem:[#allocation10 + $0x1c8] sm:$0xff] }
 0x1ac   :  { %1451 = vmatpush1.bf16.msra.mxu0 %v9821_v13  ;;  %1533 = vmatpush1.bf16.msra.mxu1 %v9824_v44  ;;  %v1595_v13 = vld [vmem:[#allocation10 + $0x120] sm:$0xff]  ;;  %v1592_v44 = vld [vmem:[#allocation10 + $0x108] sm:$0xff]  ;;  %v8963_v32 = vcombine.low %v1600_v0, %v1604_v26 }
 0x1ad   :  { %3137 = vmatprep.subr.bf16.mxu0 %v8922_v41  ;;  %3283 = vmatprep.subr.bf16.mxu1 %v8924_v61  ;;  %v8946_v41 = vcombine.high %v1583_v42, %v1587_v3  ;;  %v8948_v61 = vcombine.high %v1584_v5, %v1588_v10  ;;  %v8954_v20 = vcombine.high %v1591_v51, %v1595_v13  ;;  %v1615_v46 = vld [vmem:[#allocation10 + $0x1c0] sm:$0xff]  ;;  %v1624_v10 = vld [vmem:[#allocation10 + $0x208] sm:$0xff] }
 0x1ae   :  { %v8956_v14 = vcombine.high %v1592_v44, %v1596_v16  ;;  %v8953_v59 = vcombine.low %v1591_v51, %v1595_v13  ;;  %v1619_v9 = vld [vmem:[#allocation10 + $0x1e0] sm:$0xff]  ;;  %v1640_v26 = vld [vmem:[#allocation10 + $0x288] sm:$0xff] }
 0x1af   :  { %1453 = vmatmul.mubr.bf16.vlgmr.msra.gmra.mrb[0].mxu0 %v587_v49  ;;  %1535 = vmatmul.mubr.bf16.vlgmr.msra.gmra.mrb[0].mxu1 %v587_v49  ;;  %v8961_v49 = vcombine.low %v1599_v53, %v1603_v62  ;;  %v1623_v3 = vld [vmem:[#allocation10 + $0x200] sm:$0xff] }
 0x1b0   :  { %3138 = vmatpush1.bf16.msra.mxu0 %v8921_v56  ;;  %3284 = vmatpush1.bf16.msra.mxu1 %v8923_v19  ;;  %v8955_v56 = vcombine.low %v1592_v44, %v1596_v16  ;;  %v8962_v19 = vcombine.high %v1599_v53, %v1603_v62  ;;  %v1627_v5 = vld [vmem:[#allocation10 + $0x220] sm:$0xff]  ;;  %v1632_v16 = vld [vmem:[#allocation10 + $0x248] sm:$0xff] }
 0x1b1   :  { %3139 = vmatprep.subr.bf16.mxu0 %v8930_v55  ;;  %3285 = vmatprep.subr.bf16.mxu1 %v8932_v45  ;;  %v1611_v55 = vld [vmem:[#allocation10 + $0x1a0] sm:$0xff]  ;;  %v1608_v45 = vld [vmem:[#allocation10 + $0x188] sm:$0xff] }
 0x1b2   :  { %3169 = vmatprep.mubr.bf16.mxu0 %v10891_v48  ;;  %3315 = vmatprep.mubr.bf16.mxu1 %v10891_v48  ;;  %v8970_v27 = vcombine.high %v1607_v28, %v1611_v55  ;;  %v8972_v50 = vcombine.high %v1608_v45, %v1612_v11  ;;  %v1631_v13 = vld [vmem:[#allocation10 + $0x240] sm:$0xff] }
 0x1b3   :  { %v1635_v44 = vld [vmem:[#allocation10 + $0x260] sm:$0xff] }
 0x1b4   :  { %3140 = vmatpush1.bf16.msra.mxu0 %v8929_v35  ;;  %3286 = vmatpush1.bf16.msra.mxu1 %v8931_v52  ;;  %v1620_v35 = vld [vmem:[#allocation10 + $0x1e8] sm:$0xff]  ;;  %v8969_v52 = vcombine.low %v1607_v28, %v1611_v55  ;;  %v1639_v62 = vld [vmem:[#allocation10 + $0x280] sm:$0xff] }
 0x1b5   :  { %3141 = vmatprep.subr.bf16.mxu0 %v8938_v21  ;;  %3287 = vmatprep.subr.bf16.mxu1 %v8940_v36  ;;  %v8971_v21 = vcombine.low %v1608_v45, %v1612_v11  ;;  %v8978_v36 = vcombine.high %v1615_v46, %v1619_v9  ;;  %v8980_v42 = vcombine.high %v1616_v29, %v1620_v35  ;;  %v1643_v0 = vld [vmem:[#allocation10 + $0x2a0] sm:$0xff]  ;;  %v1648_v11 = vld [vmem:[#allocation10 + $0x2c8] sm:$0xff] }
 0x1b6   :  { %v1647_v55 = vld [vmem:[#allocation10 + $0x2c0] sm:$0xff] }
 0x1b7   :  { %v1651_v45 = vld [vmem:[#allocation10 + $0x2e0] sm:$0xff] }
 0x1b8   :  { %3142 = vmatpush1.bf16.msra.mxu0 %v8937_v37  ;;  %3288 = vmatpush1.bf16.msra.mxu1 %v8939_v40  ;;  %v1628_v37 = vld [vmem:[#allocation10 + $0x228] sm:$0xff]  ;;  %v8977_v40 = vcombine.low %v1615_v46, %v1619_v9  ;;  %v1655_v9 = vld [vmem:[#allocation10 + $0x300] sm:$0xff] }
 0x1b9   :  { %3143 = vmatprep.subr.bf16.mxu0 %v8946_v41  ;;  %3289 = vmatprep.subr.bf16.mxu1 %v8948_v61  ;;  %v8979_v41 = vcombine.low %v1616_v29, %v1620_v35  ;;  %v8986_v61 = vcombine.high %v1623_v3, %v1627_v5  ;;  %v8988_v51 = vcombine.high %v1624_v10, %v1628_v37  ;;  %v1659_v29 = vld [vmem:[#allocation10 + $0x320] sm:$0xff]  ;;  %v1656_v35 = vld [vmem:[#allocation10 + $0x308] sm:$0xff] }
 0x1bc   :  { %3144 = vmatpush1.bf16.msra.mxu0 %v8945_v60  ;;  %3290 = vmatpush1.bf16.msra.mxu1 %v8947_v39  ;;  %v1636_v60 = vld [vmem:[#allocation10 + $0x268] sm:$0xff]  ;;  %v8985_v39 = vcombine.low %v1623_v3, %v1627_v5  ;;  %v1663_v5 = vld [vmem:[#allocation10 + $0x340] sm:$0xff] }
 0x1bd   :  { %3145 = vmatprep.subr.bf16.mxu0 %v8954_v20  ;;  %3291 = vmatprep.subr.bf16.mxu1 %v8956_v14  ;;  %v8987_v20 = vcombine.low %v1624_v10, %v1628_v37  ;;  %v8994_v14 = vcombine.high %v1631_v13, %v1635_v44  ;;  %v8996_v53 = vcombine.high %v1632_v16, %v1636_v60  ;;  %v1667_v10 = vld [vmem:[#allocation10 + $0x360] sm:$0xff]  ;;  %v1664_v37 = vld [vmem:[#allocation10 + $0x348] sm:$0xff] }
 0x1c0   :  { %3146 = vmatpush1.bf16.msra.mxu0 %v8953_v59  ;;  %3292 = vmatpush1.bf16.msra.mxu1 %v8955_v56  ;;  %v1644_v59 = vld [vmem:[#allocation10 + $0x2a8] sm:$0xff]  ;;  %v8993_v56 = vcombine.low %v1631_v13, %v1635_v44  ;;  %v1671_v44 = vld [vmem:[#allocation10 + $0x380] sm:$0xff] }
 0x1c1   :  { %3147 = vmatprep.subr.bf16.mxu0 %v8962_v19  ;;  %3293 = vmatprep.subr.bf16.mxu1 %v8964_v30  ;;  %v8995_v19 = vcombine.low %v1632_v16, %v1636_v60  ;;  %v9002_v30 = vcombine.high %v1639_v62, %v1643_v0  ;;  %v9004_v28 = vcombine.high %v1640_v26, %v1644_v59  ;;  %v1675_v16 = vld [vmem:[#allocation10 + $0x3a0] sm:$0xff]  ;;  %v1672_v60 = vld [vmem:[#allocation10 + $0x388] sm:$0xff] }
 0x1c4   :  { %3148 = vmatpush1.bf16.msra.mxu0 %v8961_v49  ;;  %3294 = vmatpush1.bf16.msra.mxu1 %v8963_v32  ;;  %v1652_v49 = vld [vmem:[#allocation10 + $0x2e8] sm:$0xff]  ;;  %v9001_v32 = vcombine.low %v1639_v62, %v1643_v0  ;;  %v1679_v0 = vld [vmem:[#allocation10 + $0x3c0] sm:$0xff] }
 0x1c5   :  { %3149 = vmatprep.subr.bf16.mxu0 %v8970_v27  ;;  %3295 = vmatprep.subr.bf16.mxu1 %v8972_v50  ;;  %v9003_v27 = vcombine.low %v1640_v26, %v1644_v59  ;;  %v9010_v50 = vcombine.high %v1647_v55, %v1651_v45  ;;  %v9012_v46 = vcombine.high %v1648_v11, %v1652_v49  ;;  %v1683_v26 = vld [vmem:[#allocation10 + $0x3e0] sm:$0xff]  ;;  %v1680_v59 = vld [vmem:[#allocation10 + $0x3c8] sm:$0xff] }
 0x1c8   :  { %3150 = vmatpush1.bf16.msra.mxu0 %v8969_v52  ;;  %3296 = vmatpush1.bf16.msra.mxu1 %v8971_v21  ;;  %v1660_v52 = vld [vmem:[#allocation10 + $0x328] sm:$0xff]  ;;  %v9009_v21 = vcombine.low %v1647_v55, %v1651_v45  ;;  %v1687_v45 = vld [vmem:[#allocation10 + $0x400] sm:$0xff] }
 0x1c9   :  { %3151 = vmatprep.subr.bf16.mxu0 %v8978_v36  ;;  %3297 = vmatprep.subr.bf16.mxu1 %v8980_v42  ;;  %v9011_v36 = vcombine.low %v1648_v11, %v1652_v49  ;;  %v9018_v42 = vcombine.high %v1655_v9, %v1659_v29  ;;  %v9020_v3 = vcombine.high %v1656_v35, %v1660_v52  ;;  %v1691_v11 = vld [vmem:[#allocation10 + $0x420] sm:$0xff]  ;;  %v1688_v49 = vld [vmem:[#allocation10 + $0x408] sm:$0xff] }
 0x1cc   :  { %3152 = vmatpush1.bf16.msra.mxu0 %v8977_v40  ;;  %3298 = vmatpush1.bf16.msra.mxu1 %v8979_v41  ;;  %v1668_v40 = vld [vmem:[#allocation10 + $0x368] sm:$0xff]  ;;  %v9017_v41 = vcombine.low %v1655_v9, %v1659_v29  ;;  %v1695_v29 = vld [vmem:[#allocation10 + $0x440] sm:$0xff] }
 0x1cd   :  { %3153 = vmatprep.subr.bf16.mxu0 %v8986_v61  ;;  %3299 = vmatprep.subr.bf16.mxu1 %v8988_v51  ;;  %v9019_v61 = vcombine.low %v1656_v35, %v1660_v52  ;;  %v9026_v51 = vcombine.high %v1663_v5, %v1667_v10  ;;  %v9028_v13 = vcombine.high %v1664_v37, %v1668_v40  ;;  %v1699_v35 = vld [vmem:[#allocation10 + $0x460] sm:$0xff]  ;;  %v1696_v52 = vld [vmem:[#allocation10 + $0x448] sm:$0xff] }
 0x1d0   :  { %3154 = vmatpush1.bf16.msra.mxu0 %v8985_v39  ;;  %3300 = vmatpush1.bf16.msra.mxu1 %v8987_v20  ;;  %v1676_v39 = vld [vmem:[#allocation10 + $0x3a8] sm:$0xff]  ;;  %v9025_v20 = vcombine.low %v1663_v5, %v1667_v10  ;;  %v1703_v10 = vld [vmem:[#allocation10 + $0x480] sm:$0xff] }
 0x1d1   :  { %3155 = vmatprep.subr.bf16.mxu0 %v8994_v14  ;;  %3301 = vmatprep.subr.bf16.mxu1 %v8996_v53  ;;  %v9027_v14 = vcombine.low %v1664_v37, %v1668_v40  ;;  %v9034_v53 = vcombine.high %v1671_v44, %v1675_v16  ;;  %v9036_v62 = vcombine.high %v1672_v60, %v1676_v39  ;;  %v1707_v37 = vld [vmem:[#allocation10 + $0x4a0] sm:$0xff]  ;;  %v1704_v40 = vld [vmem:[#allocation10 + $0x488] sm:$0xff] }
 0x1d4   :  { %3156 = vmatpush1.bf16.msra.mxu0 %v8993_v56  ;;  %3302 = vmatpush1.bf16.msra.mxu1 %v8995_v19  ;;  %v1684_v56 = vld [vmem:[#allocation10 + $0x3e8] sm:$0xff]  ;;  %v9033_v19 = vcombine.low %v1671_v44, %v1675_v16  ;;  %v1711_v16 = vld [vmem:[#allocation10 + $0x4c0] sm:$0xff] }
 0x1d5   :  { %3157 = vmatprep.subr.bf16.mxu0 %v9002_v30  ;;  %3303 = vmatprep.subr.bf16.mxu1 %v9004_v28  ;;  %v9035_v30 = vcombine.low %v1672_v60, %v1676_v39  ;;  %v9042_v28 = vcombine.high %v1679_v0, %v1683_v26  ;;  %v9044_v55 = vcombine.high %v1680_v59, %v1684_v56  ;;  %v1715_v60 = vld [vmem:[#allocation10 + $0x4e0] sm:$0xff]  ;;  %v1712_v39 = vld [vmem:[#allocation10 + $0x4c8] sm:$0xff] }
 0x1d8   :  { %3158 = vmatpush1.bf16.msra.mxu0 %v9001_v32  ;;  %3304 = vmatpush1.bf16.msra.mxu1 %v9003_v27  ;;  %v1692_v32 = vld [vmem:[#allocation10 + $0x428] sm:$0xff]  ;;  %v9041_v27 = vcombine.low %v1679_v0, %v1683_v26  ;;  %v1719_v26 = vld [vmem:[#allocation10 + $0x500] sm:$0xff] }
 0x1d9   :  { %3159 = vmatprep.subr.bf16.mxu0 %v9010_v50  ;;  %3305 = vmatprep.subr.bf16.mxu1 %v9012_v46  ;;  %v9043_v50 = vcombine.low %v1680_v59, %v1684_v56  ;;  %v9050_v46 = vcombine.high %v1687_v45, %v1691_v11  ;;  %v9052_v9 = vcombine.high %v1688_v49, %v1692_v32  ;;  %v1723_v59 = vld [vmem:[#allocation10 + $0x520] sm:$0xff]  ;;  %v1720_v56 = vld [vmem:[#allocation10 + $0x508] sm:$0xff] }
 0x1dc   :  { %3160 = vmatpush1.bf16.msra.mxu0 %v9009_v21  ;;  %3306 = vmatpush1.bf16.msra.mxu1 %v9011_v36  ;;  %v1700_v21 = vld [vmem:[#allocation10 + $0x468] sm:$0xff]  ;;  %v9049_v36 = vcombine.low %v1687_v45, %v1691_v11  ;;  %v1727_v11 = vld [vmem:[#allocation10 + $0x540] sm:$0xff] }
 0x1dd   :  { %3161 = vmatprep.subr.bf16.mxu0 %v9018_v42  ;;  %3307 = vmatprep.subr.bf16.mxu1 %v9020_v3  ;;  %v9051_v42 = vcombine.low %v1688_v49, %v1692_v32  ;;  %v9058_v3 = vcombine.high %v1695_v29, %v1699_v35  ;;  %v9060_v5 = vcombine.high %v1696_v52, %v1700_v21  ;;  %v1731_v49 = vld [vmem:[#allocation10 + $0x560] sm:$0xff]  ;;  %v1728_v32 = vld [vmem:[#allocation10 + $0x548] sm:$0xff] }
 0x1e0   :  { %3162 = vmatpush1.bf16.msra.mxu0 %v9017_v41  ;;  %3308 = vmatpush1.bf16.msra.mxu1 %v9019_v61  ;;  %v1708_v41 = vld [vmem:[#allocation10 + $0x4a8] sm:$0xff]  ;;  %v9057_v61 = vcombine.low %v1695_v29, %v1699_v35  ;;  %v1735_v35 = vld [vmem:[#allocation10 + $0x580] sm:$0xff] }
 0x1e1   :  { %3163 = vmatprep.subr.bf16.mxu0 %v9026_v51  ;;  %3309 = vmatprep.subr.bf16.mxu1 %v9028_v13  ;;  %v9059_v51 = vcombine.low %v1696_v52, %v1700_v21  ;;  %v9066_v13 = vcombine.high %v1703_v10, %v1707_v37  ;;  %v9068_v44 = vcombine.high %v1704_v40, %v1708_v41  ;;  %v1739_v52 = vld [vmem:[#allocation10 + $0x5a0] sm:$0xff]  ;;  %v1736_v21 = vld [vmem:[#allocation10 + $0x588] sm:$0xff] }
 0x1e4   :  { %3164 = vmatpush1.bf16.msra.mxu0 %v9025_v20  ;;  %3310 = vmatpush1.bf16.msra.mxu1 %v9027_v14  ;;  %v1716_v20 = vld [vmem:[#allocation10 + $0x4e8] sm:$0xff]  ;;  %v9065_v14 = vcombine.low %v1703_v10, %v1707_v37  ;;  %v1743_v37 = vld [vmem:[#allocation10 + $0x5c0] sm:$0xff] }
 0x1e5   :  { %3165 = vmatprep.subr.bf16.mxu0 %v9034_v53  ;;  %3311 = vmatprep.subr.bf16.mxu1 %v9036_v62  ;;  %v9067_v53 = vcombine.low %v1704_v40, %v1708_v41  ;;  %v9074_v62 = vcombine.high %v1711_v16, %v1715_v60  ;;  %v9076_v0 = vcombine.high %v1712_v39, %v1716_v20  ;;  %v1747_v40 = vld [vmem:[#allocation10 + $0x5e0] sm:$0xff]  ;;  %v1744_v41 = vld [vmem:[#allocation10 + $0x5c8] sm:$0xff] }
 0x1e8   :  { %3166 = vmatpush1.bf16.msra.mxu0 %v9033_v19  ;;  %3312 = vmatpush1.bf16.msra.mxu1 %v9035_v30  ;;  %v1724_v19 = vld [vmem:[#allocation10 + $0x528] sm:$0xff]  ;;  %v9073_v30 = vcombine.low %v1711_v16, %v1715_v60  ;;  %v1751_v60 = vld [vmem:[#allocation10 + $0x600] sm:$0xff] }
 0x1e9   :  { %3167 = vmatprep.subr.bf16.mxu0 %v9042_v28  ;;  %3313 = vmatprep.subr.bf16.mxu1 %v9044_v55  ;;  %v9075_v28 = vcombine.low %v1712_v39, %v1716_v20  ;;  %v9082_v55 = vcombine.high %v1719_v26, %v1723_v59  ;;  %v9084_v45 = vcombine.high %v1720_v56, %v1724_v19  ;;  %v1755_v39 = vld [vmem:[#allocation10 + $0x620] sm:$0xff]  ;;  %v1752_v20 = vld [vmem:[#allocation10 + $0x608] sm:$0xff] }
 0x1ec   :  { %3168 = vmatpush1.bf16.msra.mxu0 %v9041_v27  ;;  %3314 = vmatpush1.bf16.msra.mxu1 %v9043_v50  ;;  %v1732_v27 = vld [vmem:[#allocation10 + $0x568] sm:$0xff]  ;;  %v9081_v50 = vcombine.low %v1719_v26, %v1723_v59  ;;  %v1759_v59 = vld [vmem:[#allocation10 + $0x640] sm:$0xff] }
 0x1ed   :  { %3210 = vmatprep.subr.bf16.mxu0 %v9050_v46  ;;  %3356 = vmatprep.subr.bf16.mxu1 %v9052_v9  ;;  %v9083_v46 = vcombine.low %v1720_v56, %v1724_v19  ;;  %v9090_v9 = vcombine.high %v1727_v11, %v1731_v49  ;;  %v9092_v29 = vcombine.high %v1728_v32, %v1732_v27  ;;  %v1763_v56 = vld [vmem:[#allocation10 + $0x660] sm:$0xff]  ;;  %v1760_v19 = vld [vmem:[#allocation10 + $0x648] sm:$0xff] }
 0x1ef   :  { %3170 = vmatmul.mubr.bf16.vlgmr.msra.gmra.mrb[4].mxu0 %v10904_v31  ;;  %3316 = vmatmul.mubr.bf16.vlgmr.msra.gmra.mrb[4].mxu1 %v10904_v31 }
 0x1f0   :  { %3211 = vmatpush1.bf16.msra.mxu0 %v9049_v36  ;;  %3357 = vmatpush1.bf16.msra.mxu1 %v9051_v42  ;;  %v1740_v36 = vld [vmem:[#allocation10 + $0x5a8] sm:$0xff]  ;;  %v9089_v42 = vcombine.low %v1727_v11, %v1731_v49  ;;  %v1767_v49 = vld [vmem:[#allocation10 + $0x680] sm:$0xff] }
 0x1f1   :  { %3212 = vmatprep.subr.bf16.mxu0 %v9058_v3  ;;  %3358 = vmatprep.subr.bf16.mxu1 %v9060_v5  ;;  %v9091_v3 = vcombine.low %v1728_v32, %v1732_v27  ;;  %v9098_v5 = vcombine.high %v1735_v35, %v1739_v52  ;;  %v9100_v10 = vcombine.high %v1736_v21, %v1740_v36  ;;  %v1771_v32 = vld [vmem:[#allocation10 + $0x6a0] sm:$0xff]  ;;  %v1768_v27 = vld [vmem:[#allocation10 + $0x688] sm:$0xff] }
 0x1f2   :  { %3179 = vmatprep.mubr.bf16.mxu0 %v10943_v15  ;;  %3325 = vmatprep.mubr.bf16.mxu1 %v10943_v15 }
 0x1f4   :  { %3213 = vmatpush1.bf16.msra.mxu0 %v9057_v61  ;;  %3359 = vmatpush1.bf16.msra.mxu1 %v9059_v51  ;;  %v1748_v61 = vld [vmem:[#allocation10 + $0x5e8] sm:$0xff]  ;;  %v9097_v51 = vcombine.low %v1735_v35, %v1739_v52  ;;  %v1775_v52 = vld [vmem:[#allocation10 + $0x6c0] sm:$0xff] }
 0x1f5   :  { %3214 = vmatprep.subr.bf16.mxu0 %v9066_v13  ;;  %3360 = vmatprep.subr.bf16.mxu1 %v9068_v44  ;;  %v9099_v13 = vcombine.low %v1736_v21, %v1740_v36  ;;  %v9106_v44 = vcombine.high %v1743_v37, %v1747_v40  ;;  %v9108_v16 = vcombine.high %v1744_v41, %v1748_v61  ;;  %v1779_v21 = vld [vmem:[#allocation10 + $0x6e0] sm:$0xff]  ;;  %v1776_v36 = vld [vmem:[#allocation10 + $0x6c8] sm:$0xff] }
 0x1f7   :  { %3180 = vmatmul.mubr.bf16.gmra.mrb[8].mxu0 %v10945_v17  ;;  %3326 = vmatmul.mubr.bf16.gmra.mrb[8].mxu1 %v10945_v17 }
 0x1f8   :  { %3215 = vmatpush1.bf16.msra.mxu0 %v9065_v14  ;;  %3361 = vmatpush1.bf16.msra.mxu1 %v9067_v53  ;;  %v1756_v14 = vld [vmem:[#allocation10 + $0x628] sm:$0xff]  ;;  %v9105_v53 = vcombine.low %v1743_v37, %v1747_v40  ;;  %v1783_v40 = vld [vmem:[#allocation10 + $0x700] sm:$0xff] }
 0x1f9   :  { %3216 = vmatprep.subr.bf16.mxu0 %v9074_v62  ;;  %3362 = vmatprep.subr.bf16.mxu1 %v9076_v0  ;;  %v9107_v62 = vcombine.low %v1744_v41, %v1748_v61  ;;  %v9114_v0 = vcombine.high %v1751_v60, %v1755_v39  ;;  %v9116_v26 = vcombine.high %v1752_v20, %v1756_v14  ;;  %v1787_v41 = vld [vmem:[#allocation10 + $0x720] sm:$0xff]  ;;  %v1784_v61 = vld [vmem:[#allocation10 + $0x708] sm:$0xff] }
 0x1fa   :  { %3189 = vmatprep.mubr.bf16.mxu0 %v10966_v12  ;;  %3335 = vmatprep.mubr.bf16.mxu1 %v10966_v12 }
 0x1fc   :  { %3217 = vmatpush1.bf16.msra.mxu0 %v9073_v30  ;;  %3363 = vmatpush1.bf16.msra.mxu1 %v9075_v28  ;;  %v1764_v30 = vld [vmem:[#allocation10 + $0x668] sm:$0xff]  ;;  %v9113_v28 = vcombine.low %v1751_v60, %v1755_v39  ;;  %v1791_v39 = vld [vmem:[#allocation10 + $0x740] sm:$0xff] }
 0x1fd   :  { %3218 = vmatprep.subr.bf16.mxu0 %v9082_v55  ;;  %3364 = vmatprep.subr.bf16.mxu1 %v9084_v45  ;;  %v9115_v55 = vcombine.low %v1752_v20, %v1756_v14  ;;  %v9122_v45 = vcombine.high %v1759_v59, %v1763_v56  ;;  %v9124_v11 = vcombine.high %v1760_v19, %v1764_v30  ;;  %v1795_v20 = vld [vmem:[#allocation10 + $0x760] sm:$0xff]  ;;  %v1792_v14 = vld [vmem:[#allocation10 + $0x748] sm:$0xff] }
 0x1ff   :  { %3190 = vmatmul.mubr.bf16.gmra.mrb[12].mxu0 %v10972_v33  ;;  %3336 = vmatmul.mubr.bf16.gmra.mrb[12].mxu1 %v10972_v33 }
 0x200   :  { %3219 = vmatpush1.bf16.msra.mxu0 %v9081_v50  ;;  %3365 = vmatpush1.bf16.msra.mxu1 %v9083_v46  ;;  %v1772_v50 = vld [vmem:[#allocation10 + $0x6a8] sm:$0xff]  ;;  %v9121_v46 = vcombine.low %v1759_v59, %v1763_v56  ;;  %v1799_v56 = vld [vmem:[#allocation10 + $0x780] sm:$0xff] }
 0x201   :  { %3220 = vmatprep.subr.bf16.mxu0 %v9090_v9  ;;  %3366 = vmatprep.subr.bf16.mxu1 %v9092_v29  ;;  %v9123_v9 = vcombine.low %v1760_v19, %v1764_v30  ;;  %v9130_v29 = vcombine.high %v1767_v49, %v1771_v32  ;;  %v9132_v35 = vcombine.high %v1768_v27, %v1772_v50  ;;  %v1803_v19 = vld [vmem:[#allocation10 + $0x7a0] sm:$0xff]  ;;  %v1800_v30 = vld [vmem:[#allocation10 + $0x788] sm:$0xff] }
 0x202   :  { %3199 = vmatprep.mubr.bf16.mxu0 %v10997_v7  ;;  %3345 = vmatprep.mubr.bf16.mxu1 %v10997_v7 }
 0x204   :  { %3221 = vmatpush1.bf16.msra.mxu0 %v9089_v42  ;;  %3367 = vmatpush1.bf16.msra.mxu1 %v9091_v3  ;;  %v1780_v42 = vld [vmem:[#allocation10 + $0x6e8] sm:$0xff]  ;;  %v9129_v3 = vcombine.low %v1767_v49, %v1771_v32  ;;  %v1807_v32 = vld [vmem:[#allocation10 + $0x7c0] sm:$0xff] }
 0x205   :  { %3222 = vmatprep.subr.bf16.mxu0 %v9098_v5  ;;  %3368 = vmatprep.subr.bf16.mxu1 %v9100_v10  ;;  %v9131_v5 = vcombine.low %v1768_v27, %v1772_v50  ;;  %v9138_v10 = vcombine.high %v1775_v52, %v1779_v21  ;;  %v9140_v37 = vcombine.high %v1776_v36, %v1780_v42  ;;  %v1811_v27 = vld [vmem:[#allocation10 + $0x7e0] sm:$0xff]  ;;  %v1808_v50 = vld [vmem:[#allocation10 + $0x7c8] sm:$0xff] }
 0x207   :  { %3200 = vmatmul.mubr.bf16.gmra.mrb[16].mxu0 %v10999_v22  ;;  %3346 = vmatmul.mubr.bf16.gmra.mrb[16].mxu1 %v10999_v22 }
 0x208   :  { %3223 = vmatpush1.bf16.msra.mxu0 %v9097_v51  ;;  %3242 = vmatprep.mubr.bf16.mxu0 %v10986_v1  ;;  %v1788_v51 = vld [vmem:[#allocation10 + $0x728] sm:$0xff] }
 0x209   :  { %3369 = vmatpush1.bf16.msra.mxu1 %v9099_v13  ;;  %3388 = vmatprep.mubr.bf16.mxu1 %v10986_v1  ;;  %v9137_v13 = vcombine.low %v1775_v52, %v1779_v21  ;;  %v9148_v60 = vcombine.high %v1784_v61, %v1788_v51  ;;  %v1561_v21 = vld [vmem:[#allocation10 + $0x10] sm:$0xff] }
 0x20a   :  { %3224 = vmatprep.subr.bf16.mxu0 %v9106_v44  ;;  %3370 = vmatprep.subr.bf16.mxu1 %v9108_v16  ;;  %v9139_v44 = vcombine.low %v1776_v36, %v1780_v42  ;;  %v9146_v16 = vcombine.high %v1783_v40, %v1787_v41  ;;  %v1565_v36 = vld [vmem:[#allocation10 + $0x30] sm:$0xff]  ;;  %v1562_v42 = vld [vmem:[#allocation10 + $0x18] sm:$0xff] }
 0x20c   :  { %3225 = vmatpush1.bf16.msra.mxu0 %v9105_v53  ;;  %v1796_v53 = vld [vmem:[#allocation10 + $0x768] sm:$0xff] }
 0x20d   :  { %3371 = vmatpush1.bf16.msra.mxu1 %v9107_v62  ;;  %3226 = vmatprep.subr.bf16.mxu0 %v9114_v0  ;;  %v9145_v62 = vcombine.low %v1783_v40, %v1787_v41  ;;  %v9147_v0 = vcombine.low %v1784_v61, %v1788_v51  ;;  %v9156_v59 = vcombine.high %v1792_v14, %v1796_v53  ;;  %v1569_v41 = vld [vmem:[#allocation10 + $0x50] sm:$0xff]  ;;  %v1570_v51 = vld [vmem:[#allocation10 + $0x58] sm:$0xff] }
 0x20e   :  { %3372 = vmatprep.subr.bf16.mxu1 %v9116_v26  ;;  %v9154_v26 = vcombine.high %v1791_v39, %v1795_v20  ;;  %v1573_v61 = vld [vmem:[#allocation10 + $0x70] sm:$0xff] }
 0x210   :  { %3227 = vmatpush1.bf16.msra.mxu0 %v9113_v28  ;;  %v1804_v28 = vld [vmem:[#allocation10 + $0x7a8] sm:$0xff] }
 0x211   :  { %3373 = vmatpush1.bf16.msra.mxu1 %v9115_v55  ;;  %3228 = vmatprep.subr.bf16.mxu0 %v9122_v45  ;;  %v9153_v55 = vcombine.low %v1791_v39, %v1795_v20  ;;  %v9155_v45 = vcombine.low %v1792_v14, %v1796_v53  ;;  %v9164_v49 = vcombine.high %v1800_v30, %v1804_v28  ;;  %v1577_v20 = vld [vmem:[#allocation10 + $0x90] sm:$0xff]  ;;  %v1578_v53 = vld [vmem:[#allocation10 + $0x98] sm:$0xff] }
 0x212   :  { %3374 = vmatprep.subr.bf16.mxu1 %v9124_v11  ;;  %v9162_v11 = vcombine.high %v1799_v56, %v1803_v19  ;;  %v1581_v14 = vld [vmem:[#allocation10 + $0xb0] sm:$0xff] }
 0x214   :  { %3229 = vmatpush1.bf16.msra.mxu0 %v9121_v46  ;;  %v1812_v46 = vld [vmem:[#allocation10 + $0x7e8] sm:$0xff] }
 0x215   :  { %3375 = vmatpush1.bf16.msra.mxu1 %v9123_v9  ;;  %3230 = vmatprep.subr.bf16.mxu0 %v9130_v29  ;;  %v9161_v9 = vcombine.low %v1799_v56, %v1803_v19  ;;  %v9163_v29 = vcombine.low %v1800_v30, %v1804_v28  ;;  %v9172_v52 = vcombine.high %v1808_v50, %v1812_v46  ;;  %v1585_v19 = vld [vmem:[#allocation10 + $0xd0] sm:$0xff]  ;;  %v1586_v28 = vld [vmem:[#allocation10 + $0xd8] sm:$0xff] }
 0x216   :  { %3376 = vmatprep.subr.bf16.mxu1 %v9132_v35  ;;  %v9170_v35 = vcombine.high %v1807_v32, %v1811_v27  ;;  %v1589_v30 = vld [vmem:[#allocation10 + $0xf0] sm:$0xff] }
 0x218   :  { %3231 = vmatpush1.bf16.msra.mxu0 %v9129_v3  ;;  %v1566_v3 = vld [vmem:[#allocation10 + $0x38] sm:$0xff] }
 0x219   :  { %3377 = vmatpush1.bf16.msra.mxu1 %v9131_v5  ;;  %3232 = vmatprep.subr.bf16.mxu0 %v9138_v10  ;;  %v9169_v5 = vcombine.low %v1807_v32, %v1811_v27  ;;  %v9171_v10 = vcombine.low %v1808_v50, %v1812_v46  ;;  %v8928_v40 = vcombine.high %v1562_v42, %v1566_v3  ;;  %v1593_v27 = vld [vmem:[#allocation10 + $0x110] sm:$0xff]  ;;  %v1594_v46 = vld [vmem:[#allocation10 + $0x118] sm:$0xff] }
 0x21a   :  { %3378 = vmatprep.subr.bf16.mxu1 %v9140_v37  ;;  %v8926_v37 = vcombine.high %v1561_v21, %v1565_v36  ;;  %v1597_v50 = vld [vmem:[#allocation10 + $0x130] sm:$0xff] }
 0x21c   :  { %3233 = vmatpush1.bf16.msra.mxu0 %v9137_v13  ;;  %v1574_v13 = vld [vmem:[#allocation10 + $0x78] sm:$0xff] }
 0x21d   :  { %3379 = vmatpush1.bf16.msra.mxu1 %v9139_v44  ;;  %3234 = vmatprep.subr.bf16.mxu0 %v9146_v16  ;;  %v8925_v44 = vcombine.low %v1561_v21, %v1565_v36  ;;  %v8927_v16 = vcombine.low %v1562_v42, %v1566_v3  ;;  %v8936_v39 = vcombine.high %v1570_v51, %v1574_v13  ;;  %v1601_v36 = vld [vmem:[#allocation10 + $0x150] sm:$0xff]  ;;  %v1602_v3 = vld [vmem:[#allocation10 + $0x158] sm:$0xff] }
 0x21e   :  { %3380 = vmatprep.subr.bf16.mxu1 %v9148_v60  ;;  %v8934_v60 = vcombine.high %v1569_v41, %v1573_v61  ;;  %v1605_v42 = vld [vmem:[#allocation10 + $0x170] sm:$0xff] }
 0x220   :  { %3235 = vmatpush1.bf16.msra.mxu0 %v9145_v62  ;;  %v1582_v62 = vld [vmem:[#allocation10 + $0xb8] sm:$0xff] }
 0x221   :  { %3381 = vmatpush1.bf16.msra.mxu1 %v9147_v0  ;;  %3236 = vmatprep.subr.bf16.mxu0 %v9154_v26  ;;  %v8933_v0 = vcombine.low %v1569_v41, %v1573_v61  ;;  %v8935_v26 = vcombine.low %v1570_v51, %v1574_v13  ;;  %v8944_v56 = vcombine.high %v1578_v53, %v1582_v62  ;;  %v1609_v61 = vld [vmem:[#allocation10 + $0x190] sm:$0xff]  ;;  %v1610_v13 = vld [vmem:[#allocation10 + $0x198] sm:$0xff] }
 0x222   :  { %3382 = vmatprep.subr.bf16.mxu1 %v9156_v59  ;;  %v8942_v59 = vcombine.high %v1577_v20, %v1581_v14  ;;  %v1613_v51 = vld [vmem:[#allocation10 + $0x1b0] sm:$0xff] }
 0x224   :  { %3237 = vmatpush1.bf16.msra.mxu0 %v9153_v55  ;;  %v1590_v55 = vld [vmem:[#allocation10 + $0xf8] sm:$0xff] }
 0x225   :  { %3383 = vmatpush1.bf16.msra.mxu1 %v9155_v45  ;;  %3238 = vmatprep.subr.bf16.mxu0 %v9162_v11  ;;  %v8941_v45 = vcombine.low %v1577_v20, %v1581_v14  ;;  %v8943_v11 = vcombine.low %v1578_v53, %v1582_v62  ;;  %v8952_v32 = vcombine.high %v1586_v28, %v1590_v55  ;;  %v1617_v14 = vld [vmem:[#allocation10 + $0x1d0] sm:$0xff]  ;;  %v1618_v62 = vld [vmem:[#allocation10 + $0x1d8] sm:$0xff] }
 0x226   :  { %3384 = vmatprep.subr.bf16.mxu1 %v9164_v49  ;;  %v8950_v49 = vcombine.high %v1585_v19, %v1589_v30  ;;  %v1621_v53 = vld [vmem:[#allocation10 + $0x1f0] sm:$0xff] }
 0x228   :  { %3239 = vmatpush1.bf16.msra.mxu0 %v9161_v9  ;;  %v1598_v9 = vld [vmem:[#allocation10 + $0x138] sm:$0xff] }
 0x229   :  { %3385 = vmatpush1.bf16.msra.mxu1 %v9163_v29  ;;  %3240 = vmatprep.subr.bf16.mxu0 %v9170_v35  ;;  %v8949_v29 = vcombine.low %v1585_v19, %v1589_v30  ;;  %v8951_v35 = vcombine.low %v1586_v28, %v1590_v55  ;;  %v8960_v21 = vcombine.high %v1594_v46, %v1598_v9  ;;  %v1625_v30 = vld [vmem:[#allocation10 + $0x210] sm:$0xff]  ;;  %v1626_v55 = vld [vmem:[#allocation10 + $0x218] sm:$0xff] }
 0x22a   :  { %3386 = vmatprep.subr.bf16.mxu1 %v9172_v52  ;;  %v8958_v52 = vcombine.high %v1593_v27, %v1597_v50  ;;  %v1629_v28 = vld [vmem:[#allocation10 + $0x230] sm:$0xff] }
 0x22c   :  { %3241 = vmatpush1.bf16.msra.mxu0 %v9169_v5  ;;  %v1606_v5 = vld [vmem:[#allocation10 + $0x178] sm:$0xff] }
 0x22d   :  { %3387 = vmatpush1.bf16.msra.mxu1 %v9171_v10  ;;  %3429 = vmatprep.subr.bf16.mxu0 %v8926_v37  ;;  %v8957_v10 = vcombine.low %v1593_v27, %v1597_v50  ;;  %v8959_v37 = vcombine.low %v1594_v46, %v1598_v9  ;;  %v8968_v41 = vcombine.high %v1602_v3, %v1606_v5  ;;  %v1633_v50 = vld [vmem:[#allocation10 + $0x250] sm:$0xff]  ;;  %v1634_v9 = vld [vmem:[#allocation10 + $0x258] sm:$0xff] }
 0x22e   :  { %3575 = vmatprep.subr.bf16.mxu1 %v8928_v40  ;;  %v8966_v40 = vcombine.high %v1601_v36, %v1605_v42  ;;  %v1637_v46 = vld [vmem:[#allocation10 + $0x270] sm:$0xff] }
 0x22f   :  { %3243 = vmatmul.mubr.bf16.vlgmr.msra.gmra.mrb[4].mxu0 %v11031_v38 }
 0x230   :  { %3389 = vmatmul.mubr.bf16.vlgmr.msra.gmra.mrb[4].mxu1 %v11031_v38  ;;  %3252 = vmatprep.mubr.bf16.mxu0 %v11035_v47 }
 0x231   :  { %3398 = vmatprep.mubr.bf16.mxu1 %v11035_v47  ;;  %3430 = vmatpush1.bf16.msra.mxu0 %v8925_v44  ;;  %v1614_v44 = vld [vmem:[#allocation10 + $0x1b8] sm:$0xff] }
 0x232   :  { %3576 = vmatpush1.bf16.msra.mxu1 %v8927_v16  ;;  %3431 = vmatprep.subr.bf16.mxu0 %v8934_v60  ;;  %v8965_v16 = vcombine.low %v1601_v36, %v1605_v42  ;;  %v8967_v60 = vcombine.low %v1602_v3, %v1606_v5  ;;  %v8976_v20 = vcombine.high %v1610_v13, %v1614_v44  ;;  %v1645_v42 = vld [vmem:[#allocation10 + $0x2b0] sm:$0xff]  ;;  %v1642_v3 = vld [vmem:[#allocation10 + $0x298] sm:$0xff] }
 0x233   :  { %3577 = vmatprep.subr.bf16.mxu1 %v8936_v39  ;;  %v8974_v39 = vcombine.high %v1609_v61, %v1613_v51  ;;  %v1646_v5 = vld [vmem:[#allocation10 + $0x2b8] sm:$0xff] }
 0x235   :  { %3432 = vmatpush1.bf16.msra.mxu0 %v8933_v0  ;;  %v1622_v0 = vld [vmem:[#allocation10 + $0x1f8] sm:$0xff] }
 0x236   :  { %3578 = vmatpush1.bf16.msra.mxu1 %v8935_v26  ;;  %3433 = vmatprep.subr.bf16.mxu0 %v8942_v59  ;;  %v8973_v26 = vcombine.low %v1609_v61, %v1613_v51  ;;  %v8975_v59 = vcombine.low %v1610_v13, %v1614_v44  ;;  %v8984_v19 = vcombine.high %v1618_v62, %v1622_v0  ;;  %v1649_v61 = vld [vmem:[#allocation10 + $0x2d0] sm:$0xff]  ;;  %v1650_v13 = vld [vmem:[#allocation10 + $0x2d8] sm:$0xff] }
 0x237   :  { %3253 = vmatmul.mubr.bf16.gmra.mrb[8].mxu0 %v11050_v4  ;;  %3579 = vmatprep.subr.bf16.mxu1 %v8944_v56  ;;  %v8982_v56 = vcombine.high %v1617_v14, %v1621_v53  ;;  %v1653_v51 = vld [vmem:[#allocation10 + $0x2f0] sm:$0xff]  ;;  %v1654_v44 = vld [vmem:[#allocation10 + $0x2f8] sm:$0xff] }
 0x238   :  { %3399 = vmatmul.mubr.bf16.gmra.mrb[8].mxu1 %v11050_v4  ;;  %3262 = vmatprep.mubr.bf16.mxu0 %v11060_v8 }
 0x239   :  { %3408 = vmatprep.mubr.bf16.mxu1 %v11060_v8  ;;  %3434 = vmatpush1.bf16.msra.mxu0 %v8941_v45  ;;  %v1630_v45 = vld [vmem:[#allocation10 + $0x238] sm:$0xff] }
 0x23a   :  { %3580 = vmatpush1.bf16.msra.mxu1 %v8943_v11  ;;  %3435 = vmatprep.subr.bf16.mxu0 %v8950_v49  ;;  %v8981_v11 = vcombine.low %v1617_v14, %v1621_v53  ;;  %v8983_v49 = vcombine.low %v1618_v62, %v1622_v0  ;;  %v8992_v27 = vcombine.high %v1626_v55, %v1630_v45  ;;  %v1657_v14 = vld [vmem:[#allocation10 + $0x310] sm:$0xff]  ;;  %v1658_v62 = vld [vmem:[#allocation10 + $0x318] sm:$0xff] }
 0x23b   :  { %3581 = vmatprep.subr.bf16.mxu1 %v8952_v32  ;;  %v8990_v32 = vcombine.high %v1625_v30, %v1629_v28  ;;  %v1661_v53 = vld [vmem:[#allocation10 + $0x330] sm:$0xff]  ;;  %v1662_v0 = vld [vmem:[#allocation10 + $0x338] sm:$0xff] }
 0x23d   :  { %3436 = vmatpush1.bf16.msra.mxu0 %v8949_v29  ;;  %v1638_v29 = vld [vmem:[#allocation10 + $0x278] sm:$0xff] }
 0x23e   :  { %3582 = vmatpush1.bf16.msra.mxu1 %v8951_v35  ;;  %3437 = vmatprep.subr.bf16.mxu0 %v8958_v52  ;;  %v8989_v35 = vcombine.low %v1625_v30, %v1629_v28  ;;  %v8991_v52 = vcombine.low %v1626_v55, %v1630_v45  ;;  %v9000_v36 = vcombine.high %v1634_v9, %v1638_v29  ;;  %v1665_v30 = vld [vmem:[#allocation10 + $0x350] sm:$0xff]  ;;  %v1666_v55 = vld [vmem:[#allocation10 + $0x358] sm:$0xff] }
 0x23f   :  { %3263 = vmatmul.mubr.bf16.gmra.mrb[12].mxu0 %v11071_v54  ;;  %3583 = vmatprep.subr.bf16.mxu1 %v8960_v21  ;;  %v8998_v21 = vcombine.high %v1633_v50, %v1637_v46  ;;  %v1669_v28 = vld [vmem:[#allocation10 + $0x370] sm:$0xff]  ;;  %v1670_v45 = vld [vmem:[#allocation10 + $0x378] sm:$0xff] }
 0x240   :  { %3409 = vmatmul.mubr.bf16.gmra.mrb[12].mxu1 %v11071_v54  ;;  %3272 = vmatprep.mubr.bf16.mxu0 %v11080_v2 }
 0x241   :  { %3418 = vmatprep.mubr.bf16.mxu1 %v11080_v2  ;;  %3438 = vmatpush1.bf16.msra.mxu0 %v8957_v10  ;;  %v8997_v10 = vcombine.low %v1633_v50, %v1637_v46  ;;  %v1673_v50 = vld [vmem:[#allocation10 + $0x390] sm:$0xff] }
 0x242   :  { %3584 = vmatpush1.bf16.msra.mxu1 %v8959_v37  ;;  %3439 = vmatprep.subr.bf16.mxu0 %v8966_v40  ;;  %v8999_v37 = vcombine.low %v1634_v9, %v1638_v29  ;;  %v1677_v46 = vld [vmem:[#allocation10 + $0x3b0] sm:$0xff]  ;;  %v1674_v9 = vld [vmem:[#allocation10 + $0x398] sm:$0xff] }
 0x243   :  { %3585 = vmatprep.subr.bf16.mxu1 %v8968_v41  ;;  %v9008_v41 = vcombine.high %v1642_v3, %v1646_v5  ;;  %v1678_v29 = vld [vmem:[#allocation10 + $0x3b8] sm:$0xff] }
 0x245   :  { %3440 = vmatpush1.bf16.msra.mxu0 %v8965_v16 }
 0x246   :  { %3586 = vmatpush1.bf16.msra.mxu1 %v8967_v60  ;;  %3441 = vmatprep.subr.bf16.mxu0 %v8974_v39  ;;  %v9007_v60 = vcombine.low %v1642_v3, %v1646_v5  ;;  %v9014_v39 = vcombine.high %v1649_v61, %v1653_v51  ;;  %v1682_v3 = vld [vmem:[#allocation10 + $0x3d8] sm:$0xff] }
 0x247   :  { %3273 = vmatmul.mubr.bf16.gmra.mrb[16].mxu0 %v11084_v34  ;;  %3587 = vmatprep.subr.bf16.mxu1 %v8976_v20  ;;  %v9016_v20 = vcombine.high %v1650_v13, %v1654_v44  ;;  %v1686_v5 = vld [vmem:[#allocation10 + $0x3f8] sm:$0xff] }
 0x248   :  { %3419 = vmatmul.mubr.bf16.gmra.mrb[16].mxu1 %v11084_v34  ;;  %3461 = vmatprep.mubr.bf16.mxu0 %v10891_v48 }
 0x249   :  { %3442 = vmatpush1.bf16.msra.mxu0 %v8973_v26  ;;  %3607 = vmatprep.mubr.bf16.mxu1 %v10891_v48  ;;  %v1641_v48 = vld [vmem:[#allocation10 + $0x290] sm:$0xff]  ;;  %v9013_v26 = vcombine.low %v1649_v61, %v1653_v51 }
 0x24a   :  { %3588 = vmatpush1.bf16.msra.mxu1 %v8975_v59  ;;  %3443 = vmatprep.subr.bf16.mxu0 %v8982_v56  ;;  %v9006_v40 = vcombine.high %v1641_v48, %v1645_v42  ;;  %v9005_v16 = vcombine.low %v1641_v48, %v1645_v42  ;;  %v9015_v59 = vcombine.low %v1650_v13, %v1654_v44  ;;  %v1681_v48 = vld [vmem:[#allocation10 + $0x3d0] sm:$0xff]  ;;  %v1690_v13 = vld [vmem:[#allocation10 + $0x418] sm:$0xff] }
 0x24b   :  { %3589 = vmatprep.subr.bf16.mxu1 %v8984_v19  ;;  %v9022_v56 = vcombine.high %v1657_v14, %v1661_v53  ;;  %v9024_v19 = vcombine.high %v1658_v62, %v1662_v0  ;;  %v1685_v42 = vld [vmem:[#allocation10 + $0x3f0] sm:$0xff]  ;;  %v1694_v44 = vld [vmem:[#allocation10 + $0x438] sm:$0xff] }
 0x24c   :  { %v1689_v61 = vld [vmem:[#allocation10 + $0x410] sm:$0xff] }
 0x24d   :  { %3444 = vmatpush1.bf16.msra.mxu0 %v8981_v11  ;;  %v9021_v11 = vcombine.low %v1657_v14, %v1661_v53  ;;  %v1693_v51 = vld [vmem:[#allocation10 + $0x430] sm:$0xff] }
 0x24e   :  { %3590 = vmatpush1.bf16.msra.mxu1 %v8983_v49  ;;  %3445 = vmatprep.subr.bf16.mxu0 %v8990_v32  ;;  %v9023_v49 = vcombine.low %v1658_v62, %v1662_v0  ;;  %v9030_v32 = vcombine.high %v1665_v30, %v1669_v28  ;;  %v1697_v14 = vld [vmem:[#allocation10 + $0x450] sm:$0xff]  ;;  %v1698_v62 = vld [vmem:[#allocation10 + $0x458] sm:$0xff] }
 0x24f   :  { %3591 = vmatprep.subr.bf16.mxu1 %v8992_v27  ;;  %v9032_v27 = vcombine.high %v1666_v55, %v1670_v45  ;;  %v1701_v53 = vld [vmem:[#allocation10 + $0x470] sm:$0xff]  ;;  %v1702_v0 = vld [vmem:[#allocation10 + $0x478] sm:$0xff] }
 0x251   :  { %3446 = vmatpush1.bf16.msra.mxu0 %v8989_v35  ;;  %v9029_v35 = vcombine.low %v1665_v30, %v1669_v28  ;;  %v1705_v30 = vld [vmem:[#allocation10 + $0x490] sm:$0xff] }
 0x252   :  { %3592 = vmatpush1.bf16.msra.mxu1 %v8991_v52  ;;  %3447 = vmatprep.subr.bf16.mxu0 %v8998_v21  ;;  %v9031_v52 = vcombine.low %v1666_v55, %v1670_v45  ;;  %v9038_v21 = vcombine.high %v1673_v50, %v1677_v46  ;;  %v1709_v28 = vld [vmem:[#allocation10 + $0x4b0] sm:$0xff]  ;;  %v1706_v55 = vld [vmem:[#allocation10 + $0x498] sm:$0xff] }
 0x253   :  { %3593 = vmatprep.subr.bf16.mxu1 %v9000_v36  ;;  %v9040_v36 = vcombine.high %v1674_v9, %v1678_v29  ;;  %v1710_v45 = vld [vmem:[#allocation10 + $0x4b8] sm:$0xff] }
 0x255   :  { %3448 = vmatpush1.bf16.msra.mxu0 %v8997_v10  ;;  %v9037_v10 = vcombine.low %v1673_v50, %v1677_v46  ;;  %v1713_v50 = vld [vmem:[#allocation10 + $0x4d0] sm:$0xff] }
 0x256   :  { %3594 = vmatpush1.bf16.msra.mxu1 %v8999_v37  ;;  %3449 = vmatprep.subr.bf16.mxu0 %v9006_v40  ;;  %v9039_v37 = vcombine.low %v1674_v9, %v1678_v29  ;;  %v9046_v40 = vcombine.high %v1681_v48, %v1685_v42  ;;  %v1717_v46 = vld [vmem:[#allocation10 + $0x4f0] sm:$0xff]  ;;  %v1714_v9 = vld [vmem:[#allocation10 + $0x4d8] sm:$0xff] }
 0x257   :  { %3595 = vmatprep.subr.bf16.mxu1 %v9008_v41  ;;  %v9048_v41 = vcombine.high %v1682_v3, %v1686_v5  ;;  %v1718_v29 = vld [vmem:[#allocation10 + $0x4f8] sm:$0xff] }
 0x259   :  { %3450 = vmatpush1.bf16.msra.mxu0 %v9005_v16  ;;  %v9045_v16 = vcombine.low %v1681_v48, %v1685_v42  ;;  %v1722_v48 = vld [vmem:[#allocation10 + $0x518] sm:$0xff] }
 0x25a   :  { %3596 = vmatpush1.bf16.msra.mxu1 %v9007_v60  ;;  %3451 = vmatprep.subr.bf16.mxu0 %v9014_v39  ;;  %v9047_v60 = vcombine.low %v1682_v3, %v1686_v5  ;;  %v9054_v39 = vcombine.high %v1689_v61, %v1693_v51  ;;  %v1726_v42 = vld [vmem:[#allocation10 + $0x538] sm:$0xff]  ;;  %v9077_v3 = vcombine.low %v1713_v50, %v1717_v46 }
 0x25b   :  { %3597 = vmatprep.subr.bf16.mxu1 %v9016_v20  ;;  %v9056_v20 = vcombine.high %v1690_v13, %v1694_v44  ;;  %v9079_v5 = vcombine.low %v1714_v9, %v1718_v29 }
 0x25d   :  { %3452 = vmatpush1.bf16.msra.mxu0 %v9013_v26  ;;  %v9053_v26 = vcombine.low %v1689_v61, %v1693_v51  ;;  %v1729_v51 = vld [vmem:[#allocation10 + $0x550] sm:$0xff] }
 0x25e   :  { %3598 = vmatpush1.bf16.msra.mxu1 %v9015_v59  ;;  %3453 = vmatprep.subr.bf16.mxu0 %v9022_v56  ;;  %v9055_v59 = vcombine.low %v1690_v13, %v1694_v44  ;;  %v9062_v56 = vcombine.high %v1697_v14, %v1701_v53  ;;  %v1733_v13 = vld [vmem:[#allocation10 + $0x570] sm:$0xff]  ;;  %v1734_v44 = vld [vmem:[#allocation10 + $0x578] sm:$0xff] }
 0x25f   :  { %3599 = vmatprep.subr.bf16.mxu1 %v9024_v19  ;;  %v9064_v19 = vcombine.high %v1698_v62, %v1702_v0 }
 0x261   :  { %3454 = vmatpush1.bf16.msra.mxu0 %v9021_v11  ;;  %v9061_v11 = vcombine.low %v1697_v14, %v1701_v53 }
 0x262   :  { %3600 = vmatpush1.bf16.msra.mxu1 %v9023_v49  ;;  %3455 = vmatprep.subr.bf16.mxu0 %v9030_v32  ;;  %v9063_v49 = vcombine.low %v1698_v62, %v1702_v0  ;;  %v9070_v32 = vcombine.high %v1705_v30, %v1709_v28 }
 0x263   :  { %3601 = vmatprep.subr.bf16.mxu1 %v9032_v27  ;;  %v9072_v27 = vcombine.high %v1706_v55, %v1710_v45 }
 0x265   :  { %3456 = vmatpush1.bf16.msra.mxu0 %v9029_v35  ;;  %v9071_v35 = vcombine.low %v1706_v55, %v1710_v45  ;;  %v1738_v55 = vld [vmem:[#allocation10 + $0x598] sm:$0xff] }
 0x266   :  { %3602 = vmatpush1.bf16.msra.mxu1 %v9031_v52  ;;  %3457 = vmatprep.subr.bf16.mxu0 %v9038_v21  ;;  %v9078_v52 = vcombine.high %v1713_v50, %v1717_v46  ;;  %v1721_v21 = vld [vmem:[#allocation10 + $0x510] sm:$0xff]  ;;  %v1742_v45 = vld [vmem:[#allocation10 + $0x5b8] sm:$0xff] }
 0x267   :  { %3603 = vmatprep.subr.bf16.mxu1 %v9040_v36  ;;  %v1725_v36 = vld [vmem:[#allocation10 + $0x530] sm:$0xff] }
 0x269   :  { %3458 = vmatpush1.bf16.msra.mxu0 %v9037_v10  ;;  %v9086_v10 = vcombine.high %v1721_v21, %v1725_v36 }
 0x26a   :  { %3604 = vmatpush1.bf16.msra.mxu1 %v9039_v37  ;;  %3459 = vmatprep.subr.bf16.mxu0 %v9046_v40  ;;  %v9088_v37 = vcombine.high %v1722_v48, %v1726_v42  ;;  %v717_v40 = vld [vmem:[#allocation8] sm:$0xf] }
 0x26b   :  { %3605 = vmatprep.subr.bf16.mxu1 %v9048_v41  ;;  %v10561_v41 = vmov 1966171168   ;;  %v726_v14 = vrot.slane %v717_v40, %v10802_v23  ;;  %v734_v62 = vrot.slane %v717_v40, %v10808_v25 }
 0x26c   :  { %v3730_v61 = vunpack.c.l.s4 %v10561_v41 }
 0x26d   :  { %3460 = vmatpush1.bf16.msra.mxu0 %v9045_v16  ;;  %v9085_v16 = vcombine.low %v1721_v21, %v1725_v36  ;;  %v1745_v21 = vld [vmem:[#allocation10 + $0x5d0] sm:$0xff] }
 0x26e   :  { %3606 = vmatpush1.bf16.msra.mxu1 %v9047_v60  ;;  %3502 = vmatprep.subr.bf16.mxu0 %v9054_v39  ;;  %v9087_v60 = vcombine.low %v1722_v48, %v1726_v42  ;;  %v730_v39 = vrot.slane %v717_v40, %v10989_v6  ;;  %v3731_v53 = vunpack.c.0.s8 %v3730_v61 }
 0x26f   :  { %3648 = vmatprep.subr.bf16.mxu1 %v9056_v20  ;;  %v9094_v20 = vcombine.high %v1729_v51, %v1733_v13 }
 0x270   :  { %3462 = vmatmul.mubr.bf16.vlgmr.msra.gmra.mrb[20].mxu0 %v10904_v31 }
 0x271   :  { %3608 = vmatmul.mubr.bf16.vlgmr.msra.gmra.mrb[20].mxu1 %v10904_v31  ;;  %3471 = vmatprep.mubr.bf16.mxu0 %v10943_v15  ;;  %v9069_v31 = vcombine.low %v1705_v30, %v1709_v28  ;;  %v9093_v30 = vcombine.low %v1729_v51, %v1733_v13 }
 0x272   :  { %3503 = vmatpush1.bf16.msra.mxu0 %v9053_v26  ;;  %3617 = vmatprep.mubr.bf16.mxu1 %v10943_v15  ;;  %v9080_v15 = vcombine.high %v1714_v9, %v1718_v29  ;;  %v1737_v26 = vld [vmem:[#allocation10 + $0x590] sm:$0xff] }
 0x273   :  { %3649 = vmatpush1.bf16.msra.mxu1 %v9055_v59  ;;  %3504 = vmatprep.subr.bf16.mxu0 %v9062_v56  ;;  %v1741_v59 = vld [vmem:[#allocation10 + $0x5b0] sm:$0xff] }
 0x274   :  { %3650 = vmatprep.subr.bf16.mxu1 %v9064_v19  ;;  %v9102_v50 = vcombine.high %v1737_v26, %v1741_v59 }
 0x276   :  { %3505 = vmatpush1.bf16.msra.mxu0 %v9061_v11 }
 0x277   :  { %3651 = vmatpush1.bf16.msra.mxu1 %v9063_v49  ;;  %3506 = vmatprep.subr.bf16.mxu0 %v9070_v32 }
 0x278   :  { %3472 = vmatmul.mubr.bf16.gmra.mrb[24].mxu0 %v10945_v17  ;;  %3652 = vmatprep.subr.bf16.mxu1 %v9072_v27 }
 0x279   :  { %3618 = vmatmul.mubr.bf16.gmra.mrb[24].mxu1 %v10945_v17  ;;  %3481 = vmatprep.mubr.bf16.mxu0 %v10966_v12  ;;  %v1730_v17 = vld [vmem:[#allocation10 + $0x558] sm:$0xff] }
 0x27a   :  { %3507 = vmatpush1.bf16.msra.mxu0 %v9069_v31  ;;  %3627 = vmatprep.mubr.bf16.mxu1 %v10966_v12  ;;  %v722_v12 = vrot.slane %v717_v40, %v10805_v24  ;;  %v9096_v0 = vcombine.high %v1730_v17, %v1734_v44  ;;  %v9095_v28 = vcombine.low %v1730_v17, %v1734_v44  ;;  %v1753_v17 = vld [vmem:[#allocation10 + $0x610] sm:$0xff] }
 0x27b   :  { %3653 = vmatpush1.bf16.msra.mxu1 %v9071_v35  ;;  %3508 = vmatprep.subr.bf16.mxu0 %v9078_v52  ;;  %v9101_v52 = vcombine.low %v1737_v26, %v1741_v59  ;;  %v9103_v40 = vcombine.low %v1738_v55, %v1742_v45  ;;  %v1757_v44 = vld [vmem:[#allocation10 + $0x630] sm:$0xff] }
 0x27c   :  { %3654 = vmatprep.subr.bf16.mxu1 %v9080_v15  ;;  %v9104_v15 = vcombine.high %v1738_v55, %v1742_v45  ;;  %v1765_v55 = vld [vmem:[#allocation10 + $0x670] sm:$0xff]  ;;  %v1762_v45 = vld [vmem:[#allocation10 + $0x658] sm:$0xff] }
 0x27e   :  { %3509 = vmatpush1.bf16.msra.mxu0 %v9077_v3 }
 0x27f   :  { %3655 = vmatpush1.bf16.msra.mxu1 %v9079_v5  ;;  %3510 = vmatprep.subr.bf16.mxu0 %v9086_v10  ;;  %v1749_v5 = vld [vmem:[#allocation10 + $0x5f0] sm:$0xff]  ;;  %v1746_v10 = vld [vmem:[#allocation10 + $0x5d8] sm:$0xff] }
 0x280   :  { %3482 = vmatmul.mubr.bf16.gmra.mrb[28].mxu0 %v10972_v33  ;;  %3656 = vmatprep.subr.bf16.mxu1 %v9088_v37  ;;  %v1750_v37 = vld [vmem:[#allocation10 + $0x5f8] sm:$0xff] }
 0x281   :  { %3628 = vmatmul.mubr.bf16.gmra.mrb[28].mxu1 %v10972_v33  ;;  %3491 = vmatprep.mubr.bf16.mxu0 %v10997_v7  ;;  %v11137_v33 = vsub.s32 %v3731_v53, %v10799_v18  ;;  %v9111_v26 = vcombine.low %v1746_v10, %v1750_v37 }
 0x282   :  { %3511 = vmatpush1.bf16.msra.mxu0 %v9085_v16  ;;  %3637 = vmatprep.mubr.bf16.mxu1 %v10997_v7  ;;  %v1454_v56 = vpop.f32.mrb[0].mxu0  ;;  %v1536_v19 = vpop.f32.mrb[0].mxu1  ;;  %v9109_v16 = vcombine.low %v1745_v21, %v1749_v5 }
 0x283   :  { %3657 = vmatpush1.bf16.msra.mxu1 %v9087_v60  ;;  %v9449_v11 = vadd.f32 %v1454_v56, %v722_v12  ;;  %v9451_v49 = vadd.f32 %v1536_v19, %v730_v39  ;;  %v1456_v32 = vpop.f32.mrb[1].mxu0  ;;  %v1538_v27 = vpop.f32.mrb[1].mxu1  ;;  %3512 = vmatprep.subr.bf16.mxu0 %v9094_v20  ;;  %v9110_v60 = vcombine.high %v1745_v21, %v1749_v5  ;;  %v1754_v39 = vld [vmem:[#allocation10 + $0x618] sm:$0xff]  ;;  %v1781_v21 = vld [vmem:[#allocation10 + $0x6f0] sm:$0xff] }
 0x284   :  { %v9450_v46 = vadd.f32 %v1456_v32, %v726_v14  ;;  %v9452_v9 = vadd.f32 %v1538_v27, %v734_v62  ;;  %3658 = vmatprep.subr.bf16.mxu1 %v9096_v0  ;;  %v1458_v7 = vpop.f32.mrb[2].mxu0  ;;  %v1540_v29 = vpop.f32.mrb[2].mxu1  ;;  %v9112_v12 = vcombine.high %v1746_v10, %v1750_v37  ;;  %v1758_v20 = vld [vmem:[#allocation10 + $0x638] sm:$0xff]  ;;  %v1785_v37 = vld [vmem:[#allocation10 + $0x710] sm:$0xff] }
 0x285   :  { %v1459_v31 = vpop.f32.mrb[3].mxu0  ;;  %v1541_v35 = vpop.f32.mrb[3].mxu1  ;;  %v9119_v32 = vcombine.low %v1754_v39, %v1758_v20  ;;  %v1770_v7 = vld [vmem:[#allocation10 + $0x698] sm:$0xff] }
 0x286   :  { %v3725_v36 = vcombine.low %v9449_v11, %v9450_v46  ;;  %v3726_v48 = vcombine.high %v9449_v11, %v9450_v46  ;;  %v3727_v42 = vcombine.low %v9451_v49, %v9452_v9  ;;  %v3728_v3 = vcombine.high %v9451_v49, %v9452_v9  ;;  %3513 = vmatpush1.bf16.msra.mxu0 %v9093_v30  ;;  %v1766_v11 = vld [vmem:[#allocation10 + $0x678] sm:$0xff]  ;;  %v1769_v46 = vld [vmem:[#allocation10 + $0x690] sm:$0xff] }
 0x287   :  { %3659 = vmatpush1.bf16.msra.mxu1 %v9095_v28  ;;  %3514 = vmatprep.subr.bf16.mxu0 %v9102_v50  ;;  %v9120_v30 = vcombine.high %v1754_v39, %v1758_v20  ;;  %v1761_v28 = vld [vmem:[#allocation10 + $0x650] sm:$0xff]  ;;  %v9117_v49 = vcombine.low %v1753_v17, %v1757_v44  ;;  %v9128_v50 = vcombine.high %v1762_v45, %v1766_v11  ;;  %v1774_v29 = vld [vmem:[#allocation10 + $0x6b8] sm:$0xff] }
 0x288   :  { %v11140_v41 = vrot.slane %v3725_v36, %v11137_v33  ;;  %v3742_v61 = vrot.slane %v3726_v48, %v11137_v33  ;;  %v11144_v51 = vrot.slane %v3727_v42, %v11137_v33  ;;  %v3756_v13 = vrot.slane %v3728_v3, %v11137_v33  ;;  %3492 = vmatmul.mubr.bf16.gmra.mrb[32].mxu0 %v10999_v22  ;;  %v1773_v9 = vld [vmem:[#allocation10 + $0x6b0] sm:$0xff]  ;;  %v1778_v36 = vld [vmem:[#allocation10 + $0x6d8] sm:$0xff] }
 0x289   :  { %3638 = vmatmul.mubr.bf16.gmra.mrb[32].mxu1 %v10999_v22  ;;  %3660 = vmatprep.subr.bf16.mxu1 %v9104_v15  ;;  %v9118_v22 = vcombine.high %v1753_v17, %v1757_v44  ;;  %v9126_v27 = vcombine.high %v1761_v28, %v1765_v55  ;;  %v9127_v31 = vcombine.low %v1762_v45, %v1766_v11  ;;  %v1777_v15 = vld [vmem:[#allocation10 + $0x6d0] sm:$0xff]  ;;  %v1782_v48 = vld [vmem:[#allocation10 + $0x6f8] sm:$0xff] }
 0x28a   :  { %v3757_v14 = vcombine.low %v11140_v41, %v11144_v51  ;;  %v3758_v53 = vcombine.high %v11140_v41, %v11144_v51  ;;  %v3759_v62 = vcombine.low %v3742_v61, %v3756_v13  ;;  %v3760_v0 = vcombine.high %v3742_v61, %v3756_v13  ;;  %3515 = vmatpush1.bf16.msra.mxu0 %v9101_v52  ;;  %v1786_v61 = vld [vmem:[#allocation10 + $0x718] sm:$0xff]  ;;  %v1797_v39 = vld [vmem:[#allocation10 + $0x770] sm:$0xff] }
 0x28b   :  { %3534 = vmatprep.mubr.bf16.mxu0 %v10986_v1  ;;  %3661 = vmatpush1.bf16.msra.mxu1 %v9103_v40  ;;  %v9134_v35 = vcombine.high %v1769_v46, %v1773_v9  ;;  %v9136_v52 = vcombine.high %v1770_v7, %v1774_v29  ;;  %v9133_v42 = vcombine.low %v1769_v46, %v1773_v9  ;;  %v1789_v40 = vld [vmem:[#allocation10 + $0x730] sm:$0xff]  ;;  %v1790_v13 = vld [vmem:[#allocation10 + $0x738] sm:$0xff] }
 0x28c   :  { %v11155_v59 = vrot.slane %v3759_v62, %v11137_v33  ;;  %v11158_v56 = vrot.slane %v3758_v53, %v11137_v33  ;;  %v11161_v19 = vrot.slane %v3760_v0, %v11137_v33  ;;  %3680 = vmatprep.mubr.bf16.mxu1 %v10986_v1  ;;  %3516 = vmatprep.subr.bf16.mxu0 %v9110_v60  ;;  %v1794_v20 = vld [vmem:[#allocation10 + $0x758] sm:$0xff]  ;;  %v1813_v46 = vld [vmem:[#allocation10 + $0x7f0] sm:$0xff] }
 0x28d   :  { %3662 = vmatprep.subr.bf16.mxu1 %v9112_v12  ;;  %v9125_v1 = vcombine.low %v1761_v28, %v1765_v55  ;;  %v9135_v3 = vcombine.low %v1770_v7, %v1774_v29  ;;  %v9142_v5 = vcombine.high %v1777_v15, %v1781_v21  ;;  %v9144_v10 = vcombine.high %v1778_v36, %v1782_v48  ;;  %v1793_v12 = vld [vmem:[#allocation10 + $0x750] sm:$0xff]  ;;  %v1798_v53 = vld [vmem:[#allocation10 + $0x778] sm:$0xff] }
 0x28e   :  { %3517 = vmatpush1.bf16.msra.mxu0 %v9109_v16  ;;  %v9141_v17 = vcombine.low %v1777_v15, %v1781_v21  ;;  %v9143_v44 = vcombine.low %v1778_v36, %v1782_v48  ;;  %v9150_v16 = vcombine.high %v1785_v37, %v1789_v40  ;;  %v9152_v60 = vcombine.high %v1786_v61, %v1790_v13  ;;  %v1805_v28 = vld [vmem:[#allocation10 + $0x7b0] sm:$0xff]  ;;  %v1802_v55 = vld [vmem:[#allocation10 + $0x798] sm:$0xff] }
 0x28f   :  { %3663 = vmatpush1.bf16.msra.mxu1 %v9111_v26  ;;  %3518 = vmatprep.subr.bf16.mxu0 %v9118_v22  ;;  %v9149_v62 = vcombine.low %v1785_v37, %v1789_v40  ;;  %v9151_v0 = vcombine.low %v1786_v61, %v1790_v13  ;;  %v9158_v26 = vcombine.high %v1793_v12, %v1797_v39  ;;  %v1806_v45 = vld [vmem:[#allocation10 + $0x7b8] sm:$0xff] }
 0x290   :  { %3664 = vmatprep.subr.bf16.mxu1 %v9120_v30  ;;  %v9160_v22 = vcombine.high %v1794_v20, %v1798_v53  ;;  %v1801_v30 = vld [vmem:[#allocation10 + $0x790] sm:$0xff]  ;;  %v9157_v11 = vcombine.low %v1793_v12, %v1797_v39  ;;  %v1810_v9 = vld [vmem:[#allocation10 + $0x7d8] sm:$0xff]  ;;  %v3960_v12 = vrot.slane %v11158_v56, %v10802_v23 }
 0x291   :  { %v1814_v7 = vld [vmem:[#allocation10 + $0x7f8] sm:$0xff]  ;;  %v9165_v29 = vcombine.low %v1801_v30, %v1805_v28 }
 0x292   :  { %3519 = vmatpush1.bf16.msra.mxu0 %v9117_v49  ;;  %v9159_v49 = vcombine.low %v1794_v20, %v1798_v53  ;;  %v9175_v15 = vcombine.low %v1810_v9, %v1814_v7 }
 0x293   :  { %3665 = vmatpush1.bf16.msra.mxu1 %v9119_v32  ;;  %3520 = vmatprep.subr.bf16.mxu0 %v9126_v27  ;;  %v9166_v32 = vcombine.high %v1801_v30, %v1805_v28  ;;  %v9168_v27 = vcombine.high %v1802_v55, %v1806_v45  ;;  %v3956_v30 = vrot.slane %v11158_v56, %v10805_v24 }
 0x294   :  { %3666 = vmatprep.subr.bf16.mxu1 %v9128_v50  ;;  %v1809_v50 = vld [vmem:[#allocation10 + $0x7d0] sm:$0xff] }
 0x296   :  { %3521 = vmatpush1.bf16.msra.mxu0 %v9125_v1  ;;  %v9167_v1 = vcombine.low %v1802_v55, %v1806_v45 }
 0x297   :  { %3667 = vmatpush1.bf16.msra.mxu1 %v9127_v31  ;;  %3522 = vmatprep.subr.bf16.mxu0 %v9134_v35  ;;  %v9174_v31 = vcombine.high %v1809_v50, %v1813_v46  ;;  %v9176_v35 = vcombine.high %v1810_v9, %v1814_v7  ;;  %v3791_v9 = vcombine.high %v11158_v56, %v11158_v56 }
 0x298   :  { %3668 = vmatprep.subr.bf16.mxu1 %v9136_v52  ;;  %v9173_v52 = vcombine.low %v1809_v50, %v1813_v46 }
 0x29a   :  { %3523 = vmatpush1.bf16.msra.mxu0 %v9133_v42 }
 0x29b   :  { %3669 = vmatpush1.bf16.msra.mxu1 %v9135_v3  ;;  %3524 = vmatprep.subr.bf16.mxu0 %v9142_v5 }
 0x29c   :  { %3670 = vmatprep.subr.bf16.mxu1 %v9144_v10 }
 0x29e   :  { %3525 = vmatpush1.bf16.msra.mxu0 %v9141_v17 }
 0x29f   :  { %3671 = vmatpush1.bf16.msra.mxu1 %v9143_v44  ;;  %3526 = vmatprep.subr.bf16.mxu0 %v9150_v16 }
 0x2a0   :  { %3672 = vmatprep.subr.bf16.mxu1 %v9152_v60 }
 0x2a2   :  { %3527 = vmatpush1.bf16.msra.mxu0 %v9149_v62 }
 0x2a3   :  { %3673 = vmatpush1.bf16.msra.mxu1 %v9151_v0  ;;  %3528 = vmatprep.subr.bf16.mxu0 %v9158_v26 }
 0x2a4   :  { %3674 = vmatprep.subr.bf16.mxu1 %v9160_v22 }
 0x2a6   :  { %3529 = vmatpush1.bf16.msra.mxu0 %v9157_v11  ;;  %v3968_v11 = vrot.slane %v11158_v56, %v10808_v25 }
 0x2a7   :  { %3675 = vmatpush1.bf16.msra.mxu1 %v9159_v49  ;;  %3530 = vmatprep.subr.bf16.mxu0 %v9166_v32 }
 0x2a8   :  { %3676 = vmatprep.subr.bf16.mxu1 %v9168_v27 }
 0x2aa   :  { %3531 = vmatpush1.bf16.msra.mxu0 %v9165_v29 }
 0x2ab   :  { %3677 = vmatpush1.bf16.msra.mxu1 %v9167_v1  ;;  %3532 = vmatprep.subr.bf16.mxu0 %v9174_v31 }
 0x2ac   :  { %3678 = vmatprep.subr.bf16.mxu1 %v9176_v35 }
 0x2ae   :  { %3533 = vmatpush1.bf16.msra.mxu0 %v9173_v52 }
 0x2af   :  { %3679 = vmatpush1.bf16.msra.mxu1 %v9175_v15 }
 0x2b1   :  { %3535 = vmatmul.mubr.bf16.vlgmr.msra.gmra.mrb[20].mxu0 %v11031_v38 }
 0x2b2   :  { %3681 = vmatmul.mubr.bf16.vlgmr.msra.gmra.mrb[20].mxu1 %v11031_v38  ;;  %3544 = vmatprep.mubr.bf16.mxu0 %v11035_v47  ;;  %v3767_v38 = vrot.slane %v3757_v14, %v11137_v33 }
 0x2b3   :  { %3690 = vmatprep.mubr.bf16.mxu1 %v11035_v47 }
 0x2b4   :  { %v3808_v47 = vrot.slane %v3767_v38, %v10808_v25  ;;  %v11207_v13 = vcombine.high %v3767_v38, %v3767_v38  ;;  %v3796_v17 = vrot.slane %v3767_v38, %v10805_v24  ;;  %v3804_v16 = vrot.slane %v3767_v38, %v10989_v6 }
 0x2b6   :  { %v4120_v39 = vrot.slane %v11207_v13, %v10802_v23  ;;  %v4116_v46 = vrot.slane %v11207_v13, %v10805_v24  ;;  %v4128_v1 = vrot.slane %v11207_v13, %v10808_v25 }
 0x2b9   :  { %3545 = vmatmul.mubr.bf16.gmra.mrb[24].mxu0 %v11050_v4 }
 0x2ba   :  { %3691 = vmatmul.mubr.bf16.gmra.mrb[24].mxu1 %v11050_v4  ;;  %3554 = vmatprep.mubr.bf16.mxu0 %v11060_v8  ;;  %v3800_v4 = vrot.slane %v3767_v38, %v10802_v23 }
 0x2bb   :  { %3700 = vmatprep.mubr.bf16.mxu1 %v11060_v8  ;;  %v11184_v8 = vld [vmem:[#allocation11] sm:$0xff] }
 0x2bc   :  { %v11196_v33 = vrot.slane %v11184_v8, %v10808_v25 }
 0x2c1   :  { %3555 = vmatmul.mubr.bf16.gmra.mrb[28].mxu0 %v11071_v54 }
 0x2c2   :  { %3701 = vmatmul.mubr.bf16.gmra.mrb[28].mxu1 %v11071_v54  ;;  %3564 = vmatprep.mubr.bf16.mxu0 %v11080_v2  ;;  %v11188_v54 = vrot.slane %v11184_v8, %v10802_v23 }
 0x2c3   :  { %3710 = vmatprep.mubr.bf16.mxu1 %v11080_v2  ;;  %v11192_v2 = vrot.slane %v11184_v8, %v10805_v24 }
 0x2c9   :  { %3565 = vmatmul.mubr.bf16.gmra.mrb[32].mxu0 %v11084_v34 }
 0x2ca   :  { %3711 = vmatmul.mubr.bf16.gmra.mrb[32].mxu1 %v11084_v34  ;;  %3947 = vmatprep.mubr.f32.mxu0 %v3808_v47  ;;  %v11200_v34 = vrot.slane %v11184_v8, %v10989_v6  ;;  %v3964_v47 = vrot.slane %v11158_v56, %v10989_v6  ;;  %v4124_v56 = vrot.slane %v11207_v13, %v10989_v6 }
 0x2cb   :  { %3877 = vmatprep.mubr.f32.mxu1 %v3800_v4 }
 0x302   :  { %v3244_v41 = vpop.f32.mrb[4].mxu0 }
 0x303   :  { %v3390_v51 = vpop.f32.mrb[4].mxu1  ;;  %v3246_v14 = vpop.f32.mrb[5].mxu0  ;;  %v9453_v42 = vadd.f32 %v3244_v41, %v11192_v2 }
 0x304   :  { %v9454_v21 = vadd.f32 %v3246_v14, %v11188_v54  ;;  %v3392_v36 = vpop.f32.mrb[5].mxu1  ;;  %v3248_v48 = vpop.f32.mrb[6].mxu0  ;;  %v9469_v37 = vadd.f32 %v3390_v51, %v11200_v34  ;;  %v4280_v14 = vrot.slane %v3791_v9, %v10802_v23 }
 0x305   :  { %v9470_v3 = vadd.f32 %v3392_v36, %v11196_v33  ;;  %v3394_v5 = vpop.f32.mrb[6].mxu1  ;;  %v3250_v10 = vpop.f32.mrb[7].mxu0  ;;  %v9455_v44 = vadd.f32 %v3248_v48, %v11192_v2  ;;  %v4276_v48 = vrot.slane %v3791_v9, %v10805_v24 }
 0x306   :  { %v9456_v40 = vadd.f32 %v3250_v10, %v11188_v54  ;;  %v3396_v61 = vpop.f32.mrb[7].mxu1  ;;  %3813 = vmatprep.subr.mxu1 %v9454_v21  ;;  %v9471_v28 = vadd.f32 %v3394_v5, %v11200_v34  ;;  %v4288_v10 = vrot.slane %v3791_v9, %v10808_v25 }
 0x307   :  { %3883 = vmatprep.subr.mxu0 %v9470_v3  ;;  %3814 = vmatpush1.xpose.msra.mxu1 %v9453_v42  ;;  %v9472_v20 = vadd.f32 %v3396_v61, %v11196_v33 }
 0x308   :  { %3884 = vmatpush1.xpose.msra.mxu0 %v9469_v37  ;;  %3973 = vmatprep.subr.mxu1 %v9456_v40 }
 0x30a   :  { %v3254_v60 = vpop.f32.mrb[8].mxu0  ;;  %3878 = vmatmul.mubr.f32.vlgmr.msra.gmra.mrb[36].mxu1 %v3796_v17  ;;  %v4440_v17 = vrot.slane %v11155_v59, %v10802_v23 }
 0x30b   :  { %v3400_v53 = vpop.f32.mrb[8].mxu1  ;;  %3948 = vmatmul.mubr.f32.vlgmr.msra.gmra.mrb[36].mxu0 %v3804_v16  ;;  %v3256_v62 = vpop.f32.mrb[9].mxu0  ;;  %3974 = vmatpush1.xpose.msra.mxu1 %v9455_v44  ;;  %v9457_v49 = vadd.f32 %v3254_v60, %v11192_v2 }
 0x30c   :  { %v9458_v0 = vadd.f32 %v3256_v62, %v11188_v54  ;;  %v3402_v26 = vpop.f32.mrb[9].mxu1  ;;  %4037 = vmatprep.mubr.f32.mxu1 %v3960_v12  ;;  %4197 = vmatprep.mubr.f32.mxu0 %v4120_v39  ;;  %v3258_v22 = vpop.f32.mrb[10].mxu0  ;;  %v9473_v7 = vadd.f32 %v3400_v53, %v11200_v34 }
 0x30d   :  { %v3404_v55 = vpop.f32.mrb[10].mxu1  ;;  %4043 = vmatprep.subr.mxu1 %v9472_v20  ;;  %v3260_v45 = vpop.f32.mrb[11].mxu0  ;;  %v9474_v50 = vadd.f32 %v3402_v26, %v11196_v33  ;;  %v9459_v4 = vadd.f32 %v3258_v22, %v11192_v2  ;;  %v4436_v20 = vrot.slane %v11155_v59, %v10805_v24  ;;  %v4284_v26 = vrot.slane %v3791_v9, %v10989_v6 }
 0x30e   :  { %v9460_v32 = vadd.f32 %v3260_v45, %v11188_v54  ;;  %v3406_v27 = vpop.f32.mrb[11].mxu1  ;;  %4038 = vmatmul.mubr.f32.vlgmr.msra.gmra.mrb[38].mxu1 %v3956_v30  ;;  %4133 = vmatprep.subr.mxu0 %v9458_v0  ;;  %v9475_v42 = vadd.f32 %v3404_v55, %v11200_v34  ;;  %v4448_v0 = vrot.slane %v11155_v59, %v10808_v25 }
 0x30f   :  { %4044 = vmatpush1.xpose.msra.mxu1 %v9471_v28  ;;  %4107 = vmatprep.mubr.f32.mxu1 %v3968_v11  ;;  %v9476_v21 = vadd.f32 %v3406_v27, %v11196_v33  ;;  %v4600_v30 = vrot.slane %v11161_v19, %v10802_v23  ;;  %v3790_v55 = vcombine.high %v11155_v59, %v11155_v59 }
 0x310   :  { %4134 = vmatpush1.xpose.msra.mxu0 %v9457_v49  ;;  %4293 = vmatprep.subr.mxu1 %v9460_v32  ;;  %v4596_v45 = vrot.slane %v11161_v19, %v10805_v24  ;;  %v4444_v49 = vrot.slane %v11155_v59, %v10989_v6  ;;  %v4608_v27 = vrot.slane %v11161_v19, %v10808_v25 }
 0x311   :  { %4203 = vmatprep.subr.mxu0 %v9474_v50  ;;  %v4756_v59 = vrot.slane %v3790_v55, %v10805_v24 }
 0x312   :  { %v3264_v29 = vpop.f32.mrb[12].mxu0 }
 0x313   :  { %v3410_v31 = vpop.f32.mrb[12].mxu1  ;;  %4198 = vmatmul.mubr.f32.vlgmr.msra.gmra.mrb[38].mxu0 %v4116_v46  ;;  %v3266_v35 = vpop.f32.mrb[13].mxu0  ;;  %v9461_v3 = vadd.f32 %v3264_v29, %v11192_v2  ;;  %v4760_v46 = vrot.slane %v3790_v55, %v10802_v23 }
 0x314   :  { %v9462_v52 = vadd.f32 %v3266_v35, %v11188_v54  ;;  %v3412_v15 = vpop.f32.mrb[13].mxu1  ;;  %4204 = vmatpush1.xpose.msra.mxu0 %v9473_v7  ;;  %4267 = vmatprep.mubr.f32.mxu0 %v4128_v1  ;;  %v3268_v38 = vpop.f32.mrb[14].mxu0  ;;  %v9477_v53 = vadd.f32 %v3410_v31, %v11200_v34  ;;  %v3792_v7 = vcombine.high %v11161_v19, %v11161_v19 }
 0x315   :  { %v3414_v41 = vpop.f32.mrb[14].mxu1  ;;  %v3270_v51 = vpop.f32.mrb[15].mxu0  ;;  %v9478_v37 = vadd.f32 %v3412_v15, %v11196_v33  ;;  %v9463_v22 = vadd.f32 %v3268_v38, %v11192_v2  ;;  %v4768_v1 = vrot.slane %v3790_v55, %v10808_v25 }
 0x316   :  { %v3416_v36 = vpop.f32.mrb[15].mxu1  ;;  %4108 = vmatmul.mubr.f32.vlgmr.msra.gmra.mrb[38].mxu1 %v3964_v47  ;;  %4453 = vmatprep.subr.mxu0 %v9462_v52  ;;  %v9464_v44 = vadd.f32 %v3270_v51, %v11188_v54  ;;  %v9479_v11 = vadd.f32 %v3414_v41, %v11200_v34  ;;  %v4920_v35 = vrot.slane %v3792_v7, %v10802_v23  ;;  %v1847_v41 = vsub.s32 7, %v10799_v18 }
 0x317   :  { %4294 = vmatpush1.xpose.msra.mxu1 %v9459_v4  ;;  %4357 = vmatprep.mubr.f32.mxu1 %v4280_v14  ;;  %v9480_v28 = vadd.f32 %v3416_v36, %v11196_v33  ;;  %v4916_v15 = vrot.slane %v3792_v7, %v10805_v24  ;;  %v4764_v47 = vrot.slane %v3790_v55, %v10989_v6  ;;  %v1843_v51 = vsub.s32 6, %v10799_v18 }
 0x318   :  { %4363 = vmatprep.subr.mxu1 %v9476_v21  ;;  %v4928_v4 = vrot.slane %v3792_v7, %v10808_v25  ;;  %v11299_v21 = vrot.slane %v11184_v8, %v1847_v41 }
 0x31a   :  { %v3274_v5 = vpop.f32.mrb[16].mxu0  ;;  %4358 = vmatmul.mubr.f32.vlgmr.msra.gmra.mrb[40].mxu1 %v4276_v48  ;;  %v11302_v48 = vrot.slane %v11184_v8, %v1843_v51 }
 0x31b   :  { %v3420_v40 = vpop.f32.mrb[16].mxu1  ;;  %4268 = vmatmul.mubr.f32.vlgmr.msra.gmra.mrb[38].mxu0 %v4124_v56  ;;  %4364 = vmatpush1.xpose.msra.mxu1 %v9475_v42  ;;  %v3276_v61 = vpop.f32.mrb[17].mxu0  ;;  %v9465_v32 = vadd.f32 %v3274_v5, %v11192_v2 }
 0x31c   :  { %4454 = vmatpush1.xpose.msra.mxu0 %v9461_v3  ;;  %v3422_v16 = vpop.f32.mrb[17].mxu1  ;;  %4427 = vmatprep.mubr.f32.mxu1 %v4288_v10  ;;  %v3278_v13 = vpop.f32.mrb[18].mxu0  ;;  %v9466_v60 = vadd.f32 %v3276_v61, %v11188_v54  ;;  %v9481_v29 = vadd.f32 %v3420_v40, %v11200_v34 }
 0x31d   :  { %4517 = vmatprep.mubr.f32.mxu0 %v4440_v17  ;;  %4523 = vmatprep.subr.mxu0 %v9478_v37  ;;  %v3424_v12 = vpop.f32.mrb[18].mxu1  ;;  %v3280_v39 = vpop.f32.mrb[19].mxu0  ;;  %v9482_v50 = vadd.f32 %v3422_v16, %v11196_v33  ;;  %v9467_v31 = vadd.f32 %v3278_v13, %v11192_v2  ;;  %v1839_v2 = vsub.s32 5, %v10799_v18 }
 0x31e   :  { %4613 = vmatprep.subr.mxu1 %v9464_v44  ;;  %v3426_v62 = vpop.f32.mrb[19].mxu1  ;;  %v9468_v9 = vadd.f32 %v3280_v39, %v11188_v54  ;;  %v4604_v54 = vrot.slane %v11161_v19, %v10989_v6  ;;  %v9483_v38 = vadd.f32 %v3424_v12, %v11200_v34  ;;  %v4924_v19 = vrot.slane %v3792_v7, %v10989_v6 }
 0x31f   :  { %4518 = vmatmul.mubr.f32.vlgmr.msra.gmra.mrb[40].mxu0 %v4436_v20  ;;  %v9484_v52 = vadd.f32 %v3426_v62, %v11196_v33  ;;  %v1835_v33 = vsub.s32 4, %v10799_v18  ;;  %v11293_v34 = vrot.slane %v11184_v8, %v1839_v2 }
 0x320   :  { %4524 = vmatpush1.xpose.msra.mxu0 %v9477_v53  ;;  %4587 = vmatprep.mubr.f32.mxu0 %v4448_v0 }
 0x321   :  { %4773 = vmatprep.subr.mxu0 %v9466_v60  ;;  %v11296_v14 = vrot.slane %v11184_v8, %v1835_v33 }
 0x322   :  { %4428 = vmatmul.mubr.f32.vlgmr.msra.gmra.mrb[40].mxu1 %v4284_v26 }
 0x323   :  { %4614 = vmatpush1.xpose.msra.mxu1 %v9463_v22  ;;  %4677 = vmatprep.mubr.f32.mxu1 %v4600_v30 }
 0x324   :  { %4683 = vmatprep.subr.mxu1 %v9480_v28 }
 0x326   :  { %4678 = vmatmul.mubr.f32.vlgmr.msra.gmra.mrb[42].mxu1 %v4596_v45 }
 0x327   :  { %4588 = vmatmul.mubr.f32.vlgmr.msra.gmra.mrb[40].mxu0 %v4444_v49  ;;  %4684 = vmatpush1.xpose.msra.mxu1 %v9479_v11 }
 0x328   :  { %4774 = vmatpush1.xpose.msra.mxu0 %v9465_v32  ;;  %4747 = vmatprep.mubr.f32.mxu1 %v4608_v27 }
 0x329   :  { %4837 = vmatprep.mubr.f32.mxu0 %v4760_v46  ;;  %4843 = vmatprep.subr.mxu0 %v9482_v50 }
 0x32a   :  { %4933 = vmatprep.subr.mxu1 %v9468_v9 }
 0x32b   :  { %4838 = vmatmul.mubr.f32.vlgmr.msra.gmra.mrb[42].mxu0 %v4756_v59 }
 0x32c   :  { %4844 = vmatpush1.xpose.msra.mxu0 %v9481_v29  ;;  %4907 = vmatprep.mubr.f32.mxu0 %v4768_v1 }
 0x32e   :  { %4748 = vmatmul.mubr.f32.vlgmr.msra.gmra.mrb[42].mxu1 %v4604_v54 }
 0x32f   :  { %4934 = vmatpush1.xpose.msra.mxu1 %v9467_v31  ;;  %4997 = vmatprep.mubr.f32.mxu1 %v4920_v35 }
 0x330   :  { %5003 = vmatprep.subr.mxu1 %v9484_v52 }
 0x332   :  { %4998 = vmatmul.mubr.f32.vlgmr.msra.gmra.mrb[44].mxu1 %v4916_v15 }
 0x333   :  { %4908 = vmatmul.mubr.f32.vlgmr.msra.gmra.mrb[42].mxu0 %v4764_v47  ;;  %5004 = vmatpush1.xpose.msra.mxu1 %v9483_v38 }
 0x334   :  { %5067 = vmatprep.mubr.f32.mxu1 %v4928_v4 }
 0x33a   :  { %5068 = vmatmul.mubr.f32.vlgmr.msra.gmra.mrb[44].mxu1 %v4924_v19 }
 0x384   :  { %v3536_v36 = vpop.f32.mrb[20].mxu0 }
 0x385   :  { %v3682_v42 = vpop.f32.mrb[20].mxu1  ;;  %v3538_v56 = vpop.f32.mrb[21].mxu0  ;;  %v9485_v18 = vadd.f32 %v3536_v36, %v11296_v14 }
 0x386   :  { %v9486_v3 = vadd.f32 %v3538_v56, %v11293_v34  ;;  %v3684_v5 = vpop.f32.mrb[21].mxu1  ;;  %v3540_v10 = vpop.f32.mrb[22].mxu0  ;;  %v9501_v44 = vadd.f32 %v3682_v42, %v11302_v48 }
 0x387   :  { %v9502_v37 = vadd.f32 %v3684_v5, %v11299_v21  ;;  %v11308_v40 = vadd.f32 %v3540_v10, %v11296_v14  ;;  %v3686_v61 = vpop.f32.mrb[22].mxu1  ;;  %v3542_v17 = vpop.f32.mrb[23].mxu0 }
 0x388   :  { %v11312_v8 = vadd.f32 %v3686_v61, %v11302_v48  ;;  %v9488_v16 = vadd.f32 %v3542_v17, %v11293_v34  ;;  %v3688_v13 = vpop.f32.mrb[23].mxu1  ;;  %5209 = vmatprep.subr.mxu0 %v9486_v3 }
 0x389   :  { %v9504_v60 = vadd.f32 %v3688_v13, %v11299_v21  ;;  %5280 = vmatprep.subr.mxu1 %v9502_v37  ;;  %5210 = vmatpush1.msra.mxu0 %v9485_v18 }
 0x38a   :  { %5281 = vmatpush1.msra.mxu1 %v9501_v44  ;;  %5354 = vmatprep.subr.mxu0 %v9488_v16 }
 0x38b   :  { %5425 = vmatprep.subr.mxu1 %v9504_v60 }
 0x38c   :  { %v3546_v12 = vpop.f32.mrb[24].mxu0 }
 0x38d   :  { %v11317_v39 = vadd.f32 %v3546_v12, %v11296_v14  ;;  %v3692_v20 = vpop.f32.mrb[24].mxu1  ;;  %v3548_v53 = vpop.f32.mrb[25].mxu0 }
 0x38e   :  { %v11320_v62 = vadd.f32 %v3692_v20, %v11302_v48  ;;  %v11323_v0 = vadd.f32 %v3548_v53, %v11293_v34  ;;  %v3694_v26 = vpop.f32.mrb[25].mxu1  ;;  %v3550_v22 = vpop.f32.mrb[26].mxu0 }
 0x38f   :  { %v11326_v30 = vadd.f32 %v3694_v26, %v11299_v21  ;;  %v11329_v28 = vadd.f32 %v3550_v22, %v11296_v14  ;;  %v3696_v55 = vpop.f32.mrb[26].mxu1  ;;  %v3552_v45 = vpop.f32.mrb[27].mxu0 }
 0x390   :  { %v11332_v11 = vadd.f32 %v3696_v55, %v11302_v48  ;;  %v11335_v49 = vadd.f32 %v3552_v45, %v11293_v34  ;;  %v3698_v32 = vpop.f32.mrb[27].mxu1 }
 0x391   :  { %v11338_v27 = vadd.f32 %v3698_v32, %v11299_v21 }
 0x394   :  { %v3556_v50 = vpop.f32.mrb[28].mxu0 }
 0x395   :  { %v11341_v46 = vadd.f32 %v3556_v50, %v11296_v14  ;;  %v3702_v9 = vpop.f32.mrb[28].mxu1  ;;  %v3558_v59 = vpop.f32.mrb[29].mxu0 }
 0x396   :  { %v11344_v7 = vadd.f32 %v3702_v9, %v11302_v48  ;;  %v11347_v29 = vadd.f32 %v3558_v59, %v11293_v34  ;;  %v3704_v1 = vpop.f32.mrb[29].mxu1  ;;  %v3560_v54 = vpop.f32.mrb[30].mxu0 }
 0x397   :  { %v11350_v31 = vadd.f32 %v3704_v1, %v11299_v21  ;;  %v11353_v35 = vadd.f32 %v3560_v54, %v11296_v14  ;;  %v3706_v52 = vpop.f32.mrb[30].mxu1  ;;  %v3562_v15 = vpop.f32.mrb[31].mxu0 }
 0x398   :  { %v11356_v38 = vadd.f32 %v3706_v52, %v11302_v48  ;;  %v11359_v47 = vadd.f32 %v3562_v15, %v11293_v34  ;;  %v3708_v4 = vpop.f32.mrb[31].mxu1 }
 0x399   :  { %v11362_v19 = vadd.f32 %v3708_v4, %v11299_v21 }
 0x39c   :  { %v3566_v2 = vpop.f32.mrb[32].mxu0 }
 0x39d   :  { %v11365_v33 = vadd.f32 %v3566_v2, %v11296_v14  ;;  %v3712_v41 = vpop.f32.mrb[32].mxu1  ;;  %v3568_v51 = vpop.f32.mrb[33].mxu0 }
 0x39e   :  { %v11368_v36 = vadd.f32 %v3712_v41, %v11302_v48  ;;  %v11371_v42 = vadd.f32 %v3568_v51, %v11293_v34  ;;  %v3714_v56 = vpop.f32.mrb[33].mxu1  ;;  %v3570_v3 = vpop.f32.mrb[34].mxu0 }
 0x39f   :  { %v11374_v5 = vadd.f32 %v3714_v56, %v11299_v21  ;;  %v11377_v10 = vadd.f32 %v3570_v3, %v11296_v14  ;;  %v3716_v18 = vpop.f32.mrb[34].mxu1  ;;  %v3572_v37 = vpop.f32.mrb[35].mxu0 }
 0x3a0   :  { %v11380_v61 = vadd.f32 %v3716_v18, %v11302_v48  ;;  %v11383_v17 = vadd.f32 %v3572_v37, %v11293_v34  ;;  %v3718_v44 = vpop.f32.mrb[35].mxu1 }
 0x3a1   :  { %v11386_v16 = vadd.f32 %v3718_v44, %v11299_v21 }
 0x3dd   :  { %v3879_v13 = vpop.f32.mrb[36].mxu1 }
 0x3de   :  { %v3949_v60 = vpop.f32.mrb[36].mxu0  ;;  %v3881_v12 = vpop.f32.mrb[37].mxu1 }
 0x3df   :  { %v3950_v20 = vadd.f32 %v3949_v60, %v3879_v13  ;;  %v3951_v53 = vpop.f32.mrb[37].mxu0 }
 0x3e1   :  { %v5073_v56 = vmul.f32 0.044194173, %v3950_v20 }
 0x3e9   :  { %v4109_v26 = vpop.f32.mrb[38].mxu1 }
 0x3ea   :  { %v4111_v14 = vpop.f32.mrb[39].mxu1  ;;  %v5074_v59 = vmul.f32 0.044194173, %v4109_v26 }
 0x3ec   :  { %v5089_v4 = vrot.slane %v5074_v59, 7 }
 0x3ee   :  { %v4269_v22 = vpop.f32.mrb[38].mxu0  ;;  %v5091_v37 = vsel %vm5090_vm0, %v5089_v4, %v5073_v56 }
 0x3ef   :  { %v4271_v55 = vpop.f32.mrb[39].mxu0  ;;  %v5075_v1 = vmul.f32 0.044194173, %v4269_v22 }
 0x3f1   :  { %v5092_v41 = vrot.slane %v5075_v1, 6 }
 0x3f3   :  { %v5094_v13 = vsel %vm5093_vm1, %v5092_v41, %v5091_v37 }
 0x3f5   :  { %v4429_v45 = vpop.f32.mrb[40].mxu1 }
 0x3f6   :  { %v4431_v32 = vpop.f32.mrb[41].mxu1  ;;  %v5076_v54 = vmul.f32 0.044194173, %v4429_v45 }
 0x3f8   :  { %v5095_v3 = vrot.slane %v5076_v54, 5 }
 0x3fa   :  { %v4589_v48 = vpop.f32.mrb[40].mxu0  ;;  %v5097_v53 = vsel %vm5096_vm2, %v5095_v3, %v5094_v13 }
 0x3fb   :  { %v4591_v50 = vpop.f32.mrb[41].mxu0  ;;  %v5077_v52 = vmul.f32 0.044194173, %v4589_v48 }
 0x3fd   :  { %v5098_v18 = vrot.slane %v5077_v52, 4 }
 0x3ff   :  { %v5100_v20 = vsel %vm5099_vm3, %v5098_v18, %v5097_v53 }
 0x401   :  { %v4749_v9 = vpop.f32.mrb[42].mxu1 }
 0x402   :  { %v4751_v34 = vpop.f32.mrb[43].mxu1  ;;  %v5078_v2 = vmul.f32 0.044194173, %v4749_v9 }
 0x404   :  { %v5101_v44 = vrot.slane %v5078_v2, 3 }
 0x406   :  { %v4909_v21 = vpop.f32.mrb[42].mxu0  ;;  %v5103_v55 = vsel %vm5102_vm4, %v5101_v44, %v5100_v20 }
 0x407   :  { %v4911_v15 = vpop.f32.mrb[43].mxu0  ;;  %v5079_v51 = vmul.f32 0.044194173, %v4909_v21 }
 0x409   :  { %v5104_v60 = vrot.slane %v5079_v51, 2 }
 0x40b   :  { %v5106_v45 = vsel %vm5105_vm5, %v5104_v60, %v5103_v55 }
 0x40d   :  { %v5069_v12 = vpop.f32.mrb[44].mxu1 }
 0x40e   :  { %v5080_v26 = vmul.f32 0.044194173, %v5069_v12  ;;  %v5071_v14 = vpop.f32.mrb[45].mxu1 }
 0x410   :  { %v5107_v22 = vrot.slane %v5080_v26, 1 }
 0x412   :  { %v5109_v32 = vsel %vm5108_vm6, %v5107_v22, %v5106_v45 }
 0x413   :  { %v5112_v48 = vsel %vm5111_vm7, %v5109_v32, -inf }
 0x414   :  { %5113 = vmax.xlane.f32.xlu0 %v5112_v48 }
 0x4a1   :  { %v5114_v50 = vpop.xlane.xlu0 %5113 }
 0x4a2   :  { %v5116_v9 = vrot.slane %v5114_v50, 1  ;;  %v5117_v34 = vrot.slane %v5114_v50, 2  ;;  %v5118_v21 = vrot.slane %v5114_v50, 3  ;;  %v5119_v15 = vrot.slane %v5114_v50, 4 }
 0x4a3   :  { %v5120_v4 = vrot.slane %v5114_v50, 5  ;;  %v5121_v41 = vrot.slane %v5114_v50, 6  ;;  %v5122_v3 = vrot.slane %v5114_v50, 7  ;;  %v5131_v18 = vsub.f32 %v5073_v56, %v5114_v50 }
 0x4a4   :  { %v5132_v37 = vsub.f32 %v5074_v59, %v5116_v9  ;;  %v5133_v13 = vsub.f32 %v5075_v1, %v5117_v34  ;;  %v5134_v44 = vsub.f32 %v5076_v54, %v5118_v21  ;;  %v5135_v12 = vsub.f32 %v5077_v52, %v5119_v15 }
 0x4a5   :  { %v5136_v53 = vsub.f32 %v5078_v2, %v5120_v4  ;;  %v5139_v60 = vmul.f32 1.442695, %v5131_v18  ;;  %v5137_v14 = vsub.f32 %v5079_v51, %v5121_v41  ;;  %v5138_v45 = vsub.f32 %v5080_v26, %v5122_v3 }
 0x4a6   :  { %v5141_v20 = vmul.f32 1.442695, %v5132_v37  ;;  %v5143_v22 = vmul.f32 1.442695, %v5133_v13  ;;  %v5145_v55 = vmul.f32 1.442695, %v5134_v44 }
 0x4a7   :  { %10229 = vpow2.f32 %v5139_v60  ;;  %v5147_v32 = vmul.f32 1.442695, %v5135_v12  ;;  %v5149_v48 = vmul.f32 1.442695, %v5136_v53  ;;  %v5151_v63 = vmul.f32 1.442695, %v5137_v14 }
 0x4a8   :  { %10231 = vpow2.f32 %v5141_v20  ;;  %v5153_v43 = vmul.f32 1.442695, %v5138_v45  ;;  %v10562_v53 = vmov 0.0  }
 0x4a9   :  { %10233 = vpow2.f32 %v5143_v22  ;;  %5273 = vmatprep.mubr.f32.mxu0 %v10562_v53  ;;  %5344 = vmatprep.mubr.f32.mxu1 %v10562_v53 }
 0x4aa   :  { %10235 = vpow2.f32 %v5145_v55 }
 0x4ab   :  { %10237 = vpow2.f32 %v5147_v32  ;;  %v9848_v32 = vld [vmem:[#allocation13 + $0x68] ss:$16 sps:$4 sm:$0xff]  }
 0x4ac   :  { %10239 = vpow2.f32 %v5149_v48  ;;  %v9853_v48 = vld [vmem:[#allocation13 + $0x84] ss:$16 sps:$4 sm:$0xff]  }
 0x4ad   :  { %10241 = vpow2.f32 %v5151_v63 }
 0x4ae   :  { %10243 = vpow2.f32 %v5153_v43 }
 0x4b1   :  { %v10230_v59 = vpop.eup %10229 }
 0x4b2   :  { %v10232_v1 = vpop.eup %10231 }
 0x4b3   :  { %v10234_v54 = vpop.eup %10233  ;;  %v5163_v52 = vrot.slane %v10232_v1, 7 }
 0x4b4   :  { %v10236_v2 = vpop.eup %10235  ;;  %v5165_v51 = vrot.slane %v10234_v54, 6 }
 0x4b5   :  { %v10238_v56 = vpop.eup %10237  ;;  %v5164_v26 = vsel %vm5090_vm0, %v5163_v52, %v10230_v59  ;;  %v5167_v50 = vrot.slane %v10236_v2, 5  ;;  %v9859_v52 = vld [vmem:[#allocation13 + $0xa4] ss:$16 sps:$4 sm:$0xff]  }
 0x4b6   :  { %v11397_v9 = vpop.eup %10239  ;;  %v5166_v34 = vsel %vm5093_vm1, %v5165_v51, %v5164_v26  ;;  %v5169_v21 = vrot.slane %v10238_v56, 4  ;;  %v9857_v51 = vld [vmem:[#allocation13 + $0xa0] ss:$16 sps:$4 sm:$0xff]   ;;  %v9865_v26 = vld [vmem:[#allocation13 + $0xc4] ss:$16 sps:$4 sm:$0xff]  }
 0x4b7   :  { %v11400_v15 = vpop.eup %10241  ;;  %v5168_v63 = vsel %vm5096_vm2, %v5167_v50, %v5166_v34  ;;  %v5171_v43 = vrot.slane %v11397_v9, 3  ;;  %v9868_v50 = vld [vmem:[#allocation13 + $0xcc] ss:$16 sps:$4 sm:$0xff]   ;;  %v9866_v34 = vld [vmem:[#allocation13 + $0xc8] ss:$16 sps:$4 sm:$0xff]  }
 0x4b8   :  { %v11404_v4 = vpop.eup %10243  ;;  %v5170_v41 = vsel %vm5099_vm3, %v5169_v21, %v5168_v63  ;;  %v5173_v3 = vrot.slane %v11400_v15, 2  ;;  %v9869_v21 = vld [vmem:[#allocation13 + $0xe0] ss:$16 sps:$4 sm:$0xff]   ;;  %v9872_v63 = vld [vmem:[#allocation13 + $0xe8] ss:$16 sps:$4 sm:$0xff]  }
 0x4b9   :  { %v5172_v18 = vsel %vm5102_vm4, %v5171_v43, %v5170_v41  ;;  %v5175_v37 = vrot.slane %v11404_v4, 1  ;;  %v9874_v43 = vld [vmem:[#allocation13 + $0xec] ss:$16 sps:$4 sm:$0xff]   ;;  %v9877_v41 = vld [vmem:[#allocation13 + $0x104] ss:$16 sps:$4 sm:$0xff]  }
 0x4ba   :  { %v5174_v13 = vsel %vm5105_vm5, %v5173_v3, %v5172_v18  ;;  %v9878_v3 = vld [vmem:[#allocation13 + $0x108] ss:$16 sps:$4 sm:$0xff]   ;;  %v9880_v18 = vld [vmem:[#allocation13 + $0x10c] ss:$16 sps:$4 sm:$0xff]  }
 0x4bb   :  { %v5176_v44 = vsel %vm5108_vm6, %v5175_v37, %v5174_v13  ;;  %v9881_v37 = vld [vmem:[#allocation13 + $0x120] ss:$16 sps:$4 sm:$0xff]   ;;  %v9883_v13 = vld [vmem:[#allocation13 + $0x124] ss:$16 sps:$4 sm:$0xff]  }
 0x4bc   :  { %v5178_v12 = vsel %vm5111_vm7, %v5176_v44, 0.0  ;;  %v9884_v44 = vld [vmem:[#allocation13 + $0x128] ss:$16 sps:$4 sm:$0xff]  }
 0x4bd   :  { %5179 = vadd.xlane.f32.xlu1 %v5178_v12  ;;  %v9886_v12 = vld [vmem:[#allocation13 + $0x12c] ss:$16 sps:$4 sm:$0xff]  }
 0x54a   :  { %v5180_v60 = vpop.xlane.xlu1 %5179 }
 0x54b   :  { %10245 = vrcp.f32 %v5180_v60  ;;  %v9889_v60 = vld [vmem:[#allocation13 + $0x144] ss:$16 sps:$4 sm:$0xff]  }
 0x555   :  { %v11415_v14 = vpop.eup %10245 }
 0x556   :  { %v5198_v20 = vmul.f32 %v11415_v14, %v10230_v59  ;;  %v5183_v22 = vrot.slane %v11415_v14, 1  ;;  %v5184_v45 = vrot.slane %v11415_v14, 2  ;;  %v9856_v59 = vld [vmem:[#allocation13 + $0x8c] ss:$16 sps:$4 sm:$0xff]  }
 0x558   :  { %9177 = vmatmul.mubr.msk.f32.vlgmr.msra.gmra.mrb[44].mxu0 %vm5111_vm7, %v5198_v20  ;;  %9178 = vmatmul.mubr.msk.f32.vlgmr.msra.gmra.mrb[46].mxu1 %vm5111_vm7, %v5198_v20  ;;  %v5199_v55 = vmul.f32 %v10232_v1, %v5183_v22  ;;  %v9851_v1 = vld [vmem:[#allocation13 + $0x80] ss:$16 sps:$4 sm:$0xff]   ;;  %v9892_v20 = vld [vmem:[#allocation13 + $0x14c] ss:$16 sps:$4 sm:$0xff]  }
 0x559   :  { %5355 = vmatpush1.msra.mxu0 %v11308_v40  ;;  %5426 = vmatpush1.msra.mxu1 %v11312_v8  ;;  %v5200_v40 = vmul.f32 %v10234_v54, %v5184_v45  ;;  %v5185_v8 = vrot.slane %v11415_v14, 3  ;;  %v9854_v54 = vld [vmem:[#allocation13 + $0x88] ss:$16 sps:$4 sm:$0xff]   ;;  %v9893_v22 = vld [vmem:[#allocation13 + $0x160] ss:$16 sps:$4 sm:$0xff]  }
 0x55a   :  { %5499 = vmatprep.subr.mxu0 %v11323_v0  ;;  %5570 = vmatprep.subr.mxu1 %v11326_v30  ;;  %v5187_v30 = vrot.slane %v11415_v14, 5  ;;  %v9896_v45 = vld [vmem:[#allocation13 + $0x168] ss:$16 sps:$4 sm:$0xff]  }
 0x55b   :  { %5418 = vmatprep.mubr.f32.mxu0 %v10562_v53  ;;  %5489 = vmatprep.mubr.f32.mxu1 %v10562_v53 }
 0x55c   :  { %9179 = vmatmul.mubr.msk.f32.vlgmr.msra.gmra.mrb[46].mxu0 %vm5111_vm7, %v5199_v55  ;;  %9180 = vmatmul.mubr.msk.f32.vlgmr.msra.gmra.mrb[48].mxu1 %vm5111_vm7, %v5199_v55  ;;  %v9895_v55 = vld [vmem:[#allocation13 + $0x164] ss:$16 sps:$4 sm:$0xff]  }
 0x55d   :  { %5500 = vmatpush1.msra.mxu0 %v11317_v39  ;;  %5571 = vmatpush1.msra.mxu1 %v11320_v62  ;;  %v5201_v39 = vmul.f32 %v10236_v2, %v5185_v8  ;;  %v5186_v62 = vrot.slane %v11415_v14, 4  ;;  %v9862_v2 = vld [vmem:[#allocation13 + $0xac] ss:$16 sps:$4 sm:$0xff]   ;;  %v9899_v8 = vld [vmem:[#allocation13 + $0x180] ss:$16 sps:$4 sm:$0xff]  }
 0x55e   :  { %5644 = vmatprep.subr.mxu0 %v11335_v49  ;;  %5715 = vmatprep.subr.mxu1 %v11338_v27  ;;  %v5189_v27 = vrot.slane %v11415_v14, 7 }
 0x55f   :  { %5563 = vmatprep.mubr.f32.mxu0 %v10562_v53  ;;  %5634 = vmatprep.mubr.f32.mxu1 %v10562_v53  ;;  %v5202_v0 = vmul.f32 %v10238_v56, %v5186_v62  ;;  %v9860_v56 = vld [vmem:[#allocation13 + $0xa8] ss:$16 sps:$4 sm:$0xff]  }
 0x560   :  { %9181 = vmatmul.mubr.msk.f32.vlgmr.msra.gmra.mrb[48].mxu0 %vm5111_vm7, %v5200_v40  ;;  %9182 = vmatmul.mubr.msk.f32.vlgmr.msra.gmra.mrb[50].mxu1 %vm5111_vm7, %v5200_v40  ;;  %v9898_v40 = vld [vmem:[#allocation13 + $0x16c] ss:$16 sps:$4 sm:$0xff]   ;;  %v9902_v62 = vld [vmem:[#allocation13 + $0x188] ss:$16 sps:$4 sm:$0xff]  }
 0x561   :  { %5645 = vmatpush1.msra.mxu0 %v11329_v28  ;;  %5716 = vmatpush1.msra.mxu1 %v11332_v11  ;;  %v5203_v28 = vmul.f32 %v11397_v9, %v5187_v30  ;;  %v5188_v11 = vrot.slane %v11415_v14, 6  ;;  %v9863_v9 = vld [vmem:[#allocation13 + $0xc0] ss:$16 sps:$4 sm:$0xff]   ;;  %v9890_v14 = vld [vmem:[#allocation13 + $0x148] ss:$16 sps:$4 sm:$0xff]  }
 0x562   :  { %5789 = vmatprep.subr.mxu0 %v11347_v29  ;;  %5860 = vmatprep.subr.mxu1 %v11350_v31  ;;  %v9827_v29 = vld [vmem:[#allocation13] ss:$16 sps:$4 sm:$0xff]   ;;  %v9830_v31 = vld [vmem:[#allocation13 + $0x8] ss:$16 sps:$4 sm:$0xff]  }
 0x563   :  { %5708 = vmatprep.mubr.f32.mxu0 %v10562_v53  ;;  %5779 = vmatprep.mubr.f32.mxu1 %v10562_v53  ;;  %v5204_v49 = vmul.f32 %v11400_v15, %v5188_v11  ;;  %v9871_v15 = vld [vmem:[#allocation13 + $0xe4] ss:$16 sps:$4 sm:$0xff]   ;;  %v9905_v30 = vld [vmem:[#allocation13 + $0x1a0] ss:$16 sps:$4 sm:$0xff]   ;;  %v9908_v11 = vld [vmem:[#allocation13 + $0x1a8] ss:$16 sps:$4 sm:$0xff]  }
 0x564   :  { %9183 = vmatmul.mubr.msk.f32.vlgmr.msra.gmra.mrb[50].mxu0 %vm5111_vm7, %v5201_v39  ;;  %9184 = vmatmul.mubr.msk.f32.vlgmr.msra.gmra.mrb[52].mxu1 %vm5111_vm7, %v5201_v39  ;;  %v9901_v39 = vld [vmem:[#allocation13 + $0x184] ss:$16 sps:$4 sm:$0xff]  }
 0x565   :  { %5790 = vmatpush1.msra.mxu0 %v11341_v46  ;;  %5861 = vmatpush1.msra.mxu1 %v11344_v7  ;;  %v9829_v46 = vld [vmem:[#allocation13 + $0x4] ss:$16 sps:$4 sm:$0xff]   ;;  %v9832_v7 = vld [vmem:[#allocation13 + $0xc] ss:$16 sps:$4 sm:$0xff]  }
 0x566   :  { %5934 = vmatprep.subr.mxu0 %v11359_v47  ;;  %6005 = vmatprep.subr.mxu1 %v11362_v19  ;;  %v9838_v47 = vld [vmem:[#allocation13 + $0x2c] ss:$16 sps:$4 sm:$0xff]   ;;  %v9833_v19 = vld [vmem:[#allocation13 + $0x20] ss:$16 sps:$4 sm:$0xff]  }
 0x567   :  { %5853 = vmatprep.mubr.f32.mxu0 %v10562_v53  ;;  %5924 = vmatprep.mubr.f32.mxu1 %v10562_v53 }
 0x568   :  { %9185 = vmatmul.mubr.msk.f32.vlgmr.msra.gmra.mrb[52].mxu0 %vm5111_vm7, %v5202_v0  ;;  %9186 = vmatmul.mubr.msk.f32.vlgmr.msra.gmra.mrb[54].mxu1 %vm5111_vm7, %v5202_v0  ;;  %v9904_v0 = vld [vmem:[#allocation13 + $0x18c] ss:$16 sps:$4 sm:$0xff]  }
 0x569   :  { %5935 = vmatpush1.msra.mxu0 %v11353_v35  ;;  %6006 = vmatpush1.msra.mxu1 %v11356_v38  ;;  %v5205_v35 = vmul.f32 %v11404_v4, %v5189_v27  ;;  %v9835_v38 = vld [vmem:[#allocation13 + $0x24] ss:$16 sps:$4 sm:$0xff]   ;;  %v9875_v4 = vld [vmem:[#allocation13 + $0x100] ss:$16 sps:$4 sm:$0xff]  }
 0x56a   :  { %6079 = vmatprep.subr.mxu0 %v11371_v42  ;;  %6150 = vmatprep.subr.mxu1 %v11374_v5  ;;  %v9844_v42 = vld [vmem:[#allocation13 + $0x4c] ss:$16 sps:$4 sm:$0xff]   ;;  %v9839_v5 = vld [vmem:[#allocation13 + $0x40] ss:$16 sps:$4 sm:$0xff]  }
 0x56b   :  { %5998 = vmatprep.mubr.f32.mxu0 %v10562_v53  ;;  %6069 = vmatprep.mubr.f32.mxu1 %v10562_v53  ;;  %v9911_v27 = vld [vmem:[#allocation13 + $0x1c0] ss:$16 sps:$4 sm:$0xff]  }
 0x56c   :  { %9187 = vmatmul.mubr.msk.f32.vlgmr.msra.gmra.mrb[54].mxu0 %vm5111_vm7, %v5203_v28  ;;  %9188 = vmatmul.mubr.msk.f32.vlgmr.msra.gmra.mrb[56].mxu1 %vm5111_vm7, %v5203_v28  ;;  %v9907_v28 = vld [vmem:[#allocation13 + $0x1a4] ss:$16 sps:$4 sm:$0xff]  }
 0x56d   :  { %6080 = vmatpush1.msra.mxu0 %v11365_v33  ;;  %6151 = vmatpush1.msra.mxu1 %v11368_v36  ;;  %v9836_v33 = vld [vmem:[#allocation13 + $0x28] ss:$16 sps:$4 sm:$0xff]   ;;  %v9841_v36 = vld [vmem:[#allocation13 + $0x44] ss:$16 sps:$4 sm:$0xff]  }
 0x56e   :  { %6224 = vmatprep.subr.mxu0 %v11383_v17  ;;  %6295 = vmatprep.subr.mxu1 %v11386_v16  ;;  %v9850_v17 = vld [vmem:[#allocation13 + $0x6c] ss:$16 sps:$4 sm:$0xff]   ;;  %v9845_v16 = vld [vmem:[#allocation13 + $0x60] ss:$16 sps:$4 sm:$0xff]  }
 0x56f   :  { %6143 = vmatprep.mubr.f32.mxu0 %v10562_v53  ;;  %6214 = vmatprep.mubr.f32.mxu1 %v10562_v53 }
 0x570   :  { %9189 = vmatmul.mubr.msk.f32.vlgmr.msra.gmra.mrb[56].mxu0 %vm5111_vm7, %v5204_v49  ;;  %9190 = vmatmul.mubr.msk.f32.vlgmr.msra.gmra.mrb[58].mxu1 %vm5111_vm7, %v5204_v49  ;;  %v9910_v49 = vld [vmem:[#allocation13 + $0x1ac] ss:$16 sps:$4 sm:$0xff]  }
 0x571   :  { %6225 = vmatpush1.msra.mxu0 %v11377_v10  ;;  %6296 = vmatpush1.msra.mxu1 %v11380_v61  ;;  %v9842_v10 = vld [vmem:[#allocation13 + $0x48] ss:$16 sps:$4 sm:$0xff]   ;;  %v9847_v61 = vld [vmem:[#allocation13 + $0x64] ss:$16 sps:$4 sm:$0xff]  }
 0x572   :  { %6288 = vmatprep.mubr.f32.mxu0 %v10562_v53  ;;  %6359 = vmatprep.mubr.f32.mxu1 %v10562_v53  ;;  %v9887_v53 = vld [vmem:[#allocation13 + $0x140] ss:$16 sps:$4 sm:$0xff]  }
 0x573   :  { %7316 = vmatprep.subr.bf16.mxu0 %v9829_v46  ;;  %7398 = vmatprep.subr.bf16.mxu1 %v9832_v7  ;;  %v9913_v46 = vld [vmem:[#allocation13 + $0x1c4] ss:$16 sps:$4 sm:$0xff]   ;;  %v9914_v7 = vld [vmem:[#allocation13 + $0x1c8] ss:$16 sps:$4 sm:$0xff]  }
 0x574   :  { %9191 = vmatmul.mubr.msk.f32.vlgmr.msra.gmra.mrb[58].mxu0 %vm5111_vm7, %v5205_v35  ;;  %9192 = vmatmul.mubr.msk.f32.vlgmr.msra.gmra.mrb[60].mxu1 %vm5111_vm7, %v5205_v35  ;;  %v9922_v35 = vld [vmem:[#allocation13 + $0x1ec] ss:$16 sps:$4 sm:$0xff]  }
 0x575   :  { %7317 = vmatpush1.bf16.msra.mxu0 %v9827_v29  ;;  %7399 = vmatpush1.bf16.msra.mxu1 %v9830_v31  ;;  %v9916_v29 = vld [vmem:[#allocation13 + $0x1cc] ss:$16 sps:$4 sm:$0xff]   ;;  %v9919_v31 = vld [vmem:[#allocation13 + $0x1e4] ss:$16 sps:$4 sm:$0xff]  }
 0x576   :  { %7318 = vmatprep.subr.bf16.mxu0 %v9835_v38  ;;  %7400 = vmatprep.subr.bf16.mxu1 %v9838_v47  ;;  %v9917_v38 = vld [vmem:[#allocation13 + $0x1e0] ss:$16 sps:$4 sm:$0xff]   ;;  %v9920_v47 = vld [vmem:[#allocation13 + $0x1e8] ss:$16 sps:$4 sm:$0xff]  }
 0x579   :  { %7319 = vmatpush1.bf16.msra.mxu0 %v9833_v19  ;;  %7401 = vmatpush1.bf16.msra.mxu1 %v9836_v33  ;;  %v9925_v19 = vld [vmem:[#allocation13 + $0x204] ss:$16 sps:$4 sm:$0xff]   ;;  %v9928_v33 = vld [vmem:[#allocation13 + $0x20c] ss:$16 sps:$4 sm:$0xff]  }
 0x57a   :  { %7320 = vmatprep.subr.bf16.mxu0 %v9841_v36  ;;  %7402 = vmatprep.subr.bf16.mxu1 %v9844_v42 }
 0x57d   :  { %7321 = vmatpush1.bf16.msra.mxu0 %v9839_v5  ;;  %7403 = vmatpush1.bf16.msra.mxu1 %v9842_v10 }
 0x57e   :  { %7322 = vmatprep.subr.bf16.mxu0 %v9847_v61  ;;  %7404 = vmatprep.subr.bf16.mxu1 %v9850_v17 }
 0x581   :  { %7323 = vmatpush1.bf16.msra.mxu0 %v9845_v16  ;;  %7405 = vmatpush1.bf16.msra.mxu1 %v9848_v32 }
 0x582   :  { %7324 = vmatprep.subr.bf16.mxu0 %v9853_v48  ;;  %7406 = vmatprep.subr.bf16.mxu1 %v9856_v59 }
 0x585   :  { %7325 = vmatpush1.bf16.msra.mxu0 %v9851_v1  ;;  %7407 = vmatpush1.bf16.msra.mxu1 %v9854_v54 }
 0x586   :  { %7326 = vmatprep.subr.bf16.mxu0 %v9859_v52  ;;  %7408 = vmatprep.subr.bf16.mxu1 %v9862_v2 }
 0x589   :  { %7327 = vmatpush1.bf16.msra.mxu0 %v9857_v51  ;;  %7409 = vmatpush1.bf16.msra.mxu1 %v9860_v56 }
 0x58a   :  { %7328 = vmatprep.subr.bf16.mxu0 %v9865_v26  ;;  %7410 = vmatprep.subr.bf16.mxu1 %v9868_v50 }
 0x58d   :  { %7329 = vmatpush1.bf16.msra.mxu0 %v9863_v9  ;;  %7411 = vmatpush1.bf16.msra.mxu1 %v9866_v34 }
 0x58e   :  { %7330 = vmatprep.subr.bf16.mxu0 %v9871_v15  ;;  %7412 = vmatprep.subr.bf16.mxu1 %v9874_v43 }
 0x591   :  { %7331 = vmatpush1.bf16.msra.mxu0 %v9869_v21  ;;  %7413 = vmatpush1.bf16.msra.mxu1 %v9872_v63 }
 0x592   :  { %7332 = vmatprep.subr.bf16.mxu0 %v9877_v41  ;;  %7414 = vmatprep.subr.bf16.mxu1 %v9880_v18 }
 0x595   :  { %7333 = vmatpush1.bf16.msra.mxu0 %v9875_v4  ;;  %7415 = vmatpush1.bf16.msra.mxu1 %v9878_v3 }
 0x596   :  { %7334 = vmatprep.subr.bf16.mxu0 %v9883_v13  ;;  %7416 = vmatprep.subr.bf16.mxu1 %v9886_v12 }
 0x599   :  { %7335 = vmatpush1.bf16.msra.mxu0 %v9881_v37  ;;  %7417 = vmatpush1.bf16.msra.mxu1 %v9884_v44 }
 0x59a   :  { %7336 = vmatprep.subr.bf16.mxu0 %v9889_v60  ;;  %7418 = vmatprep.subr.bf16.mxu1 %v9892_v20 }
 0x59d   :  { %7337 = vmatpush1.bf16.msra.mxu0 %v9887_v53  ;;  %7419 = vmatpush1.bf16.msra.mxu1 %v9890_v14 }
 0x59e   :  { %7338 = vmatprep.subr.bf16.mxu0 %v9895_v55  ;;  %7420 = vmatprep.subr.bf16.mxu1 %v9898_v40 }
 0x5a1   :  { %7339 = vmatpush1.bf16.msra.mxu0 %v9893_v22  ;;  %7421 = vmatpush1.bf16.msra.mxu1 %v9896_v45 }
 0x5a2   :  { %7340 = vmatprep.subr.bf16.mxu0 %v9901_v39  ;;  %7422 = vmatprep.subr.bf16.mxu1 %v9904_v0 }
 0x5a5   :  { %7341 = vmatpush1.bf16.msra.mxu0 %v9899_v8  ;;  %7423 = vmatpush1.bf16.msra.mxu1 %v9902_v62 }
 0x5a6   :  { %7342 = vmatprep.subr.bf16.mxu0 %v9907_v28  ;;  %7424 = vmatprep.subr.bf16.mxu1 %v9910_v49 }
 0x5a9   :  { %7343 = vmatpush1.bf16.msra.mxu0 %v9905_v30  ;;  %7425 = vmatpush1.bf16.msra.mxu1 %v9908_v11 }
 0x5aa   :  { %7344 = vmatprep.subr.bf16.mxu0 %v9913_v46  ;;  %7426 = vmatprep.subr.bf16.mxu1 %v9916_v29 }
 0x5ad   :  { %7345 = vmatpush1.bf16.msra.mxu0 %v9911_v27  ;;  %7427 = vmatpush1.bf16.msra.mxu1 %v9914_v7 }
 0x5ae   :  { %7346 = vmatprep.subr.bf16.mxu0 %v9919_v31  ;;  %7428 = vmatprep.subr.bf16.mxu1 %v9922_v35 }
 0x5b1   :  { %7347 = vmatpush1.bf16.msra.mxu0 %v9917_v38  ;;  %7429 = vmatpush1.bf16.msra.mxu1 %v9920_v47 }
 0x5b2   :  { %7357 = vmatprep.subr.bf16.mxu0 %v9925_v19  ;;  %7439 = vmatprep.subr.bf16.mxu1 %v9928_v33 }
 0x62b   :  { %v5275_v36 = vpop.f32.mrb[44].mxu0  ;;  %v5346_v42 = vpop.f32.mrb[46].mxu1 }
 0x62c   :  { %v5277_v5 = vpop.f32.mrb[45].mxu0  ;;  %v5348_v10 = vpop.f32.mrb[47].mxu1  ;;  %v6366_v61 = vpack.c.bf16 %v5275_v36, %v5275_v36  ;;  %v6368_v17 = vpack.c.bf16 %v5346_v42, %v5346_v42 }
 0x62d   :  { %v6367_v16 = vpack.c.bf16 %v5277_v5, %v5277_v5  ;;  %v6369_v32 = vpack.c.bf16 %v5348_v10, %v5348_v10 }
 0x62e   :  { %v6580_v26 = vunpack.c.l.b16 %v6366_v61  ;;  %v6582_v50 = vunpack.c.l.b16 %v6368_v17 }
 0x62f   :  { %v5420_v48 = vpop.f32.mrb[46].mxu0  ;;  %v5491_v59 = vpop.f32.mrb[48].mxu1  ;;  %v6581_v21 = vunpack.c.l.b16 %v6367_v16  ;;  %v6583_v15 = vunpack.c.l.b16 %v6369_v32 }
 0x630   :  { %v6370_v1 = vpack.c.bf16 %v5420_v48, %v5420_v48  ;;  %v6372_v54 = vpack.c.bf16 %v5491_v59, %v5491_v59  ;;  %v5422_v52 = vpop.f32.mrb[47].mxu0  ;;  %v5493_v2 = vpop.f32.mrb[49].mxu1 }
 0x631   :  { %v6371_v51 = vpack.c.bf16 %v5422_v52, %v5422_v52  ;;  %v6373_v56 = vpack.c.bf16 %v5493_v2, %v5493_v2 }
 0x632   :  { %v6584_v9 = vunpack.c.l.b16 %v6370_v1  ;;  %v6586_v34 = vunpack.c.l.b16 %v6372_v54 }
 0x633   :  { %v6585_v63 = vunpack.c.l.b16 %v6371_v51  ;;  %v6587_v43 = vunpack.c.l.b16 %v6373_v56  ;;  %v5565_v4 = vpop.f32.mrb[48].mxu0  ;;  %v5636_v41 = vpop.f32.mrb[50].mxu1 }
 0x634   :  { %v6612_v3 = vrot.slane %v6584_v9, 7  ;;  %v6640_v18 = vrot.slane %v6586_v34, 7  ;;  %v6374_v37 = vpack.c.bf16 %v5565_v4, %v5565_v4  ;;  %v6376_v13 = vpack.c.bf16 %v5636_v41, %v5636_v41  ;;  %v5567_v44 = vpop.f32.mrb[49].mxu0  ;;  %v5638_v12 = vpop.f32.mrb[51].mxu1 }
 0x635   :  { %v6626_v53 = vrot.slane %v6585_v63, 7  ;;  %v6654_v60 = vrot.slane %v6587_v43, 7  ;;  %v6375_v14 = vpack.c.bf16 %v5567_v44, %v5567_v44  ;;  %v6377_v20 = vpack.c.bf16 %v5638_v12, %v5638_v12 }
 0x636   :  { %v6613_v22 = vsel %vm5090_vm0, %v6612_v3, %v6580_v26  ;;  %v6641_v55 = vsel %vm5090_vm0, %v6640_v18, %v6582_v50  ;;  %v6588_v45 = vunpack.c.l.b16 %v6374_v37  ;;  %v6590_v40 = vunpack.c.l.b16 %v6376_v13 }
 0x637   :  { %v6627_v8 = vsel %vm5090_vm0, %v6626_v53, %v6581_v21  ;;  %v6655_v39 = vsel %vm5090_vm0, %v6654_v60, %v6583_v15  ;;  %v6589_v62 = vunpack.c.l.b16 %v6375_v14  ;;  %v6591_v0 = vunpack.c.l.b16 %v6377_v20  ;;  %v5710_v30 = vpop.f32.mrb[50].mxu0  ;;  %v5781_v28 = vpop.f32.mrb[52].mxu1 }
 0x638   :  { %v6614_v11 = vrot.slane %v6588_v45, 6  ;;  %v6642_v49 = vrot.slane %v6590_v40, 6  ;;  %v6378_v27 = vpack.c.bf16 %v5710_v30, %v5710_v30  ;;  %v6380_v46 = vpack.c.bf16 %v5781_v28, %v5781_v28  ;;  %v5712_v7 = vpop.f32.mrb[51].mxu0  ;;  %v5783_v29 = vpop.f32.mrb[53].mxu1 }
 0x639   :  { %v6628_v31 = vrot.slane %v6589_v62, 6  ;;  %v6656_v35 = vrot.slane %v6591_v0, 6  ;;  %v6379_v38 = vpack.c.bf16 %v5712_v7, %v5712_v7  ;;  %v6381_v47 = vpack.c.bf16 %v5783_v29, %v5783_v29 }
 0x63a   :  { %v6615_v19 = vsel %vm5093_vm1, %v6614_v11, %v6613_v22  ;;  %v6643_v33 = vsel %vm5093_vm1, %v6642_v49, %v6641_v55  ;;  %v6592_v36 = vunpack.c.l.b16 %v6378_v27  ;;  %v6594_v42 = vunpack.c.l.b16 %v6380_v46 }
 0x63b   :  { %v6629_v5 = vsel %vm5093_vm1, %v6628_v31, %v6627_v8  ;;  %v6657_v10 = vsel %vm5093_vm1, %v6656_v35, %v6655_v39  ;;  %v6593_v61 = vunpack.c.l.b16 %v6379_v38  ;;  %v6595_v17 = vunpack.c.l.b16 %v6381_v47  ;;  %v5855_v16 = vpop.f32.mrb[52].mxu0  ;;  %v5926_v32 = vpop.f32.mrb[54].mxu1 }
 0x63c   :  { %v6616_v48 = vrot.slane %v6592_v36, 5  ;;  %v6644_v59 = vrot.slane %v6594_v42, 5  ;;  %v6382_v1 = vpack.c.bf16 %v5855_v16, %v5855_v16  ;;  %v6384_v54 = vpack.c.bf16 %v5926_v32, %v5926_v32  ;;  %v5857_v52 = vpop.f32.mrb[53].mxu0  ;;  %v5928_v2 = vpop.f32.mrb[55].mxu1 }
 0x63d   :  { %v6630_v51 = vrot.slane %v6593_v61, 5  ;;  %v6658_v56 = vrot.slane %v6595_v17, 5  ;;  %v6383_v26 = vpack.c.bf16 %v5857_v52, %v5857_v52  ;;  %v6385_v50 = vpack.c.bf16 %v5928_v2, %v5928_v2 }
 0x63e   :  { %v6617_v9 = vsel %vm5096_vm2, %v6616_v48, %v6615_v19  ;;  %v6645_v34 = vsel %vm5096_vm2, %v6644_v59, %v6643_v33  ;;  %v6596_v21 = vunpack.c.l.b16 %v6382_v1  ;;  %v6598_v15 = vunpack.c.l.b16 %v6384_v54 }
 0x63f   :  { %v6631_v63 = vsel %vm5096_vm2, %v6630_v51, %v6629_v5  ;;  %v6659_v43 = vsel %vm5096_vm2, %v6658_v56, %v6657_v10  ;;  %v6597_v4 = vunpack.c.l.b16 %v6383_v26  ;;  %v6599_v41 = vunpack.c.l.b16 %v6385_v50  ;;  %v6000_v3 = vpop.f32.mrb[54].mxu0  ;;  %v6071_v18 = vpop.f32.mrb[56].mxu1 }
 0x640   :  { %v6618_v37 = vrot.slane %v6596_v21, 4  ;;  %v6646_v13 = vrot.slane %v6598_v15, 4  ;;  %v6386_v44 = vpack.c.bf16 %v6000_v3, %v6000_v3  ;;  %v6388_v12 = vpack.c.bf16 %v6071_v18, %v6071_v18  ;;  %v6002_v53 = vpop.f32.mrb[55].mxu0  ;;  %v6073_v60 = vpop.f32.mrb[57].mxu1 }
 0x641   :  { %v6632_v14 = vrot.slane %v6597_v4, 4  ;;  %v6660_v20 = vrot.slane %v6599_v41, 4  ;;  %v6387_v22 = vpack.c.bf16 %v6002_v53, %v6002_v53  ;;  %v6389_v55 = vpack.c.bf16 %v6073_v60, %v6073_v60 }
 0x642   :  { %v6619_v45 = vsel %vm5099_vm3, %v6618_v37, %v6617_v9  ;;  %v6647_v40 = vsel %vm5099_vm3, %v6646_v13, %v6645_v34  ;;  %v6600_v8 = vunpack.c.l.b16 %v6386_v44  ;;  %v6602_v39 = vunpack.c.l.b16 %v6388_v12 }
 0x643   :  { %v6633_v62 = vsel %vm5099_vm3, %v6632_v14, %v6631_v63  ;;  %v6661_v0 = vsel %vm5099_vm3, %v6660_v20, %v6659_v43  ;;  %v6601_v30 = vunpack.c.l.b16 %v6387_v22  ;;  %v6603_v28 = vunpack.c.l.b16 %v6389_v55  ;;  %v6145_v11 = vpop.f32.mrb[56].mxu0  ;;  %v6216_v49 = vpop.f32.mrb[58].mxu1  ;;  %v9923_v55 = vld [vmem:[#allocation13 + $0x200] ss:$16 sps:$4 sm:$0xff]  }
 0x644   :  { %v6620_v27 = vrot.slane %v6600_v8, 3  ;;  %v6648_v46 = vrot.slane %v6602_v39, 3  ;;  %v6390_v7 = vpack.c.bf16 %v6145_v11, %v6145_v11  ;;  %v6392_v29 = vpack.c.bf16 %v6216_v49, %v6216_v49  ;;  %v6147_v31 = vpop.f32.mrb[57].mxu0  ;;  %v6218_v35 = vpop.f32.mrb[59].mxu1  ;;  %v9931_v8 = vld [vmem:[#allocation13 + $0x224] ss:$16 sps:$4 sm:$0xff]  }
 0x645   :  { %v6634_v38 = vrot.slane %v6601_v30, 3  ;;  %v6662_v47 = vrot.slane %v6603_v28, 3  ;;  %v6391_v19 = vpack.c.bf16 %v6147_v31, %v6147_v31  ;;  %v6393_v33 = vpack.c.bf16 %v6218_v35, %v6218_v35  ;;  %v9934_v39 = vld [vmem:[#allocation13 + $0x22c] ss:$16 sps:$4 sm:$0xff]   ;;  %v9932_v30 = vld [vmem:[#allocation13 + $0x228] ss:$16 sps:$4 sm:$0xff]  }
 0x646   :  { %v6621_v36 = vsel %vm5102_vm4, %v6620_v27, %v6619_v45  ;;  %v6649_v42 = vsel %vm5102_vm4, %v6648_v46, %v6647_v40  ;;  %v6604_v5 = vunpack.c.l.b16 %v6390_v7  ;;  %v6606_v10 = vunpack.c.l.b16 %v6392_v29  ;;  %v9926_v45 = vld [vmem:[#allocation13 + $0x208] ss:$16 sps:$4 sm:$0xff]   ;;  %v9937_v28 = vld [vmem:[#allocation13 + $0x244] ss:$16 sps:$4 sm:$0xff]   ;;  %v9940_v11 = vld [vmem:[#allocation13 + $0x24c] ss:$16 sps:$4 sm:$0xff]  }
 0x647   :  { %v6635_v61 = vsel %vm5102_vm4, %v6634_v38, %v6633_v62  ;;  %v6663_v17 = vsel %vm5102_vm4, %v6662_v47, %v6661_v0  ;;  %v6605_v16 = vunpack.c.l.b16 %v6391_v19  ;;  %v6607_v32 = vunpack.c.l.b16 %v6393_v33  ;;  %v6290_v48 = vpop.f32.mrb[58].mxu0  ;;  %v6361_v59 = vpop.f32.mrb[60].mxu1  ;;  %v9929_v0 = vld [vmem:[#allocation13 + $0x220] ss:$16 sps:$4 sm:$0xff]   ;;  %v9938_v27 = vld [vmem:[#allocation13 + $0x248] ss:$16 sps:$4 sm:$0xff]  }
 0x648   :  { %v6622_v1 = vrot.slane %v6604_v5, 2  ;;  %v6650_v54 = vrot.slane %v6606_v10, 2  ;;  %v6394_v52 = vpack.c.bf16 %v6290_v48, %v6290_v48  ;;  %v6396_v2 = vpack.c.bf16 %v6361_v59, %v6361_v59  ;;  %v6292_v51 = vpop.f32.mrb[59].mxu0  ;;  %v6363_v56 = vpop.f32.mrb[61].mxu1  ;;  %v9935_v49 = vld [vmem:[#allocation13 + $0x240] ss:$16 sps:$4 sm:$0xff]  }
 0x649   :  { %v6636_v26 = vrot.slane %v6605_v16, 2  ;;  %v6664_v50 = vrot.slane %v6607_v32, 2  ;;  %v6395_v9 = vpack.c.bf16 %v6292_v51, %v6292_v51  ;;  %v6397_v34 = vpack.c.bf16 %v6363_v56, %v6363_v56  ;;  %v9943_v46 = vld [vmem:[#allocation13 + $0x264] ss:$16 sps:$4 sm:$0xff]   ;;  %v9946_v7 = vld [vmem:[#allocation13 + $0x26c] ss:$16 sps:$4 sm:$0xff]  }
 0x64a   :  { %v6623_v21 = vsel %vm5105_vm5, %v6622_v1, %v6621_v36  ;;  %v6651_v15 = vsel %vm5105_vm5, %v6650_v54, %v6649_v42  ;;  %v6608_v63 = vunpack.c.l.b16 %v6394_v52  ;;  %v6610_v43 = vunpack.c.l.b16 %v6396_v2  ;;  %v9941_v29 = vld [vmem:[#allocation13 + $0x260] ss:$16 sps:$4 sm:$0xff]   ;;  %v9944_v31 = vld [vmem:[#allocation13 + $0x268] ss:$16 sps:$4 sm:$0xff]   ;;  %v9949_v35 = vld [vmem:[#allocation13 + $0x284] ss:$16 sps:$4 sm:$0xff]  }
 0x64b   :  { %v6637_v4 = vsel %vm5105_vm5, %v6636_v26, %v6635_v61  ;;  %v6665_v41 = vsel %vm5105_vm5, %v6664_v50, %v6663_v17  ;;  %v6609_v3 = vunpack.c.l.b16 %v6395_v9  ;;  %v6611_v18 = vunpack.c.l.b16 %v6397_v34  ;;  %v9952_v38 = vld [vmem:[#allocation13 + $0x28c] ss:$16 sps:$4 sm:$0xff]   ;;  %v9947_v47 = vld [vmem:[#allocation13 + $0x280] ss:$16 sps:$4 sm:$0xff]   ;;  %v9950_v19 = vld [vmem:[#allocation13 + $0x288] ss:$16 sps:$4 sm:$0xff]  }
 0x64c   :  { %v6624_v37 = vrot.slane %v6608_v63, 1  ;;  %v6652_v13 = vrot.slane %v6610_v43, 1  ;;  %v9955_v33 = vld [vmem:[#allocation13 + $0x2a4] ss:$16 sps:$4 sm:$0xff]   ;;  %v9958_v36 = vld [vmem:[#allocation13 + $0x2ac] ss:$16 sps:$4 sm:$0xff]  }
 0x64d   :  { %v6638_v44 = vrot.slane %v6609_v3, 1  ;;  %v6666_v12 = vrot.slane %v6611_v18, 1  ;;  %v9953_v42 = vld [vmem:[#allocation13 + $0x2a0] ss:$16 sps:$4 sm:$0xff]   ;;  %v9956_v5 = vld [vmem:[#allocation13 + $0x2a8] ss:$16 sps:$4 sm:$0xff]  }
 0x64e   :  { %v6625_v53 = vsel %vm5108_vm6, %v6624_v37, %v6623_v21  ;;  %v11510_v60 = vsel %vm5108_vm6, %v6652_v13, %v6651_v15  ;;  %v9961_v10 = vld [vmem:[#allocation13 + $0x2c4] ss:$16 sps:$4 sm:$0xff]   ;;  %v9964_v61 = vld [vmem:[#allocation13 + $0x2cc] ss:$16 sps:$4 sm:$0xff]   ;;  %v9959_v17 = vld [vmem:[#allocation13 + $0x2c0] ss:$16 sps:$4 sm:$0xff]  }
 0x64f   :  { %v6639_v14 = vsel %vm5108_vm6, %v6638_v44, %v6637_v4  ;;  %v6667_v20 = vsel %vm5108_vm6, %v6666_v12, %v6665_v41  ;;  %v6668_v40 = vpack.c.b16 %v6625_v53, %v6625_v53  ;;  %v9962_v16 = vld [vmem:[#allocation13 + $0x2c8] ss:$16 sps:$4 sm:$0xff]   ;;  %v9967_v32 = vld [vmem:[#allocation13 + $0x2e4] ss:$16 sps:$4 sm:$0xff]   ;;  %v9970_v48 = vld [vmem:[#allocation13 + $0x2ec] ss:$16 sps:$4 sm:$0xff]  }
 0x650   :  { %v6669_v22 = vpack.c.b16 %v6639_v14, %v6639_v14  ;;  %v6671_v62 = vpack.c.b16 %v6667_v20, %v6667_v20  ;;  %v9965_v59 = vld [vmem:[#allocation13 + $0x2e0] ss:$16 sps:$4 sm:$0xff]   ;;  %v9968_v1 = vld [vmem:[#allocation13 + $0x2e8] ss:$16 sps:$4 sm:$0xff]   ;;  %v9973_v54 = vld [vmem:[#allocation13 + $0x304] ss:$16 sps:$4 sm:$0xff]  }
 0x651   :  { %v9976_v52 = vld [vmem:[#allocation13 + $0x30c] ss:$16 sps:$4 sm:$0xff]   ;;  %v9971_v2 = vld [vmem:[#allocation13 + $0x300] ss:$16 sps:$4 sm:$0xff]   ;;  %v9974_v51 = vld [vmem:[#allocation13 + $0x308] ss:$16 sps:$4 sm:$0xff]  }
 0x652   :  { %7348 = vmatprep.mubr.bf16.mxu0 %v6669_v22  ;;  %7430 = vmatprep.mubr.bf16.mxu1 %v6669_v22  ;;  %v9979_v56 = vld [vmem:[#allocation13 + $0x324] ss:$16 sps:$4 sm:$0xff]   ;;  %v9982_v26 = vld [vmem:[#allocation13 + $0x32c] ss:$16 sps:$4 sm:$0xff]   ;;  %v9977_v50 = vld [vmem:[#allocation13 + $0x320] ss:$16 sps:$4 sm:$0xff]  }
 0x653   :  { %7349 = vmatmul.mubr.bf16.vlgmr.msra.gmra.mrb[60].mxu0 %v6668_v40  ;;  %7431 = vmatmul.mubr.bf16.vlgmr.msra.gmra.mrb[64].mxu1 %v6668_v40  ;;  %v9980_v9 = vld [vmem:[#allocation13 + $0x328] ss:$16 sps:$4 sm:$0xff]   ;;  %v9985_v34 = vld [vmem:[#allocation13 + $0x344] ss:$16 sps:$4 sm:$0xff]   ;;  %v9988_v21 = vld [vmem:[#allocation13 + $0x34c] ss:$16 sps:$4 sm:$0xff]  }
 0x654   :  { %7358 = vmatpush1.bf16.msra.mxu0 %v9923_v55  ;;  %7440 = vmatpush1.bf16.msra.mxu1 %v9926_v45  ;;  %v9983_v15 = vld [vmem:[#allocation13 + $0x340] ss:$16 sps:$4 sm:$0xff]   ;;  %v9986_v63 = vld [vmem:[#allocation13 + $0x348] ss:$16 sps:$4 sm:$0xff]   ;;  %v9991_v43 = vld [vmem:[#allocation13 + $0x364] ss:$16 sps:$4 sm:$0xff]  }
 0x655   :  { %7389 = vmatprep.mubr.bf16.mxu0 %v6671_v62  ;;  %7471 = vmatprep.mubr.bf16.mxu1 %v6671_v62  ;;  %v9994_v4 = vld [vmem:[#allocation13 + $0x36c] ss:$16 sps:$4 sm:$0xff]   ;;  %v9989_v41 = vld [vmem:[#allocation13 + $0x360] ss:$16 sps:$4 sm:$0xff]   ;;  %v9992_v3 = vld [vmem:[#allocation13 + $0x368] ss:$16 sps:$4 sm:$0xff]  }
 0x656   :  { %7359 = vmatprep.subr.bf16.mxu0 %v9931_v8  ;;  %7441 = vmatprep.subr.bf16.mxu1 %v9934_v39  ;;  %v9997_v18 = vld [vmem:[#allocation13 + $0x384] ss:$16 sps:$4 sm:$0xff]   ;;  %v10000_v37 = vld [vmem:[#allocation13 + $0x38c] ss:$16 sps:$4 sm:$0xff]   ;;  %v9995_v13 = vld [vmem:[#allocation13 + $0x380] ss:$16 sps:$4 sm:$0xff]  }
 0x657   :  { %v9998_v44 = vld [vmem:[#allocation13 + $0x388] ss:$16 sps:$4 sm:$0xff]   ;;  %v10003_v12 = vld [vmem:[#allocation13 + $0x3a4] ss:$16 sps:$4 sm:$0xff]   ;;  %v10006_v53 = vld [vmem:[#allocation13 + $0x3ac] ss:$16 sps:$4 sm:$0xff]  }
 0x658   :  { %7360 = vmatpush1.bf16.msra.mxu0 %v9929_v0  ;;  %7442 = vmatpush1.bf16.msra.mxu1 %v9932_v30  ;;  %v10001_v14 = vld [vmem:[#allocation13 + $0x3a0] ss:$16 sps:$4 sm:$0xff]   ;;  %v10004_v20 = vld [vmem:[#allocation13 + $0x3a8] ss:$16 sps:$4 sm:$0xff]   ;;  %v10009_v22 = vld [vmem:[#allocation13 + $0x3c4] ss:$16 sps:$4 sm:$0xff]   ;;  %v6670_v30 = vpack.c.b16 %v11510_v60, %v11510_v60 }
 0x659   :  { %7361 = vmatprep.subr.bf16.mxu0 %v9937_v28  ;;  %7443 = vmatprep.subr.bf16.mxu1 %v9940_v11  ;;  %v10012_v55 = vld [vmem:[#allocation13 + $0x3cc] ss:$16 sps:$4 sm:$0xff]   ;;  %v10007_v45 = vld [vmem:[#allocation13 + $0x3c0] ss:$16 sps:$4 sm:$0xff]   ;;  %v10010_v40 = vld [vmem:[#allocation13 + $0x3c8] ss:$16 sps:$4 sm:$0xff]  }
 0x65a   :  { %v10015_v8 = vld [vmem:[#allocation13 + $0x3e4] ss:$16 sps:$4 sm:$0xff]   ;;  %v10018_v39 = vld [vmem:[#allocation13 + $0x3ec] ss:$16 sps:$4 sm:$0xff]   ;;  %v10013_v62 = vld [vmem:[#allocation13 + $0x3e0] ss:$16 sps:$4 sm:$0xff]  }
 0x65b   :  { %v10016_v0 = vld [vmem:[#allocation13 + $0x3e8] ss:$16 sps:$4 sm:$0xff]   ;;  %v10019_v28 = vld [vmem:[#allocation16] ss:$16 sps:$4 sm:$0xff]  }
 0x65c   :  { %7362 = vmatpush1.bf16.msra.mxu0 %v9935_v49  ;;  %7444 = vmatpush1.bf16.msra.mxu1 %v9938_v27  ;;  %v10021_v11 = vld [vmem:[#allocation16 + $0x4] ss:$16 sps:$4 sm:$0xff]   ;;  %v10022_v49 = vld [vmem:[#allocation16 + $0x200] ss:$16 sps:$4 sm:$0xff]  }
 0x65d   :  { %7363 = vmatprep.subr.bf16.mxu0 %v9943_v46  ;;  %7445 = vmatprep.subr.bf16.mxu1 %v9946_v7  ;;  %v10024_v27 = vld [vmem:[#allocation16 + $0x204] ss:$16 sps:$4 sm:$0xff]   ;;  %v10031_v60 = vld [vmem:[#allocation16 + $0x40] ss:$16 sps:$4 sm:$0xff]  }
 0x65e   :  { %v10027_v46 = vld [vmem:[#allocation16 + $0x24] ss:$16 sps:$4 sm:$0xff]  }
 0x65f   :  { %v10030_v7 = vld [vmem:[#allocation16 + $0x224] ss:$16 sps:$4 sm:$0xff]  }
 0x660   :  { %7364 = vmatpush1.bf16.msra.mxu0 %v9941_v29  ;;  %7446 = vmatpush1.bf16.msra.mxu1 %v9944_v31  ;;  %v10025_v29 = vld [vmem:[#allocation16 + $0x20] ss:$16 sps:$4 sm:$0xff]  }
 0x661   :  { %7365 = vmatprep.subr.bf16.mxu0 %v9949_v35  ;;  %7447 = vmatprep.subr.bf16.mxu1 %v9952_v38  ;;  %v10028_v31 = vld [vmem:[#allocation16 + $0x220] ss:$16 sps:$4 sm:$0xff]   ;;  %v10033_v35 = vld [vmem:[#allocation16 + $0x44] ss:$16 sps:$4 sm:$0xff]  }
 0x662   :  { %v10036_v38 = vld [vmem:[#allocation16 + $0x244] ss:$16 sps:$4 sm:$0xff]  }
 0x664   :  { %7366 = vmatpush1.bf16.msra.mxu0 %v9947_v47  ;;  %7448 = vmatpush1.bf16.msra.mxu1 %v9950_v19  ;;  %v10034_v47 = vld [vmem:[#allocation16 + $0x240] ss:$16 sps:$4 sm:$0xff]   ;;  %v10039_v19 = vld [vmem:[#allocation16 + $0x64] ss:$16 sps:$4 sm:$0xff]  }
 0x665   :  { %7367 = vmatprep.subr.bf16.mxu0 %v9955_v33  ;;  %7449 = vmatprep.subr.bf16.mxu1 %v9958_v36  ;;  %v10042_v33 = vld [vmem:[#allocation16 + $0x264] ss:$16 sps:$4 sm:$0xff]   ;;  %v10037_v36 = vld [vmem:[#allocation16 + $0x60] ss:$16 sps:$4 sm:$0xff]  }
 0x668   :  { %7368 = vmatpush1.bf16.msra.mxu0 %v9953_v42  ;;  %7450 = vmatpush1.bf16.msra.mxu1 %v9956_v5  ;;  %v10040_v42 = vld [vmem:[#allocation16 + $0x260] ss:$16 sps:$4 sm:$0xff]   ;;  %v10045_v5 = vld [vmem:[#allocation16 + $0x84] ss:$16 sps:$4 sm:$0xff]  }
 0x669   :  { %7369 = vmatprep.subr.bf16.mxu0 %v9961_v10  ;;  %7451 = vmatprep.subr.bf16.mxu1 %v9964_v61  ;;  %v10048_v10 = vld [vmem:[#allocation16 + $0x284] ss:$16 sps:$4 sm:$0xff]   ;;  %v10043_v61 = vld [vmem:[#allocation16 + $0x80] ss:$16 sps:$4 sm:$0xff]  }
 0x66c   :  { %7370 = vmatpush1.bf16.msra.mxu0 %v9959_v17  ;;  %7452 = vmatpush1.bf16.msra.mxu1 %v9962_v16  ;;  %v10046_v17 = vld [vmem:[#allocation16 + $0x280] ss:$16 sps:$4 sm:$0xff]   ;;  %v10051_v16 = vld [vmem:[#allocation16 + $0xa4] ss:$16 sps:$4 sm:$0xff]  }
 0x66d   :  { %7371 = vmatprep.subr.bf16.mxu0 %v9967_v32  ;;  %7453 = vmatprep.subr.bf16.mxu1 %v9970_v48  ;;  %v10054_v32 = vld [vmem:[#allocation16 + $0x2a4] ss:$16 sps:$4 sm:$0xff]   ;;  %v10049_v48 = vld [vmem:[#allocation16 + $0xa0] ss:$16 sps:$4 sm:$0xff]  }
 0x670   :  { %7372 = vmatpush1.bf16.msra.mxu0 %v9965_v59  ;;  %7454 = vmatpush1.bf16.msra.mxu1 %v9968_v1  ;;  %v10052_v59 = vld [vmem:[#allocation16 + $0x2a0] ss:$16 sps:$4 sm:$0xff]   ;;  %v10057_v1 = vld [vmem:[#allocation16 + $0xc4] ss:$16 sps:$4 sm:$0xff]  }
 0x671   :  { %7373 = vmatprep.subr.bf16.mxu0 %v9973_v54  ;;  %7455 = vmatprep.subr.bf16.mxu1 %v9976_v52  ;;  %v10060_v54 = vld [vmem:[#allocation16 + $0x2c4] ss:$16 sps:$4 sm:$0xff]   ;;  %v10055_v52 = vld [vmem:[#allocation16 + $0xc0] ss:$16 sps:$4 sm:$0xff]  }
 0x674   :  { %7374 = vmatpush1.bf16.msra.mxu0 %v9971_v2  ;;  %7456 = vmatpush1.bf16.msra.mxu1 %v9974_v51  ;;  %v10058_v2 = vld [vmem:[#allocation16 + $0x2c0] ss:$16 sps:$4 sm:$0xff]   ;;  %v10063_v51 = vld [vmem:[#allocation16 + $0xe4] ss:$16 sps:$4 sm:$0xff]  }
 0x675   :  { %7375 = vmatprep.subr.bf16.mxu0 %v9979_v56  ;;  %7457 = vmatprep.subr.bf16.mxu1 %v9982_v26  ;;  %v10066_v56 = vld [vmem:[#allocation16 + $0x2e4] ss:$16 sps:$4 sm:$0xff]   ;;  %v10061_v26 = vld [vmem:[#allocation16 + $0xe0] ss:$16 sps:$4 sm:$0xff]  }
 0x678   :  { %7376 = vmatpush1.bf16.msra.mxu0 %v9977_v50  ;;  %7458 = vmatpush1.bf16.msra.mxu1 %v9980_v9  ;;  %v10064_v50 = vld [vmem:[#allocation16 + $0x2e0] ss:$16 sps:$4 sm:$0xff]   ;;  %v10069_v9 = vld [vmem:[#allocation16 + $0x104] ss:$16 sps:$4 sm:$0xff]  }
 0x679   :  { %7377 = vmatprep.subr.bf16.mxu0 %v9985_v34  ;;  %7459 = vmatprep.subr.bf16.mxu1 %v9988_v21  ;;  %v10072_v34 = vld [vmem:[#allocation16 + $0x304] ss:$16 sps:$4 sm:$0xff]   ;;  %v10067_v21 = vld [vmem:[#allocation16 + $0x100] ss:$16 sps:$4 sm:$0xff]  }
 0x67c   :  { %7378 = vmatpush1.bf16.msra.mxu0 %v9983_v15  ;;  %7460 = vmatpush1.bf16.msra.mxu1 %v9986_v63  ;;  %v10070_v15 = vld [vmem:[#allocation16 + $0x300] ss:$16 sps:$4 sm:$0xff]   ;;  %v10075_v63 = vld [vmem:[#allocation16 + $0x124] ss:$16 sps:$4 sm:$0xff]  }
 0x67d   :  { %7379 = vmatprep.subr.bf16.mxu0 %v9991_v43  ;;  %7461 = vmatprep.subr.bf16.mxu1 %v9994_v4  ;;  %v10078_v43 = vld [vmem:[#allocation16 + $0x324] ss:$16 sps:$4 sm:$0xff]   ;;  %v10073_v4 = vld [vmem:[#allocation16 + $0x120] ss:$16 sps:$4 sm:$0xff]  }
 0x680   :  { %7380 = vmatpush1.bf16.msra.mxu0 %v9989_v41  ;;  %7462 = vmatpush1.bf16.msra.mxu1 %v9992_v3  ;;  %v10076_v41 = vld [vmem:[#allocation16 + $0x320] ss:$16 sps:$4 sm:$0xff]   ;;  %v6526_v3 = vld [vmem:[#allocation14] sm:$0xf] }
 0x681   :  { %7381 = vmatprep.subr.bf16.mxu0 %v9997_v18  ;;  %7463 = vmatprep.subr.bf16.mxu1 %v10000_v37  ;;  %v6531_v18 = vrot.slane %v6526_v3, %v10805_v24  ;;  %v6539_v37 = vrot.slane %v6526_v3, %v10989_v6 }
 0x684   :  { %7382 = vmatpush1.bf16.msra.mxu0 %v9995_v13  ;;  %7464 = vmatpush1.bf16.msra.mxu1 %v9998_v44  ;;  %v6535_v13 = vrot.slane %v6526_v3, %v10802_v23 }
 0x685   :  { %7383 = vmatprep.subr.bf16.mxu0 %v10003_v12  ;;  %7465 = vmatprep.subr.bf16.mxu1 %v10006_v53  ;;  %v6543_v53 = vrot.slane %v6526_v3, %v10808_v25 }
 0x688   :  { %7384 = vmatpush1.bf16.msra.mxu0 %v10001_v14  ;;  %7466 = vmatpush1.bf16.msra.mxu1 %v10004_v20 }
 0x689   :  { %7385 = vmatprep.subr.bf16.mxu0 %v10009_v22  ;;  %7467 = vmatprep.subr.bf16.mxu1 %v10012_v55 }
 0x68c   :  { %7386 = vmatpush1.bf16.msra.mxu0 %v10007_v45  ;;  %7468 = vmatpush1.bf16.msra.mxu1 %v10010_v40 }
 0x68d   :  { %7387 = vmatprep.subr.bf16.mxu0 %v10015_v8  ;;  %7469 = vmatprep.subr.bf16.mxu1 %v10018_v39 }
 0x690   :  { %7388 = vmatpush1.bf16.msra.mxu0 %v10013_v62  ;;  %7470 = vmatpush1.bf16.msra.mxu1 %v10016_v0 }
 0x691   :  { %8354 = vmatprep.subr.bf16.mxu0 %v10021_v11  ;;  %8395 = vmatprep.subr.bf16.mxu1 %v10024_v27 }
 0x693   :  { %7390 = vmatmul.mubr.bf16.vlgmr.msra.gmra.mrb[60].mxu0 %v6670_v30  ;;  %7472 = vmatmul.mubr.bf16.vlgmr.msra.gmra.mrb[64].mxu1 %v6670_v30 }
 0x694   :  { %8355 = vmatpush1.bf16.msra.mxu0 %v10019_v28  ;;  %8396 = vmatpush1.bf16.msra.mxu1 %v10022_v49 }
 0x695   :  { %8356 = vmatprep.subr.bf16.mxu0 %v10027_v46  ;;  %8397 = vmatprep.subr.bf16.mxu1 %v10030_v7 }
 0x698   :  { %8357 = vmatpush1.bf16.msra.mxu0 %v10025_v29  ;;  %8398 = vmatpush1.bf16.msra.mxu1 %v10028_v31 }
 0x699   :  { %8358 = vmatprep.subr.bf16.mxu0 %v10033_v35  ;;  %8399 = vmatprep.subr.bf16.mxu1 %v10036_v38  ;;  %v10079_v38 = vld [vmem:[#allocation16 + $0x140] ss:$16 sps:$4 sm:$0xff]  }
 0x69c   :  { %8359 = vmatpush1.bf16.msra.mxu0 %v10031_v60  ;;  %8400 = vmatpush1.bf16.msra.mxu1 %v10034_v47  ;;  %v10081_v60 = vld [vmem:[#allocation16 + $0x144] ss:$16 sps:$4 sm:$0xff]   ;;  %v10082_v47 = vld [vmem:[#allocation16 + $0x340] ss:$16 sps:$4 sm:$0xff]  }
 0x69d   :  { %8360 = vmatprep.subr.bf16.mxu0 %v10039_v19  ;;  %8401 = vmatprep.subr.bf16.mxu1 %v10042_v33  ;;  %v10084_v19 = vld [vmem:[#allocation16 + $0x344] ss:$16 sps:$4 sm:$0xff]  }
 0x69e   :  { %v10087_v33 = vld [vmem:[#allocation16 + $0x164] ss:$16 sps:$4 sm:$0xff]  }
 0x6a0   :  { %8361 = vmatpush1.bf16.msra.mxu0 %v10037_v36  ;;  %8402 = vmatpush1.bf16.msra.mxu1 %v10040_v42  ;;  %v10090_v36 = vld [vmem:[#allocation16 + $0x364] ss:$16 sps:$4 sm:$0xff]   ;;  %v10085_v42 = vld [vmem:[#allocation16 + $0x160] ss:$16 sps:$4 sm:$0xff]  }
 0x6a1   :  { %8362 = vmatprep.subr.bf16.mxu0 %v10045_v5  ;;  %8403 = vmatprep.subr.bf16.mxu1 %v10048_v10  ;;  %v10088_v5 = vld [vmem:[#allocation16 + $0x360] ss:$16 sps:$4 sm:$0xff]   ;;  %v10093_v10 = vld [vmem:[#allocation16 + $0x184] ss:$16 sps:$4 sm:$0xff]  }
 0x6a4   :  { %8363 = vmatpush1.bf16.msra.mxu0 %v10043_v61  ;;  %8404 = vmatpush1.bf16.msra.mxu1 %v10046_v17  ;;  %v10096_v61 = vld [vmem:[#allocation16 + $0x384] ss:$16 sps:$4 sm:$0xff]   ;;  %v10091_v17 = vld [vmem:[#allocation16 + $0x180] ss:$16 sps:$4 sm:$0xff]  }
 0x6a5   :  { %8364 = vmatprep.subr.bf16.mxu0 %v10051_v16  ;;  %8405 = vmatprep.subr.bf16.mxu1 %v10054_v32  ;;  %v10094_v16 = vld [vmem:[#allocation16 + $0x380] ss:$16 sps:$4 sm:$0xff]   ;;  %v10099_v32 = vld [vmem:[#allocation16 + $0x1a4] ss:$16 sps:$4 sm:$0xff]  }
 0x6a8   :  { %8365 = vmatpush1.bf16.msra.mxu0 %v10049_v48  ;;  %8406 = vmatpush1.bf16.msra.mxu1 %v10052_v59  ;;  %v10102_v48 = vld [vmem:[#allocation16 + $0x3a4] ss:$16 sps:$4 sm:$0xff]   ;;  %v10097_v59 = vld [vmem:[#allocation16 + $0x1a0] ss:$16 sps:$4 sm:$0xff]  }
 0x6a9   :  { %8366 = vmatprep.subr.bf16.mxu0 %v10057_v1  ;;  %8407 = vmatprep.subr.bf16.mxu1 %v10060_v54  ;;  %v10100_v1 = vld [vmem:[#allocation16 + $0x3a0] ss:$16 sps:$4 sm:$0xff]   ;;  %v10105_v54 = vld [vmem:[#allocation16 + $0x1c4] ss:$16 sps:$4 sm:$0xff]  }
 0x6ac   :  { %8367 = vmatpush1.bf16.msra.mxu0 %v10055_v52  ;;  %8408 = vmatpush1.bf16.msra.mxu1 %v10058_v2  ;;  %v10108_v52 = vld [vmem:[#allocation16 + $0x3c4] ss:$16 sps:$4 sm:$0xff]   ;;  %v10103_v2 = vld [vmem:[#allocation16 + $0x1c0] ss:$16 sps:$4 sm:$0xff]  }
 0x6ad   :  { %8368 = vmatprep.subr.bf16.mxu0 %v10063_v51  ;;  %8409 = vmatprep.subr.bf16.mxu1 %v10066_v56  ;;  %v10106_v51 = vld [vmem:[#allocation16 + $0x3c0] ss:$16 sps:$4 sm:$0xff]   ;;  %v10111_v56 = vld [vmem:[#allocation16 + $0x1e4] ss:$16 sps:$4 sm:$0xff]  }
 0x6b0   :  { %8369 = vmatpush1.bf16.msra.mxu0 %v10061_v26  ;;  %8410 = vmatpush1.bf16.msra.mxu1 %v10064_v50  ;;  %v10114_v26 = vld [vmem:[#allocation16 + $0x3e4] ss:$16 sps:$4 sm:$0xff]   ;;  %v10109_v50 = vld [vmem:[#allocation16 + $0x1e0] ss:$16 sps:$4 sm:$0xff]  }
 0x6b1   :  { %8370 = vmatprep.subr.bf16.mxu0 %v10069_v9  ;;  %8411 = vmatprep.subr.bf16.mxu1 %v10072_v34  ;;  %v10112_v9 = vld [vmem:[#allocation16 + $0x3e0] ss:$16 sps:$4 sm:$0xff]   ;;  %v10117_v34 = vld [vmem:[#allocation16 + $0xc] ss:$16 sps:$4 sm:$0xff]  }
 0x6b4   :  { %8371 = vmatpush1.bf16.msra.mxu0 %v10067_v21  ;;  %8412 = vmatpush1.bf16.msra.mxu1 %v10070_v15  ;;  %v10120_v21 = vld [vmem:[#allocation16 + $0x20c] ss:$16 sps:$4 sm:$0xff]  }
 0x6b5   :  { %8372 = vmatprep.subr.bf16.mxu0 %v10075_v63  ;;  %8413 = vmatprep.subr.bf16.mxu1 %v10078_v43 }
 0x6b8   :  { %8373 = vmatpush1.bf16.msra.mxu0 %v10073_v4  ;;  %8414 = vmatpush1.bf16.msra.mxu1 %v10076_v41 }
 0x6b9   :  { %8374 = vmatprep.subr.bf16.mxu0 %v10081_v60  ;;  %8415 = vmatprep.subr.bf16.mxu1 %v10084_v19 }
 0x6bc   :  { %8375 = vmatpush1.bf16.msra.mxu0 %v10079_v38  ;;  %8416 = vmatpush1.bf16.msra.mxu1 %v10082_v47 }
 0x6bd   :  { %8376 = vmatprep.subr.bf16.mxu0 %v10087_v33  ;;  %8417 = vmatprep.subr.bf16.mxu1 %v10090_v36  ;;  %v10115_v33 = vld [vmem:[#allocation16 + $0x8] ss:$16 sps:$4 sm:$0xff]  }
 0x6be   :  { %v10118_v36 = vld [vmem:[#allocation16 + $0x208] ss:$16 sps:$4 sm:$0xff]  }
 0x6c0   :  { %8377 = vmatpush1.bf16.msra.mxu0 %v10085_v42  ;;  %8418 = vmatpush1.bf16.msra.mxu1 %v10088_v5 }
 0x6c1   :  { %8378 = vmatprep.subr.bf16.mxu0 %v10093_v10  ;;  %8419 = vmatprep.subr.bf16.mxu1 %v10096_v61  ;;  %v10123_v10 = vld [vmem:[#allocation16 + $0x2c] ss:$16 sps:$4 sm:$0xff]  }
 0x6c2   :  { %v10126_v61 = vld [vmem:[#allocation16 + $0x22c] ss:$16 sps:$4 sm:$0xff]  }
 0x6c4   :  { %8379 = vmatpush1.bf16.msra.mxu0 %v10091_v17  ;;  %8420 = vmatpush1.bf16.msra.mxu1 %v10094_v16  ;;  %v10121_v17 = vld [vmem:[#allocation16 + $0x28] ss:$16 sps:$4 sm:$0xff]  }
 0x6c5   :  { %8380 = vmatprep.subr.bf16.mxu0 %v10099_v32  ;;  %8421 = vmatprep.subr.bf16.mxu1 %v10102_v48  ;;  %v10124_v16 = vld [vmem:[#allocation16 + $0x228] ss:$16 sps:$4 sm:$0xff]   ;;  %v10129_v32 = vld [vmem:[#allocation16 + $0x4c] ss:$16 sps:$4 sm:$0xff]  }
 0x6c6   :  { %v10132_v48 = vld [vmem:[#allocation16 + $0x24c] ss:$16 sps:$4 sm:$0xff]  }
 0x6c8   :  { %8381 = vmatpush1.bf16.msra.mxu0 %v10097_v59  ;;  %8422 = vmatpush1.bf16.msra.mxu1 %v10100_v1  ;;  %v10127_v59 = vld [vmem:[#allocation16 + $0x48] ss:$16 sps:$4 sm:$0xff]  }
 0x6c9   :  { %8382 = vmatprep.subr.bf16.mxu0 %v10105_v54  ;;  %8423 = vmatprep.subr.bf16.mxu1 %v10108_v52  ;;  %v10130_v1 = vld [vmem:[#allocation16 + $0x248] ss:$16 sps:$4 sm:$0xff]   ;;  %v10135_v54 = vld [vmem:[#allocation16 + $0x6c] ss:$16 sps:$4 sm:$0xff]  }
 0x6ca   :  { %v10138_v52 = vld [vmem:[#allocation16 + $0x26c] ss:$16 sps:$4 sm:$0xff]  }
 0x6cc   :  { %8383 = vmatpush1.bf16.msra.mxu0 %v10103_v2  ;;  %8424 = vmatpush1.bf16.msra.mxu1 %v10106_v51  ;;  %v10133_v2 = vld [vmem:[#allocation16 + $0x68] ss:$16 sps:$4 sm:$0xff]  }
 0x6cd   :  { %8384 = vmatprep.subr.bf16.mxu0 %v10111_v56  ;;  %8425 = vmatprep.subr.bf16.mxu1 %v10114_v26  ;;  %v10136_v51 = vld [vmem:[#allocation16 + $0x268] ss:$16 sps:$4 sm:$0xff]   ;;  %v10141_v56 = vld [vmem:[#allocation16 + $0x8c] ss:$16 sps:$4 sm:$0xff]  }
 0x6ce   :  { %v10144_v26 = vld [vmem:[#allocation16 + $0x28c] ss:$16 sps:$4 sm:$0xff]  }
 0x6d0   :  { %8385 = vmatpush1.bf16.msra.mxu0 %v10109_v50  ;;  %8426 = vmatpush1.bf16.msra.mxu1 %v10112_v9  ;;  %v10139_v50 = vld [vmem:[#allocation16 + $0x88] ss:$16 sps:$4 sm:$0xff]  }
 0x6d1   :  { %8436 = vmatprep.subr.bf16.mxu0 %v10117_v34  ;;  %8477 = vmatprep.subr.bf16.mxu1 %v10120_v21  ;;  %v10142_v9 = vld [vmem:[#allocation16 + $0x288] ss:$16 sps:$4 sm:$0xff]   ;;  %v10147_v34 = vld [vmem:[#allocation16 + $0xac] ss:$16 sps:$4 sm:$0xff]  }
 0x6d2   :  { %v10150_v21 = vld [vmem:[#allocation16 + $0x2ac] ss:$16 sps:$4 sm:$0xff]  }
 0x766   :  { %v7391_v44 = vpop.f32.mrb[60].mxu0  ;;  %v7473_v12 = vpop.f32.mrb[64].mxu1 }
 0x767   :  { %v11520_v14 = vadd.f32 %v7391_v44, %v6531_v18  ;;  %v7393_v20 = vpop.f32.mrb[61].mxu0  ;;  %v7475_v22 = vpop.f32.mrb[65].mxu1  ;;  %v11522_v55 = vadd.f32 %v7473_v12, %v6539_v37  ;;  %v7480_v37 = vld [vmem:[%s11645_s4] sm:$0xf] }
 0x768   :  { %v11524_v45 = vadd.f32 %v7393_v20, %v6535_v13  ;;  %v7395_v40 = vpop.f32.mrb[62].mxu0  ;;  %v7477_v8 = vpop.f32.mrb[66].mxu1  ;;  %v11532_v11 = vadd.f32 %v7475_v22, %v6543_v53  ;;  %v7481_v13 = vld [vmem:[%s11646_s5] sm:$0xf]  ;;  %v7518_v44 = vrot.slane %v7480_v37, %v10802_v23  ;;  %v7526_v12 = vrot.slane %v7480_v37, %v10808_v25 }
 0x769   :  { %v7488_v39 = vmul.f32 %v11520_v14, %v11520_v14  ;;  %v7396_v62 = vpop.f32.mrb[63].mxu0  ;;  %v7478_v0 = vpop.f32.mrb[67].mxu1  ;;  %v7490_v49 = vmul.f32 %v11522_v55, %v11522_v55  ;;  %v7514_v53 = vrot.slane %v7480_v37, %v10805_v24  ;;  %v7522_v20 = vrot.slane %v7480_v37, %v10989_v6  ;;  %v10162_v37 = vld [vmem:[#allocation16 + $0x2ec] ss:$16 sps:$4 sm:$0xff]  }
 0x76a   :  { %v7482_v30 = vadd.f32 %v11524_v45, %v11520_v14  ;;  %v7489_v28 = vmul.f32 %v11524_v45, %v11524_v45  ;;  %v7491_v29 = vmul.f32 %v11532_v11, %v11532_v11  ;;  %v7543_v0 = vrot.slane %v7481_v13, %v10802_v23 }
 0x76c   :  { %v7483_v27 = vadd.f32 %v11522_v55, %v7482_v30  ;;  %v7492_v46 = vadd.f32 %v7489_v28, %v7488_v39  ;;  %v7551_v30 = vrot.slane %v7481_v13, %v10808_v25  ;;  %v7539_v28 = vrot.slane %v7481_v13, %v10805_v24 }
 0x76e   :  { %v7484_v7 = vadd.f32 %v11532_v11, %v7483_v27  ;;  %v7493_v31 = vadd.f32 %v7492_v46, %v7490_v49  ;;  %v7547_v49 = vrot.slane %v7481_v13, %v10989_v6  ;;  %v10157_v13 = vld [vmem:[#allocation16 + $0xe8] ss:$16 sps:$4 sm:$0xff]  }
 0x770   :  { %7485 = vadd.xlane.f32.xlu0 %v7484_v7  ;;  %v7494_v35 = vadd.f32 %v7493_v31, %v7491_v29 }
 0x772   :  { %7495 = vadd.xlane.f32.xlu1 %v7494_v35 }
 0x7fd   :  { %v7486_v15 = vpop.xlane.xlu0 %7485 }
 0x7fe   :  { %v7487_v63 = vmul.f32 0.001953125, %v7486_v15  ;;  %v10145_v15 = vld [vmem:[#allocation16 + $0xa8] ss:$16 sps:$4 sm:$0xff]  }
 0x7ff   :  { %v7496_v43 = vpop.xlane.xlu1 %7495 }
 0x800   :  { %v7497_v4 = vmul.f32 0.001953125, %v7496_v43  ;;  %v7498_v41 = vmul.f32 %v7487_v63, %v7487_v63  ;;  %v7500_v22 = vsub.f32 %v11520_v14, %v7487_v63  ;;  %v7502_v40 = vsub.f32 %v11522_v55, %v7487_v63  ;;  %v10153_v43 = vld [vmem:[#allocation16 + $0xcc] ss:$16 sps:$4 sm:$0xff]  }
 0x801   :  { %v7501_v8 = vsub.f32 %v11524_v45, %v7487_v63  ;;  %v7503_v39 = vsub.f32 %v11532_v11, %v7487_v63  ;;  %v10148_v63 = vld [vmem:[#allocation16 + $0x2a8] ss:$16 sps:$4 sm:$0xff]  }
 0x802   :  { %v7499_v3 = vsub.f32 %v7497_v4, %v7498_v41  ;;  %v10156_v4 = vld [vmem:[#allocation16 + $0x2cc] ss:$16 sps:$4 sm:$0xff]   ;;  %v10151_v41 = vld [vmem:[#allocation16 + $0xc8] ss:$16 sps:$4 sm:$0xff]  }
 0x804   :  { %v7504_v18 = vadd.f32 1e-05, %v7499_v3  ;;  %v10154_v3 = vld [vmem:[#allocation16 + $0x2c8] ss:$16 sps:$4 sm:$0xff]  }
 0x806   :  { %10247 = vrsqrt.f32 %v7504_v18  ;;  %v10159_v18 = vld [vmem:[#allocation16 + $0xec] ss:$16 sps:$4 sm:$0xff]  }
 0x810   :  { %v10248_v62 = vpop.eup %10247 }
 0x811   :  { %v7507_v27 = vmul.f32 %v10248_v62, %v7501_v8  ;;  %v7509_v46 = vmul.f32 %v10248_v62, %v7503_v39  ;;  %v7506_v7 = vmul.f32 %v10248_v62, %v7500_v22  ;;  %v7508_v29 = vmul.f32 %v10248_v62, %v7502_v40  ;;  %v10166_v22 = vld [vmem:[#allocation16 + $0x308] ss:$16 sps:$4 sm:$0xff]   ;;  %v10171_v40 = vld [vmem:[#allocation16 + $0x12c] ss:$16 sps:$4 sm:$0xff]  }
 0x812   :  { %v10174_v8 = vld [vmem:[#allocation16 + $0x32c] ss:$16 sps:$4 sm:$0xff]   ;;  %v10169_v39 = vld [vmem:[#allocation16 + $0x128] ss:$16 sps:$4 sm:$0xff]  }
 0x813   :  { %v7532_v14 = vmul.f32 %v7518_v44, %v7507_v27  ;;  %v7534_v31 = vmul.f32 %v7526_v12, %v7509_v46  ;;  %v7531_v55 = vmul.f32 %v7514_v53, %v7506_v7  ;;  %v7533_v35 = vmul.f32 %v7522_v20, %v7508_v29  ;;  %v10160_v44 = vld [vmem:[#allocation16 + $0x2e8] ss:$16 sps:$4 sm:$0xff]   ;;  %v10165_v12 = vld [vmem:[#allocation16 + $0x10c] ss:$16 sps:$4 sm:$0xff]  }
 0x814   :  { %v10168_v53 = vld [vmem:[#allocation16 + $0x30c] ss:$16 sps:$4 sm:$0xff]   ;;  %v10163_v20 = vld [vmem:[#allocation16 + $0x108] ss:$16 sps:$4 sm:$0xff]  }
 0x815   :  { %v11558_v45 = vadd.f32 %v7543_v0, %v7532_v14  ;;  %v11560_v11 = vadd.f32 %v7551_v30, %v7534_v31  ;;  %v11562_v38 = vadd.f32 %v7539_v28, %v7531_v55  ;;  %v11564_v60 = vadd.f32 %v7547_v49, %v7533_v35  ;;  %v10172_v62 = vld [vmem:[#allocation16 + $0x328] ss:$16 sps:$4 sm:$0xff]   ;;  %v10177_v0 = vld [vmem:[#allocation16 + $0x14c] ss:$16 sps:$4 sm:$0xff]  }
 0x816   :  { %v10180_v30 = vld [vmem:[#allocation16 + $0x34c] ss:$16 sps:$4 sm:$0xff]   ;;  %v10175_v28 = vld [vmem:[#allocation16 + $0x148] ss:$16 sps:$4 sm:$0xff]  }
 0x817   :  { %v7561_v47 = vpack.c.bf16 %v11558_v45, %v11558_v45  ;;  %v7563_v19 = vpack.c.bf16 %v11560_v11, %v11560_v11  ;;  %v11572_v42 = vpack.c.bf16 %v11562_v38, %v11562_v38  ;;  %v11576_v5 = vpack.c.bf16 %v11564_v60, %v11564_v60  ;;  %v10178_v49 = vld [vmem:[#allocation16 + $0x348] ss:$16 sps:$4 sm:$0xff]   ;;  %v10183_v27 = vld [vmem:[#allocation16 + $0x16c] ss:$16 sps:$4 sm:$0xff]  }
 0x818   :  { %v10186_v46 = vld [vmem:[#allocation16 + $0x36c] ss:$16 sps:$4 sm:$0xff]   ;;  %v10181_v7 = vld [vmem:[#allocation16 + $0x168] ss:$16 sps:$4 sm:$0xff]  }
 0x819   :  { %8386 = vmatprep.mubr.bf16.mxu0 %v7561_v47  ;;  %8427 = vmatprep.mubr.bf16.mxu1 %v7563_v19  ;;  %v10184_v29 = vld [vmem:[#allocation16 + $0x368] ss:$16 sps:$4 sm:$0xff]   ;;  %v10189_v14 = vld [vmem:[#allocation16 + $0x18c] ss:$16 sps:$4 sm:$0xff]  }
 0x81a   :  { %8387 = vmatmul.mubr.bf16.vlgmr.msra.gmra.mrb[64].mxu0 %v11572_v42  ;;  %8428 = vmatmul.mubr.bf16.vlgmr.msra.gmra.mrb[68].mxu1 %v11576_v5  ;;  %v10192_v31 = vld [vmem:[#allocation16 + $0x38c] ss:$16 sps:$4 sm:$0xff]   ;;  %v10187_v55 = vld [vmem:[#allocation16 + $0x188] ss:$16 sps:$4 sm:$0xff]  }
 0x81b   :  { %8437 = vmatpush1.bf16.msra.mxu0 %v10115_v33  ;;  %8478 = vmatpush1.bf16.msra.mxu1 %v10118_v36  ;;  %v10190_v35 = vld [vmem:[#allocation16 + $0x388] ss:$16 sps:$4 sm:$0xff]  }
 0x81c   :  { %8468 = vmatprep.mubr.bf16.mxu0 %v7561_v47  ;;  %8509 = vmatprep.mubr.bf16.mxu1 %v7563_v19  ;;  %v10195_v47 = vld [vmem:[#allocation16 + $0x1ac] ss:$16 sps:$4 sm:$0xff]   ;;  %v10193_v33 = vld [vmem:[#allocation16 + $0x1a8] ss:$16 sps:$4 sm:$0xff]  }
 0x81d   :  { %8438 = vmatprep.subr.bf16.mxu0 %v10123_v10  ;;  %8479 = vmatprep.subr.bf16.mxu1 %v10126_v61  ;;  %v10198_v19 = vld [vmem:[#allocation16 + $0x3ac] ss:$16 sps:$4 sm:$0xff]   ;;  %v10196_v36 = vld [vmem:[#allocation16 + $0x3a8] ss:$16 sps:$4 sm:$0xff]  }
 0x81e   :  { %v10201_v10 = vld [vmem:[#allocation16 + $0x1cc] ss:$16 sps:$4 sm:$0xff]  }
 0x81f   :  { %8439 = vmatpush1.bf16.msra.mxu0 %v10121_v17  ;;  %8480 = vmatpush1.bf16.msra.mxu1 %v10124_v16  ;;  %v10204_v61 = vld [vmem:[#allocation16 + $0x3cc] ss:$16 sps:$4 sm:$0xff]   ;;  %v10199_v17 = vld [vmem:[#allocation16 + $0x1c8] ss:$16 sps:$4 sm:$0xff]  }
 0x820   :  { %8440 = vmatprep.subr.bf16.mxu0 %v10129_v32  ;;  %8481 = vmatprep.subr.bf16.mxu1 %v10132_v48  ;;  %v10202_v16 = vld [vmem:[#allocation16 + $0x3c8] ss:$16 sps:$4 sm:$0xff]   ;;  %v10207_v32 = vld [vmem:[#allocation16 + $0x1ec] ss:$16 sps:$4 sm:$0xff]  }
 0x821   :  { %v10210_v48 = vld [vmem:[#allocation16 + $0x3ec] ss:$16 sps:$4 sm:$0xff]  }
 0x823   :  { %8441 = vmatpush1.bf16.msra.mxu0 %v10127_v59  ;;  %8482 = vmatpush1.bf16.msra.mxu1 %v10130_v1  ;;  %v10205_v59 = vld [vmem:[#allocation16 + $0x1e8] ss:$16 sps:$4 sm:$0xff]  }
 0x824   :  { %8442 = vmatprep.subr.bf16.mxu0 %v10135_v54  ;;  %8483 = vmatprep.subr.bf16.mxu1 %v10138_v52  ;;  %v10208_v1 = vld [vmem:[#allocation16 + $0x3e8] ss:$16 sps:$4 sm:$0xff]   ;;  %v7692_v54 = vld [vmem:[#allocation17] sm:$0xf] }
 0x825   :  { %v7697_v52 = vrot.slane %v7692_v54, %v10805_v24 }
 0x827   :  { %8443 = vmatpush1.bf16.msra.mxu0 %v10133_v2  ;;  %8484 = vmatpush1.bf16.msra.mxu1 %v10136_v51  ;;  %v7701_v2 = vrot.slane %v7692_v54, %v10802_v23 }
 0x828   :  { %8444 = vmatprep.subr.bf16.mxu0 %v10141_v56  ;;  %8485 = vmatprep.subr.bf16.mxu1 %v10144_v26 }
 0x82b   :  { %8445 = vmatpush1.bf16.msra.mxu0 %v10139_v50  ;;  %8486 = vmatpush1.bf16.msra.mxu1 %v10142_v9 }
 0x82c   :  { %8446 = vmatprep.subr.bf16.mxu0 %v10147_v34  ;;  %8487 = vmatprep.subr.bf16.mxu1 %v10150_v21 }
 0x82f   :  { %8447 = vmatpush1.bf16.msra.mxu0 %v10145_v15  ;;  %8488 = vmatpush1.bf16.msra.mxu1 %v10148_v63 }
 0x830   :  { %8448 = vmatprep.subr.bf16.mxu0 %v10153_v43  ;;  %8489 = vmatprep.subr.bf16.mxu1 %v10156_v4 }
 0x833   :  { %8449 = vmatpush1.bf16.msra.mxu0 %v10151_v41  ;;  %8490 = vmatpush1.bf16.msra.mxu1 %v10154_v3 }
 0x834   :  { %8450 = vmatprep.subr.bf16.mxu0 %v10159_v18  ;;  %8491 = vmatprep.subr.bf16.mxu1 %v10162_v37 }
 0x837   :  { %8451 = vmatpush1.bf16.msra.mxu0 %v10157_v13  ;;  %8492 = vmatpush1.bf16.msra.mxu1 %v10160_v44 }
 0x838   :  { %8452 = vmatprep.subr.bf16.mxu0 %v10165_v12  ;;  %8493 = vmatprep.subr.bf16.mxu1 %v10168_v53 }
 0x83b   :  { %8453 = vmatpush1.bf16.msra.mxu0 %v10163_v20  ;;  %8494 = vmatpush1.bf16.msra.mxu1 %v10166_v22 }
 0x83c   :  { %8454 = vmatprep.subr.bf16.mxu0 %v10171_v40  ;;  %8495 = vmatprep.subr.bf16.mxu1 %v10174_v8  ;;  %v8602_v8 = vmul.f32 %v10859_v58, %v10859_v58 }
 0x83f   :  { %8455 = vmatpush1.bf16.msra.mxu0 %v10169_v39  ;;  %8496 = vmatpush1.bf16.msra.mxu1 %v10172_v62 }
 0x840   :  { %8456 = vmatprep.subr.bf16.mxu0 %v10177_v0  ;;  %8497 = vmatprep.subr.bf16.mxu1 %v10180_v30  ;;  %v8603_v30 = vmul.f32 %v10856_v57, %v10856_v57 }
 0x843   :  { %8457 = vmatpush1.bf16.msra.mxu0 %v10175_v28  ;;  %8498 = vmatpush1.bf16.msra.mxu1 %v10178_v49 }
 0x844   :  { %8458 = vmatprep.subr.bf16.mxu0 %v10183_v27  ;;  %8499 = vmatprep.subr.bf16.mxu1 %v10186_v46 }
 0x847   :  { %8459 = vmatpush1.bf16.msra.mxu0 %v10181_v7  ;;  %8500 = vmatpush1.bf16.msra.mxu1 %v10184_v29 }
 0x848   :  { %8460 = vmatprep.subr.bf16.mxu0 %v10189_v14  ;;  %8501 = vmatprep.subr.bf16.mxu1 %v10192_v31  ;;  %v8606_v31 = vadd.f32 %v8603_v30, %v8602_v8 }
 0x84b   :  { %8461 = vmatpush1.bf16.msra.mxu0 %v10187_v55  ;;  %8502 = vmatpush1.bf16.msra.mxu1 %v10190_v35 }
 0x84c   :  { %8462 = vmatprep.subr.bf16.mxu0 %v10195_v47  ;;  %8503 = vmatprep.subr.bf16.mxu1 %v10198_v19  ;;  %v11669_v19 = vld [vmem:[#allocation28_spill] sm:$0xff] }
 0x84f   :  { %8463 = vmatpush1.bf16.msra.mxu0 %v10193_v33  ;;  %8504 = vmatpush1.bf16.msra.mxu1 %v10196_v36  ;;  %v8604_v33 = vmul.f32 %v11669_v19, %v11669_v19 }
 0x850   :  { %8464 = vmatprep.subr.bf16.mxu0 %v10201_v10  ;;  %8505 = vmatprep.subr.bf16.mxu1 %v10204_v61 }
 0x851   :  { %v8607_v10 = vadd.f32 %v8606_v31, %v8604_v33 }
 0x853   :  { %8465 = vmatpush1.bf16.msra.mxu0 %v10199_v17  ;;  %8506 = vmatpush1.bf16.msra.mxu1 %v10202_v16 }
 0x854   :  { %8466 = vmatprep.subr.bf16.mxu0 %v10207_v32  ;;  %8507 = vmatprep.subr.bf16.mxu1 %v10210_v48 }
 0x857   :  { %8467 = vmatpush1.bf16.msra.mxu0 %v10205_v59  ;;  %8508 = vmatpush1.bf16.msra.mxu1 %v10208_v1 }
 0x85a   :  { %8469 = vmatmul.mubr.bf16.vlgmr.msra.gmra.mrb[68].mxu0 %v11572_v42  ;;  %8510 = vmatmul.mubr.bf16.vlgmr.msra.gmra.mrb[72].mxu1 %v11576_v5  ;;  %v7705_v42 = vrot.slane %v7692_v54, %v10989_v6  ;;  %v7709_v5 = vrot.slane %v7692_v54, %v10808_v25 }
 0x8ed   :  { %v8388_v51 = vpop.f32.mrb[64].mxu0  ;;  %v8429_v56 = vpop.f32.mrb[68].mxu1 }
 0x8ee   :  { %v8389_v26 = vadd.f32 %v8388_v51, %v7697_v52  ;;  %v8390_v50 = vpop.f32.mrb[65].mxu0  ;;  %v8431_v9 = vpop.f32.mrb[69].mxu1  ;;  %v8522_v51 = vld [vmem:[%s11647_s6] sm:$0xf]  ;;  %s10563_s6 = smov [#allocation19]  }
 0x8ef   :  { %v8391_v34 = vadd.f32 %v8390_v50, %v7701_v2  ;;  %v8392_v21 = vpop.f32.mrb[66].mxu0  ;;  %v8433_v15 = vpop.f32.mrb[70].mxu1  ;;  %v8560_v50 = vrot.slane %v8522_v51, %v10802_v23 }
 0x8f0   :  { %v8430_v63 = vadd.f32 %v8429_v56, %v8389_v26  ;;  %v8393_v43 = vpop.f32.mrb[67].mxu0  ;;  %v8434_v4 = vpop.f32.mrb[71].mxu1  ;;  %v8523_v56 = vld [vmem:[%s11648_s7] sm:$0xf]  ;;  %v8556_v26 = vrot.slane %v8522_v51, %v10805_v24  ;;  %s8779_s7 = sshll.u32 %s10563_s6, 4  ;;  %s8780_s7 = int_to_ptr.vmem [resolvable:$true] %s8779_s7 }
 0x8f1   :  { %v8432_v41 = vadd.f32 %v8431_v9, %v8391_v34  ;;  %v8564_v9 = vrot.slane %v8522_v51, %v10989_v6  ;;  %v8568_v34 = vrot.slane %v8522_v51, %v10808_v25  ;;  %s10511_s25 = scalar_lea.vmem %s8780_s7, 128  ;;  %p10516_p11 = scmp.lt.s32.totalorder %s8780_s7, %s8780_s7 }
 0x8f2   :  { %v11587_v3 = vadd.f32 %v8430_v63, %v11562_v38  ;;  %p10512_p10 = scmp.ne.s32.totalorder %s8780_s7, %s10511_s25  ;;  %p10517_p12 = scmp.lt.s32.totalorder %s10511_s25, %s10511_s25 }
 0x8f3   :  { %v11590_v18 = vadd.f32 %v8432_v41, %v11558_v45 }
 0x8f4   :  { %v8530_v39 = vmul.f32 %v11587_v3, %v11587_v3  ;;  %p10518_p13 = por %p10517_p12, %p10516_p11 }
 0x8f5   :  { %v8531_v38 = vmul.f32 %v11590_v18, %v11590_v18  ;;  %v8524_v27 = vadd.f32 %v11590_v18, %v11587_v3 }
 0x8f6   :  { %p10519_p0 = pnand %p10518_p13, %p10512_p10 }
 0x8f7   :  { %v8534_v14 = vadd.f32 %v8531_v38, %v8530_v39 }
 0x92d   :  { %v8470_v37 = vpop.f32.mrb[68].mxu0  ;;  %v8511_v13 = vpop.f32.mrb[72].mxu1 }
 0x92e   :  { %v8471_v44 = vadd.f32 %v8470_v37, %v7705_v42  ;;  %v8472_v12 = vpop.f32.mrb[69].mxu0  ;;  %v8513_v53 = vpop.f32.mrb[73].mxu1  ;;  %v8585_v37 = vrot.slane %v8523_v56, %v10802_v23 }
 0x92f   :  { %v8473_v20 = vadd.f32 %v8472_v12, %v7709_v5  ;;  %v8474_v22 = vpop.f32.mrb[70].mxu0  ;;  %v8515_v40 = vpop.f32.mrb[74].mxu1  ;;  %v8581_v5 = vrot.slane %v8523_v56, %v10805_v24 }
 0x930   :  { %v8512_v62 = vadd.f32 %v8511_v13, %v8471_v44  ;;  %v8475_v45 = vpop.f32.mrb[71].mxu0  ;;  %v8516_v0 = vpop.f32.mrb[75].mxu1  ;;  %v8589_v13 = vrot.slane %v8523_v56, %v10989_v6 }
 0x931   :  { %v8514_v28 = vadd.f32 %v8513_v53, %v8473_v20 }
 0x932   :  { %v8520_v49 = vadd.f32 %v8512_v62, %v11564_v60  ;;  %v11670_v60 = vld [vmem:[#allocation27_spill] sm:$0xff] }
 0x933   :  { %v8521_v46 = vadd.f32 %v8514_v28, %v11560_v11  ;;  %v8605_v61 = vmul.f32 %v11670_v60, %v11670_v60 }
 0x934   :  { %v8525_v7 = vadd.f32 %v8524_v27, %v8520_v49  ;;  %v8532_v29 = vmul.f32 %v8520_v49, %v8520_v49 }
 0x935   :  { %v8533_v55 = vmul.f32 %v8521_v46, %v8521_v46  ;;  %v8608_v17 = vadd.f32 %v8607_v10, %v8605_v61 }
 0x936   :  { %v8526_v35 = vadd.f32 %v8525_v7, %v8521_v46  ;;  %v8535_v47 = vadd.f32 %v8534_v14, %v8532_v29 }
 0x938   :  { %8527 = vadd.xlane.f32.xlu0 %v8526_v35  ;;  %v8536_v36 = vadd.f32 %v8535_v47, %v8533_v55 }
 0x93a   :  { %8537 = vadd.xlane.f32.xlu1 %v8536_v36 }
 0x93e   :  { %8609 = vadd.xlane.f32.xlu1 %v8608_v17 }
 0x9c5   :  { %v8528_v11 = vpop.xlane.xlu0 %8527 }
 0x9c6   :  { %v8529_v16 = vmul.f32 0.001953125, %v8528_v11 }
 0x9c7   :  { %v8538_v32 = vpop.xlane.xlu1 %8537 }
 0x9c8   :  { %v8539_v48 = vmul.f32 0.001953125, %v8538_v32  ;;  %v8540_v59 = vmul.f32 %v8529_v16, %v8529_v16  ;;  %v8542_v15 = vsub.f32 %v11587_v3, %v8529_v16  ;;  %v8543_v63 = vsub.f32 %v11590_v18, %v8529_v16 }
 0x9c9   :  { %v8544_v43 = vsub.f32 %v8520_v49, %v8529_v16  ;;  %v8545_v4 = vsub.f32 %v8521_v46, %v8529_v16  ;;  %v8593_v3 = vrot.slane %v8523_v56, %v10808_v25 }
 0x9ca   :  { %v8541_v1 = vsub.f32 %v8539_v48, %v8540_v59 }
 0x9cb   :  { %v8610_v54 = vpop.xlane.xlu1 %8609 }
 0x9cc   :  { %v8611_v52 = vadd.f32 1e-12, %v8610_v54  ;;  %v8546_v2 = vadd.f32 1e-05, %v8541_v1 }
 0x9ce   :  { %10249 = vrsqrt.f32 %v8611_v52 }
 0x9cf   :  { %10251 = vrsqrt.f32 %v8546_v2 }
 0x9d8   :  { %v10250_v21 = vpop.eup %10249 }
 0x9d9   :  { %v10252_v41 = vpop.eup %10251  ;;  %v8614_v42 = vmul.f32 %v10250_v21, %v10856_v57  ;;  %v8613_v14 = vmul.f32 %v10250_v21, %v10859_v58  ;;  %v8616_v55 = vmul.f32 %v10250_v21, %v11670_v60  ;;  %v8615_v35 = vmul.f32 %v10250_v21, %v11669_v19 }
 0x9da   :  { %v8548_v44 = vmul.f32 %v10252_v41, %v8542_v15  ;;  %v8549_v12 = vmul.f32 %v10252_v41, %v8543_v63  ;;  %v8550_v53 = vmul.f32 %v10252_v41, %v8544_v43  ;;  %v8551_v20 = vmul.f32 %v10252_v41, %v8545_v4 }
 0x9db   :  { %8696 = vmatprep.mubr.f32.mxu0 %v8614_v42 }
 0x9dc   :  { %v8573_v22 = vmul.f32 %v8556_v26, %v8548_v44  ;;  %v8574_v18 = vmul.f32 %v8560_v50, %v8549_v12  ;;  %v8575_v40 = vmul.f32 %v8564_v9, %v8550_v53  ;;  %v8576_v8 = vmul.f32 %v8568_v34, %v8551_v20 }
 0x9de   :  { %v8598_v39 = vadd.f32 %v8581_v5, %v8573_v22  ;;  %v8599_v38 = vadd.f32 %v8585_v37, %v8574_v18  ;;  %v8600_v57 = vadd.f32 %v8589_v13, %v8575_v40  ;;  %v8601_v62 = vadd.f32 %v8593_v3, %v8576_v8 }
 0x9e0   :  { %v8617_v24 = vmul.f32 %v8598_v39, %v8598_v39  ;;  %v8618_v45 = vmul.f32 %v8599_v38, %v8599_v38  ;;  %v8619_v23 = vmul.f32 %v8600_v57, %v8600_v57  ;;  %v8620_v6 = vmul.f32 %v8601_v62, %v8601_v62 }
 0x9e2   :  { %v8621_v0 = vadd.f32 %v8618_v45, %v8617_v24 }
 0x9e4   :  { %v8622_v30 = vadd.f32 %v8621_v0, %v8619_v23 }
 0x9e6   :  { %v8623_v28 = vadd.f32 %v8622_v30, %v8620_v6 }
 0x9e8   :  { %8624 = vadd.xlane.f32.xlu0 %v8623_v28 }
 0xa75   :  { %v8625_v49 = vpop.xlane.xlu0 %8624 }
 0xa76   :  { %v8626_v27 = vadd.f32 1e-12, %v8625_v49 }
 0xa78   :  { %10253 = vrsqrt.f32 %v8626_v27 }
 0xa82   :  { %v10254_v25 = vpop.eup %10253 }
 0xa83   :  { %v8629_v46 = vmul.f32 %v10254_v25, %v8599_v38  ;;  %v8628_v7 = vmul.f32 %v10254_v25, %v8598_v39  ;;  %v8631_v29 = vmul.f32 %v10254_v25, %v8601_v62  ;;  %v8630_v31 = vmul.f32 %v10254_v25, %v8600_v57 }
 0xa85   :  { %8632 = vmatprep.subr.mxu0 %v8629_v46 }
 0xa86   :  { %8633 = vmatpush1.xpose.msra.mxu0 %v8628_v7 }
 0xa87   :  { %8702 = vmatprep.subr.mxu0 %v8631_v29 }
 0xa89   :  { %8697 = vmatmul.mubr.f32.vlgmr.msra.gmra.mrb[72].mxu0 %v8613_v14 }
 0xa8a   :  { %8703 = vmatpush1.xpose.msra.mxu0 %v8630_v31  ;;  %8766 = vmatprep.mubr.f32.mxu0 %v8616_v55 }
 0xa91   :  { %8767 = vmatmul.mubr.f32.vlgmr.msra.gmra.mrb[72].mxu0 %v8615_v35 }
 0xb64   :  { %v8768_v47 = vpop.f32.mrb[72].mxu0 }
 0xb65   :  { %8772 = vst.msk [vmem:[#allocation19] sm:$0xff] %vm5111_vm7, %v8768_v47  ;;  %v8770_v33 = vpop.f32.mrb[73].mxu0 }
 0xb66   :  { %10522 = shalt.err (!%p10519_p0)
}
 0xb67   :  { %s11671_s18 = sld [smem:[#allocation30_spill]] }
 0xb6d   :  { %s10523_s12 = scalar_lea.hbm %s11671_s18, 128 }
 0xb6e   :  { %p10524_p1 = scmp.ne.s32.totalorder %s11671_s18, %s10523_s12  ;;  %p10527_p2 = scmp.lt.u32.totalorder %s10523_s12, %s11671_s18 }
 0xb70   :  { %p10529_p3 = pnand %p10527_p2, %p10524_p1 }
 0xb72   :  { %10532 = shalt.err (!%p10529_p3)
}
 0xb73   :  { %8782 = dma.vmem_to_hbm [thread:$0]  %s8780_s7, 128, %s11671_s18, [#allocation4]  }
 0xb74   :  { %10545 = dma.done.wait [#allocation4], 128  }
 0xb75   :  { %10546 = vsyncadd [#allocation4], 4294967168 }
 0xb76   :  { %8786 = vsyncpa [#allocation3], 1 }
 0xb77   :  { %8787 = vsyncpa [#allocation6], 1 }
 0xb78   :  { %8788 = vsyncpa [#allocation9], 1 }
 0xb79   :  { %8789 = vsyncpa [#allocation12], 1 }
 0xb7a   :  { %8790 = vsyncpa [#allocation15], 1 }
 0xb7b   :  { %8791 = vsyncpa [#allocation18], 1 }
 0xb7c   :  { %8792 = vsyncpa [#allocation4], 1 }

</bundles_post_ra>
